<compile_context>
chip_gen: v5e
topology: v5e:2x2
jax: 0.10.0
libtpu: 0.0.40
codegen_flags: <defaults>
</compile_context>

<pallas_src>
import functools
import math

import jax
import jax.numpy as jnp
from jax.experimental import pallas as pl
from jax.experimental.pallas import tpu as pltpu


def _round_up(x, m):
    return (x + m - 1) // m * m


def _pick_tile(dim, target, align):
    """Largest `align`-aligned tile <= target that divides dim (else dim)."""
    if dim <= target:
        return dim
    t = (target // align) * align
    while t >= align:
        if dim % t == 0:
            return t
        t -= align
    return dim


# ----------------------------- Pallas kernels --------------------------------
def _fused_linear_kernel(*refs, has_ln, relu, has_residual, eps):
    """[LayerNorm] -> bf16 matmul (f32 acc) -> +bias [-> ReLU] [-> +residual]."""
    it = iter(refs)
    x_ref = next(it)
    if has_ln:
        g_ref = next(it)
        beta_ref = next(it)
    w_ref = next(it)
    b_ref = next(it)
    if has_residual:
        res_ref = next(it)
    o_ref = next(it)

    x = x_ref[...].astype(jnp.float32)
    if has_ln:
        mean = jnp.mean(x, axis=-1, keepdims=True)
        var = jnp.mean(jnp.square(x - mean), axis=-1, keepdims=True)
        x = (x - mean) * jax.lax.rsqrt(var + eps) * g_ref[...] + beta_ref[...]
    acc = jnp.dot(x.astype(jnp.bfloat16), w_ref[...].astype(jnp.bfloat16),
                  preferred_element_type=jnp.float32)
    acc = acc + b_ref[...]
    if relu:
        acc = jnp.maximum(acc, 0.0)
    if has_residual:
        acc = acc + res_ref[...].astype(jnp.float32)
    o_ref[...] = acc.astype(o_ref.dtype)


def _layernorm_kernel(x_ref, g_ref, b_ref, o_ref, *, eps):
    x = x_ref[...].astype(jnp.float32)
    mean = jnp.mean(x, axis=-1, keepdims=True)
    var = jnp.mean(jnp.square(x - mean), axis=-1, keepdims=True)
    o_ref[...] = ((x - mean) * jax.lax.rsqrt(var + eps) * g_ref[...]
                  + b_ref[...]).astype(o_ref.dtype)


def _attention_kernel(*refs, nhead, packed_qkv, has_attn_mask):
    """All heads of one batch element per grid step (lane-dense (L, E) output).

    Scores/softmax/masking are f32; the QK^T and PV matmuls take bf16 operands
    with f32 accumulation.  Per-head probabilities are averaged in-kernel so
    only an (L, S) slab goes to HBM (matches nn.MultiheadAttention's averaged
    attention weights).
    """
    it = iter(refs)
    if packed_qkv:
        qkv_ref = next(it)
    else:
        q_ref = next(it)
        kv_ref = next(it)
    amask_ref = next(it) if has_attn_mask else None
    kpad_ref = next(it)
    o_ref = next(it)
    p_ref = next(it)

    e_dim = o_ref.shape[-1]
    d_head = e_dim // nhead
    scale = 1.0 / math.sqrt(d_head)

    if packed_qkv:
        qkv = qkv_ref[...]
        q_all = qkv[:, :e_dim]
        k_all = qkv[:, e_dim:2 * e_dim]
        v_all = qkv[:, 2 * e_dim:]
    else:
        q_all = q_ref[...]
        kv = kv_ref[...]
        k_all = kv[:, :e_dim]
        v_all = kv[:, e_dim:]

    bias = kpad_ref[...].astype(jnp.float32)                 # (1, S)
    if has_attn_mask:
        bias = amask_ref[...].astype(jnp.float32) + bias     # (L, S)

    outs = []
    p_sum = None
    for h in range(nhead):
        sl = slice(h * d_head, (h + 1) * d_head)
        qh = q_all[:, sl].astype(jnp.bfloat16)
        kh = k_all[:, sl].astype(jnp.bfloat16)
        vh = v_all[:, sl].astype(jnp.bfloat16)
        s = jax.lax.dot_general(qh, kh, (((1,), (1,)), ((), ())),
                                preferred_element_type=jnp.float32)
        s = s * scale + bias
        m = jnp.max(s, axis=-1, keepdims=True)
        es = jnp.exp(s - m)
        p = es / jnp.sum(es, axis=-1, keepdims=True)
        outs.append(jnp.dot(p.astype(jnp.bfloat16), vh,
                            preferred_element_type=jnp.float32))
        p_sum = p if p_sum is None else p_sum + p
    o_ref[...] = jnp.concatenate(outs, axis=-1).astype(o_ref.dtype)
    p_ref[...] = (p_sum * (1.0 / nhead)).astype(p_ref.dtype)


# ------------------------------ kernel wrappers -------------------------------
def fused_linear_pallas(x, w, b, *, ln=None, relu=False, residual=None,
                        eps=1e-6, tile_m_max=512, tile_n_max=512):
    """y = [LN](x) @ w + b [ReLU] [+ residual].  x: (..., K), w: (K, N)."""
    shape = x.shape
    k_dim = shape[-1]
    n_dim = w.shape[1]
    x2d = x.reshape(-1, k_dim)
    m = x2d.shape[0]
    tile_m = min(tile_m_max, _round_up(m, 8))
    mp = _round_up(m, tile_m)
    needs_pad = mp != m
    if needs_pad:
        x2d = jnp.pad(x2d, ((0, mp - m), (0, 0)))
    tile_n = _pick_tile(n_dim, tile_n_max, 128)

    operands = [x2d]
    in_specs = [pl.BlockSpec((tile_m, k_dim), lambda i, j: (i, 0))]
    if ln is not None:
        g, beta = ln
        operands += [g.reshape(1, k_dim), beta.reshape(1, k_dim)]
        in_specs += [pl.BlockSpec((1, k_dim), lambda i, j: (0, 0)),
                     pl.BlockSpec((1, k_dim), lambda i, j: (0, 0))]
    operands += [w, b.reshape(1, n_dim)]
    in_specs += [pl.BlockSpec((k_dim, tile_n), lambda i, j: (0, j)),
                 pl.BlockSpec((1, tile_n), lambda i, j: (0, j))]
    if residual is not None:
        res2d = residual.reshape(-1, n_dim)
        if needs_pad:
            res2d = jnp.pad(res2d, ((0, mp - m), (0, 0)))
        operands.append(res2d)
        in_specs.append(pl.BlockSpec((tile_m, tile_n), lambda i, j: (i, j)))

    kernel = functools.partial(_fused_linear_kernel, has_ln=ln is not None,
                               relu=relu, has_residual=residual is not None,
                               eps=eps)
    out = pl.pallas_call(
        kernel,
        out_shape=jax.ShapeDtypeStruct((mp, n_dim), x.dtype),
        grid_spec=pltpu.PrefetchScalarGridSpec(
            num_scalar_prefetch=0,
            grid=(mp // tile_m, n_dim // tile_n),
            in_specs=in_specs,
            out_specs=pl.BlockSpec((tile_m, tile_n), lambda i, j: (i, j)),
        ),
        compiler_params=pltpu.CompilerParams(
            dimension_semantics=("parallel", "parallel")),
        cost_estimate=pl.CostEstimate(
            flops=2 * mp * k_dim * n_dim,
            transcendentals=0,
            bytes_accessed=4 * (mp * k_dim + k_dim * n_dim + 2 * mp * n_dim)),
    )(*operands)
    if needs_pad:
        out = out[:m]
    return out.reshape(shape[:-1] + (n_dim,))


def layernorm_pallas(x, gamma, beta, eps=1e-6, tile_m_max=512):
    shape = x.shape
    h = shape[-1]
    x2d = x.reshape(-1, h)
    m = x2d.shape[0]
    tile_m = min(tile_m_max, _round_up(m, 8))
    mp = _round_up(m, tile_m)
    needs_pad = mp != m
    if needs_pad:
        x2d = jnp.pad(x2d, ((0, mp - m), (0, 0)))
    out = pl.pallas_call(
        functools.partial(_layernorm_kernel, eps=eps),
        out_shape=jax.ShapeDtypeStruct((mp, h), x.dtype),
        grid_spec=pltpu.PrefetchScalarGridSpec(
            num_scalar_prefetch=0,
            grid=(mp // tile_m,),
            in_specs=[pl.BlockSpec((tile_m, h), lambda i: (i, 0)),
                      pl.BlockSpec((1, h), lambda i: (0, 0)),
                      pl.BlockSpec((1, h), lambda i: (0, 0))],
            out_specs=pl.BlockSpec((tile_m, h), lambda i: (i, 0)),
        ),
        compiler_params=pltpu.CompilerParams(dimension_semantics=("parallel",)),
        cost_estimate=pl.CostEstimate(
            flops=6 * mp * h, transcendentals=0, bytes_accessed=8 * mp * h),
    )(x2d, gamma.reshape(1, h), beta.reshape(1, h))
    if needs_pad:
        out = out[:m]
    return out.reshape(shape)


def attention_self_pallas(qkv, attn_mask_bias, kpad_bias, nhead):
    """qkv: (B, L, 3E) packed; attn_mask_bias: (L, L); kpad_bias: (B, 1, L)."""
    b, l, three_e = qkv.shape
    e = three_e // 3
    s = l
    kernel = functools.partial(_attention_kernel, nhead=nhead,
                               packed_qkv=True, has_attn_mask=True)
    out, probs = pl.pallas_call(
        kernel,
        out_shape=(jax.ShapeDtypeStruct((b, l, e), qkv.dtype),
                   jax.ShapeDtypeStruct((b, l, s), jnp.float32)),
        grid_spec=pltpu.PrefetchScalarGridSpec(
            num_scalar_prefetch=0,
            grid=(b,),
            in_specs=[
                pl.BlockSpec((None, l, three_e), lambda i: (i, 0, 0)),
                pl.BlockSpec((l, s), lambda i: (0, 0)),
                pl.BlockSpec((None, 1, s), lambda i: (i, 0, 0)),
            ],
            out_specs=(
                pl.BlockSpec((None, l, e), lambda i: (i, 0, 0)),
                pl.BlockSpec((None, l, s), lambda i: (i, 0, 0)),
            ),
        ),
        compiler_params=pltpu.CompilerParams(dimension_semantics=("parallel",)),
        cost_estimate=pl.CostEstimate(
            flops=4 * b * l * s * e, transcendentals=b * l * s,
            bytes_accessed=4 * (b * l * three_e + b * l * e + b * l * s)),
    )(qkv, attn_mask_bias, kpad_bias)
    return out, probs


def attention_cross_pallas(q, kv, kpad_bias, nhead):
    """q: (B, L, E); kv: (B, S, 2E) packed; kpad_bias: (B, 1, S)."""
    b, l, e = q.shape
    s = kv.shape[1]
    kernel = functools.partial(_attention_kernel, nhead=nhead,
                               packed_qkv=False, has_attn_mask=False)
    out, probs = pl.pallas_call(
        kernel,
        out_shape=(jax.ShapeDtypeStruct((b, l, e), q.dtype),
                   jax.ShapeDtypeStruct((b, l, s), jnp.float32)),
        grid_spec=pltpu.PrefetchScalarGridSpec(
            num_scalar_prefetch=0,
            grid=(b,),
            in_specs=[
                pl.BlockSpec((None, l, e), lambda i: (i, 0, 0)),
                pl.BlockSpec((None, s, 2 * e), lambda i: (i, 0, 0)),
                pl.BlockSpec((None, 1, s), lambda i: (i, 0, 0)),
            ],
            out_specs=(
                pl.BlockSpec((None, l, e), lambda i: (i, 0, 0)),
                pl.BlockSpec((None, l, s), lambda i: (i, 0, 0)),
            ),
        ),
        compiler_params=pltpu.CompilerParams(dimension_semantics=("parallel",)),
        cost_estimate=pl.CostEstimate(
            flops=4 * b * l * s * e, transcendentals=b * l * s,
            bytes_accessed=4 * (b * l * e + b * s * 2 * e + b * l * e + b * l * s)),
    )(q, kv, kpad_bias)
    return out, probs


# ------------------------- pure-JAX reference ops -----------------------------
def _bf16_matmul(a, b):
    return jnp.dot(a.astype(jnp.bfloat16), b.astype(jnp.bfloat16),
                   preferred_element_type=jnp.float32)


def _layernorm_ref(x, g, b, eps=1e-6):
    mean = jnp.mean(x, axis=-1, keepdims=True)
    var = jnp.mean(jnp.square(x - mean), axis=-1, keepdims=True)
    return (x - mean) * jax.lax.rsqrt(var + eps) * g + b


def _fused_linear_ref(x, w, b, *, ln=None, relu=False, residual=None, eps=1e-6):
    y = x
    if ln is not None:
        y = _layernorm_ref(y, ln[0], ln[1], eps)
    y = _bf16_matmul(y, w) + b
    if relu:
        y = jnp.maximum(y, 0.0)
    if residual is not None:
        y = y + residual
    return y.astype(x.dtype)


def _attention_ref(q, k, v, bias, nhead):
    b, l, e = q.shape
    d = e // nhead
    scale = 1.0 / math.sqrt(d)
    qh = q.reshape(b, l, nhead, d).transpose(0, 2, 1, 3).astype(jnp.bfloat16)
    kh = k.reshape(b, -1, nhead, d).transpose(0, 2, 1, 3).astype(jnp.bfloat16)
    vh = v.reshape(b, -1, nhead, d).transpose(0, 2, 1, 3).astype(jnp.bfloat16)
    s = jnp.einsum("bhld,bhsd->bhls", qh, kh,
                   preferred_element_type=jnp.float32) * scale + bias[:, None]
    p = jax.nn.softmax(s, axis=-1)
    o = jnp.einsum("bhls,bhsd->bhld", p.astype(jnp.bfloat16), vh,
                   preferred_element_type=jnp.float32)
    o = o.transpose(0, 2, 1, 3).reshape(b, l, e).astype(q.dtype)
    return o, p.mean(axis=1)


def attention_self_ref(qkv, attn_mask_bias, kpad_bias, nhead):
    e = qkv.shape[-1] // 3
    q, k, v = qkv[..., :e], qkv[..., e:2 * e], qkv[..., 2 * e:]
    bias = attn_mask_bias[None] + kpad_bias            # (B, L, L)
    return _attention_ref(q, k, v, bias, nhead)


def attention_cross_ref(q, kv, kpad_bias, nhead):
    e = q.shape[-1]
    k, v = kv[..., :e], kv[..., e:]
    return _attention_ref(q, k, v, kpad_bias, nhead)   # bias (B, 1, S)


# --------------------------- shared decoder forward ---------------------------
def _decoder_forward(params, targets, enc_output, padding_mask, attn_mask,
                     memory_mask, *, nhead, ops):
    b, t, _ = targets.shape
    s = enc_output.shape[1]
    neg = jnp.float32(-1e9)
    # Additive score biases (PyTorch-MHA style); kept tiny — the (T,T) mask and
    # per-batch key-padding rows are combined inside the attention kernel
    # instead of materializing (B, L, S) bias arrays.
    attn_bias = attn_mask.astype(jnp.float32)                                   # (T, T)
    kpad_self = jnp.where(padding_mask, neg, 0.0).astype(jnp.float32).reshape(b, 1, t)
    kpad_mem = jnp.where(memory_mask, neg, 0.0).astype(jnp.float32).reshape(b, 1, s)

    # The PyTorch module permutes (B,T,H)->(T,B,H) only because
    # nn.MultiheadAttention is seq-first; the math is identical batch-first.
    x = targets
    self_atts, cross_atts = [], []
    for lp in params["layers"]:
        sa = lp["self_attn"]
        qkv = ops["ln_linear"](x, (lp["ln1_g"], lp["ln1_b"]), sa["w_qkv"], sa["b_qkv"])
        y, w_self = ops["attn_self"](qkv, attn_bias, kpad_self, nhead)
        x = ops["linear_res"](y, sa["wo"], sa["bo"], x)          # out-proj + residual

        ca = lp["cross_attn"]
        q = ops["ln_linear"](x, (lp["ln2_g"], lp["ln2_b"]), ca["wq"], ca["bq"])
        kv = ops["linear"](enc_output, ca["w_kv"], ca["b_kv"])
        y, w_cross = ops["attn_cross"](q, kv, kpad_mem, nhead)
        x = ops["linear_res"](y, ca["wo"], ca["bo"], x)

        h1 = ops["ln_linear_relu"](x, (lp["ln3_g"], lp["ln3_b"]),
                                   lp["ffn_w1"], lp["ffn_b1"])    # LN+FFN1+ReLU fused
        x = ops["linear_res"](h1, lp["ffn_w2"], lp["ffn_b2"], x)  # FFN2 + residual

        self_atts.append(w_self)
        cross_atts.append(w_cross)
    out = ops["layernorm"](x, params["last_g"], params["last_b"])
    return out, self_atts, cross_atts


_PALLAS_OPS = {
    "ln_linear": lambda x, ln, w, b: fused_linear_pallas(x, w, b, ln=ln),
    "ln_linear_relu": lambda x, ln, w, b: fused_linear_pallas(x, w, b, ln=ln, relu=True),
    "linear": lambda x, w, b: fused_linear_pallas(x, w, b),
    "linear_res": lambda x, w, b, res: fused_linear_pallas(x, w, b, residual=res),
    "attn_self": attention_self_pallas,
    "attn_cross": attention_cross_pallas,
    "layernorm": layernorm_pallas,
}

_REF_OPS = {
    "ln_linear": lambda x, ln, w, b: _fused_linear_ref(x, w, b, ln=ln),
    "ln_linear_relu": lambda x, ln, w, b: _fused_linear_ref(x, w, b, ln=ln, relu=True),
    "linear": lambda x, w, b: _fused_linear_ref(x, w, b),
    "linear_res": lambda x, w, b, res: _fused_linear_ref(x, w, b, residual=res),
    "attn_self": attention_self_ref,
    "attn_cross": attention_cross_ref,
    "layernorm": _layernorm_ref,
}


def decoder_forward_pallas(params, targets, enc_output, padding_mask, attn_mask,
                           memory_mask, *, nhead):
    return _decoder_forward(params, targets, enc_output, padding_mask,
                            attn_mask, memory_mask, nhead=nhead, ops=_PALLAS_OPS)


def decoder_forward_ref(params, targets, enc_output, padding_mask, attn_mask,
                        memory_mask, *, nhead):
    return _decoder_forward(params, targets, enc_output, padding_mask,
                            attn_mask, memory_mask, nhead=nhead, ops=_REF_OPS)


# ------------------------------- parameters -----------------------------------
def _xavier(key, shape):
    bound = math.sqrt(6.0 / (shape[0] + shape[1]))
    return jax.random.uniform(key, shape, jnp.float32, -bound, bound)


def _self_attn_params(key, hidden):
    ks = jax.random.split(key, 4)
    return {
        "w_qkv": jnp.concatenate([_xavier(ks[0], (hidden, hidden)),
                                  _xavier(ks[1], (hidden, hidden)),
                                  _xavier(ks[2], (hidden, hidden))], axis=1),
        "b_qkv": jnp.zeros((3 * hidden,), jnp.float32),
        "wo": _xavier(ks[3], (hidden, hidden)),
        "bo": jnp.zeros((hidden,), jnp.float32),
    }


def _cross_attn_params(key, hidden):
    ks = jax.random.split(key, 4)
    return {
        "wq": _xavier(ks[0], (hidden, hidden)),
        "bq": jnp.zeros((hidden,), jnp.float32),
        "w_kv": jnp.concatenate([_xavier(ks[1], (hidden, hidden)),
                                 _xavier(ks[2], (hidden, hidden))], axis=1),
        "b_kv": jnp.zeros((2 * hidden,), jnp.float32),
        "wo": _xavier(ks[3], (hidden, hidden)),
        "bo": jnp.zeros((hidden,), jnp.float32),
    }


def init_decoder_params(key, hidden, filter_size, n_layers):
    ones = jnp.ones((hidden,), jnp.float32)
    zeros = jnp.zeros((hidden,), jnp.float32)
    layers = []
    for _ in range(n_layers):
        key, k_sa, k_ca, k_f1, k_f2 = jax.random.split(key, 5)
        layers.append({
            "ln1_g": ones, "ln1_b": zeros,
            "ln2_g": ones, "ln2_b": zeros,
            "ln3_g": ones, "ln3_b": zeros,
            "self_attn": _self_attn_params(k_sa, hidden),
            "cross_attn": _cross_attn_params(k_ca, hidden),
            "ffn_w1": _xavier(k_f1, (hidden, filter_size)),
            "ffn_b1": jnp.zeros((filter_size,), jnp.float32),
            "ffn_w2": _xavier(k_f2, (filter_size, hidden)),
            "ffn_b2": zeros,
        })
    return {"layers": layers, "last_g": ones, "last_b": zeros}


# ---------------------------------- main ---------------------------------------
if __name__ == "__main__":
    key = jax.random.PRNGKey(0)
    B, T, S, H, F, nhead, n_layers = 2, 8, 8, 32, 64, 4, 2
    k_t, k_e, k_p = jax.random.split(key, 3)

    targets = jax.random.normal(k_t, (B, T, H), dtype=jnp.float32)
    enc_output = jax.random.normal(k_e, (B, S, H), dtype=jnp.float32)
    padding_mask = jnp.zeros((B, T), dtype=jnp.bool_)          # no padded targets
    memory_mask = jnp.zeros((B, S), dtype=jnp.bool_)           # no padded memory
    attn_mask = jnp.where(jnp.triu(jnp.ones((T, T), jnp.bool_), k=1),
                          -1e9, 0.0).astype(jnp.float32)       # causal mask

    params = init_decoder_params(k_p, H, F, n_layers)

    fwd = jax.jit(functools.partial(decoder_forward_pallas, nhead=nhead))
    out, self_atts, cross_atts = fwd(params, targets, enc_output,
                                     padding_mask, attn_mask, memory_mask)
    (out, self_atts, cross_atts) = jax.block_until_ready(
        (out, self_atts, cross_atts))

    # Pure-JAX reference with identical parameterization (same bf16-operand /
    # f32-accumulation matmul convention as the kernels).
    ref_out, ref_self, ref_cross = decoder_forward_ref(
        params, targets, enc_output, padding_mask, attn_mask, memory_mask,
        nhead=nhead)

    assert out.shape == (B, T, H)
    assert len(self_atts) == n_layers and len(cross_atts) == n_layers
    assert all(a.shape == (B, T, T) for a in self_atts)
    assert all(a.shape == (B, T, S) for a in cross_atts)
    assert jnp.allclose(out, ref_out, atol=2e-3, rtol=2e-3)
    assert all(jnp.allclose(a, b, atol=2e-3, rtol=2e-3)
               for a, b in zip(self_atts, ref_self))
    assert all(jnp.allclose(a, b, atol=2e-3, rtol=2e-3)
               for a, b in zip(cross_atts, ref_cross))

    print("KERNEL_OK")
</pallas_src>

<mosaic_0001>
module attributes {stable_mosaic.version = 11 : i64} {
  func.func @_fused_linear_kernel(%arg0: i32, %arg1: i32, %arg2: memref<16x32xf32, #tpu.memory_space<vmem>>, %arg3: memref<32x64xf32, #tpu.memory_space<vmem>>, %arg4: memref<1x64xf32, #tpu.memory_space<vmem>>, %arg5: memref<16x64xf32, #tpu.memory_space<vmem>>) attributes {dimension_semantics = [#tpu.dimension_semantics<parallel>, #tpu.dimension_semantics<parallel>], iteration_bounds = array<i64: 1, 1>, scalar_prefetch = 0 : i64, scratch_operands = 0 : i64, tpu.core_type = #tpu.core_type<tc>, window_params = [{transform_indices = @transform_0, window_bounds = array<i64: 16, 32>}, {transform_indices = @transform_1, window_bounds = array<i64: 32, 64>}, {transform_indices = @transform_2, window_bounds = array<i64: 1, 64>}, {transform_indices = @transform_3, window_bounds = array<i64: 16, 64>}]} {
    %c0 = arith.constant 0 : index
    %c0_0 = arith.constant 0 : index
    %0 = vector.load %arg2[%c0, %c0_0] : memref<16x32xf32, #tpu.memory_space<vmem>>, vector<16x32xf32>
    %1 = arith.truncf %0 : vector<16x32xf32> to vector<16x32xbf16>
    %c0_1 = arith.constant 0 : index
    %c0_2 = arith.constant 0 : index
    %2 = vector.load %arg3[%c0_1, %c0_2] : memref<32x64xf32, #tpu.memory_space<vmem>>, vector<32x64xf32>
    %3 = arith.truncf %2 : vector<32x64xf32> to vector<32x64xbf16>
    %cst = arith.constant dense<0.000000e+00> : vector<16x64xf32>
    %4 = tpu.matmul %1, %3, %cst {dimension_numbers = #tpu.dot_dimension_numbers<[1], [0], [0], [1], [0, 0, 1, 1], [], []>} : vector<16x32xbf16>, vector<32x64xbf16>, vector<16x64xf32> -> vector<16x64xf32>
    %c0_3 = arith.constant 0 : index
    %c0_4 = arith.constant 0 : index
    %5 = vector.load %arg4[%c0_3, %c0_4] : memref<1x64xf32, #tpu.memory_space<vmem>>, vector<1x64xf32>
    %6 = vector.broadcast %5 : vector<1x64xf32> to vector<16x64xf32>
    %7 = arith.addf %4, %6 : vector<16x64xf32>
    %c0_5 = arith.constant 0 : index
    %c0_6 = arith.constant 0 : index
    %8 = vector.load %arg5[%c0_5, %c0_6] : memref<16x64xf32, #tpu.memory_space<vmem>>, vector<16x64xf32>
    tpu.vector_store %arg5[%c0_5, %c0_6], %7 {strides = array<i32>} : memref<16x64xf32, #tpu.memory_space<vmem>>, vector<16x64xf32>,
    return
  }
  func.func @transform_0(%arg0: i32, %arg1: i32) -> (i32, i32) {
    %c0_i32 = arith.constant 0 : i32
    %c0_i32_0 = arith.constant 0 : i32
    return %arg0, %c0_i32 : i32, i32
  }
  func.func @transform_1(%arg0: i32, %arg1: i32) -> (i32, i32) {
    %c0_i32 = arith.constant 0 : i32
    %c0_i32_0 = arith.constant 0 : i32
    return %c0_i32, %arg1 : i32, i32
  }
  func.func @transform_2(%arg0: i32, %arg1: i32) -> (i32, i32) {
    %c0_i32 = arith.constant 0 : i32
    %c0_i32_0 = arith.constant 0 : i32
    return %c0_i32, %arg1 : i32, i32
  }
  func.func @transform_3(%arg0: i32, %arg1: i32) -> (i32, i32) {
    %c0_i32 = arith.constant 0 : i32
    return %arg0, %arg1 : i32, i32
  }
}

module attributes {stable_mosaic.version = 11 : i64} {
  func.func @_fused_linear_kernel(%arg0: i32, %arg1: i32, %arg2: memref<16x32xf32, #tpu.memory_space<vmem>>, %arg3: memref<1x32xf32, #tpu.memory_space<vmem>>, %arg4: memref<1x32xf32, #tpu.memory_space<vmem>>, %arg5: memref<32x96xf32, #tpu.memory_space<vmem>>, %arg6: memref<1x96xf32, #tpu.memory_space<vmem>>, %arg7: memref<16x96xf32, #tpu.memory_space<vmem>>) attributes {dimension_semantics = [#tpu.dimension_semantics<parallel>, #tpu.dimension_semantics<parallel>], iteration_bounds = array<i64: 1, 1>, scalar_prefetch = 0 : i64, scratch_operands = 0 : i64, tpu.core_type = #tpu.core_type<tc>, window_params = [{transform_indices = @transform_0, window_bounds = array<i64: 16, 32>}, {pipeline_mode = #tpu.pipeline_mode<synchronous>, transform_indices = @transform_1, window_bounds = array<i64: 1, 32>}, {pipeline_mode = #tpu.pipeline_mode<synchronous>, transform_indices = @transform_2, window_bounds = array<i64: 1, 32>}, {transform_indices = @transform_3, window_bounds = array<i64: 32, 96>}, {transform_indices = @transform_4, window_bounds = array<i64: 1, 96>}, {transform_indices = @transform_5, window_bounds = array<i64: 16, 96>}]} {
    %c0 = arith.constant 0 : index
    %c0_0 = arith.constant 0 : index
    %0 = vector.load %arg2[%c0, %c0_0] : memref<16x32xf32, #tpu.memory_space<vmem>>, vector<16x32xf32>
    %cst = arith.constant dense<0.000000e+00> : vector<16xf32>
    %1 = vector.multi_reduction <add>, %0, %cst [1] : vector<16x32xf32> to vector<16xf32>
    %2 = vector.shape_cast %1 : vector<16xf32> to vector<16x1xf32>
    %cst_1 = arith.constant 3.200000e+01 : f32
    %3 = vector.broadcast %cst_1 : f32 to vector<16x1xf32>
    %4 = arith.divf %2, %3 : vector<16x1xf32>
    %5 = vector.broadcast %4 : vector<16x1xf32> to vector<16x32xf32>
    %6 = arith.subf %0, %5 : vector<16x32xf32>
    %7 = arith.mulf %6, %6 : vector<16x32xf32>
    %cst_2 = arith.constant dense<0.000000e+00> : vector<16xf32>
    %8 = vector.multi_reduction <add>, %7, %cst_2 [1] : vector<16x32xf32> to vector<16xf32>
    %9 = vector.shape_cast %8 : vector<16xf32> to vector<16x1xf32>
    %cst_3 = arith.constant 3.200000e+01 : f32
    %10 = vector.broadcast %cst_3 : f32 to vector<16x1xf32>
    %11 = arith.divf %9, %10 : vector<16x1xf32>
    %12 = vector.broadcast %4 : vector<16x1xf32> to vector<16x32xf32>
    %13 = arith.subf %0, %12 : vector<16x32xf32>
    %cst_4 = arith.constant 9.99999997E-7 : f32
    %14 = vector.broadcast %cst_4 : f32 to vector<16x1xf32>
    %15 = arith.addf %11, %14 : vector<16x1xf32>
    %16 = math.rsqrt %15 : vector<16x1xf32>
    %17 = vector.broadcast %16 : vector<16x1xf32> to vector<16x32xf32>
    %18 = arith.mulf %13, %17 : vector<16x32xf32>
    %c0_5 = arith.constant 0 : index
    %c0_6 = arith.constant 0 : index
    %19 = vector.load %arg3[%c0_5, %c0_6] : memref<1x32xf32, #tpu.memory_space<vmem>>, vector<1x32xf32>
    %20 = vector.broadcast %19 : vector<1x32xf32> to vector<16x32xf32>
    %21 = arith.mulf %18, %20 : vector<16x32xf32>
    %c0_7 = arith.constant 0 : index
    %c0_8 = arith.constant 0 : index
    %22 = vector.load %arg4[%c0_7, %c0_8] : memref<1x32xf32, #tpu.memory_space<vmem>>, vector<1x32xf32>
    %23 = vector.broadcast %22 : vector<1x32xf32> to vector<16x32xf32>
    %24 = arith.addf %21, %23 : vector<16x32xf32>
    %25 = arith.truncf %24 : vector<16x32xf32> to vector<16x32xbf16>
    %c0_9 = arith.constant 0 : index
    %c0_10 = arith.constant 0 : index
    %26 = vector.load %arg5[%c0_9, %c0_10] : memref<32x96xf32, #tpu.memory_space<vmem>>, vector<32x96xf32>
    %27 = arith.truncf %26 : vector<32x96xf32> to vector<32x96xbf16>
    %cst_11 = arith.constant dense<0.000000e+00> : vector<16x96xf32>
    %28 = tpu.matmul %25, %27, %cst_11 {dimension_numbers = #tpu.dot_dimension_numbers<[1], [0], [0], [1], [0, 0, 1, 1], [], []>} : vector<16x32xbf16>, vector<32x96xbf16>, vector<16x96xf32> -> vector<16x96xf32>
    %c0_12 = arith.constant 0 : index
    %c0_13 = arith.constant 0 : index
    %29 = vector.load %arg6[%c0_12, %c0_13] : memref<1x96xf32, #tpu.memory_space<vmem>>, vector<1x96xf32>
    %30 = vector.broadcast %29 : vector<1x96xf32> to vector<16x96xf32>
    %31 = arith.addf %28, %30 : vector<16x96xf32>
    %c0_14 = arith.constant 0 : index
    %c0_15 = arith.constant 0 : index
    %32 = vector.load %arg7[%c0_14, %c0_15] : memref<16x96xf32, #tpu.memory_space<vmem>>, vector<16x96xf32>
    tpu.vector_store %arg7[%c0_14, %c0_15], %31 {strides = array<i32>} : memref<16x96xf32, #tpu.memory_space<vmem>>, vector<16x96xf32>,
    return
  }
  func.func @transform_0(%arg0: i32, %arg1: i32) -> (i32, i32) {
    %c0_i32 = arith.constant 0 : i32
    %c0_i32_0 = arith.constant 0 : i32
    return %arg0, %c0_i32 : i32, i32
  }
  func.func @transform_1(%arg0: i32, %arg1: i32) -> (i32, i32) {
    %c0_i32 = arith.constant 0 : i32
    %c0_i32_0 = arith.constant 0 : i32
    %c0_i32_1 = arith.constant 0 : i32
    return %c0_i32, %c0_i32_0 : i32, i32
  }
  func.func @transform_2(%arg0: i32, %arg1: i32) -> (i32, i32) {
    %c0_i32 = arith.constant 0 : i32
    %c0_i32_0 = arith.constant 0 : i32
    %c0_i32_1 = arith.constant 0 : i32
    return %c0_i32, %c0_i32_0 : i32, i32
  }
  func.func @transform_3(%arg0: i32, %arg1: i32) -> (i32, i32) {
    %c0_i32 = arith.constant 0 : i32
    %c0_i32_0 = arith.constant 0 : i32
    return %c0_i32, %arg1 : i32, i32
  }
  func.func @transform_4(%arg0: i32, %arg1: i32) -> (i32, i32) {
    %c0_i32 = arith.constant 0 : i32
    %c0_i32_0 = arith.constant 0 : i32
    return %c0_i32, %arg1 : i32, i32
  }
  func.func @transform_5(%arg0: i32, %arg1: i32) -> (i32, i32) {
    %c0_i32 = arith.constant 0 : i32
    return %arg0, %arg1 : i32, i32
  }
}

module attributes {stable_mosaic.version = 11 : i64} {
  func.func @_fused_linear_kernel(%arg0: i32, %arg1: i32, %arg2: memref<16x32xf32, #tpu.memory_space<vmem>>, %arg3: memref<32x64xf32, #tpu.memory_space<vmem>>, %arg4: memref<1x64xf32, #tpu.memory_space<vmem>>, %arg5: memref<16x64xf32, #tpu.memory_space<vmem>>) attributes {dimension_semantics = [#tpu.dimension_semantics<parallel>, #tpu.dimension_semantics<parallel>], iteration_bounds = array<i64: 1, 1>, scalar_prefetch = 0 : i64, scratch_operands = 0 : i64, tpu.core_type = #tpu.core_type<tc>, window_params = [{transform_indices = @transform_0, window_bounds = array<i64: 16, 32>}, {transform_indices = @transform_1, window_bounds = array<i64: 32, 64>}, {transform_indices = @transform_2, window_bounds = array<i64: 1, 64>}, {transform_indices = @transform_3, window_bounds = array<i64: 16, 64>}]} {
    %c0 = arith.constant 0 : index
    %c0_0 = arith.constant 0 : index
    %0 = vector.load %arg2[%c0, %c0_0] : memref<16x32xf32, #tpu.memory_space<vmem>>, vector<16x32xf32>
    %1 = arith.truncf %0 : vector<16x32xf32> to vector<16x32xbf16>
    %c0_1 = arith.constant 0 : index
    %c0_2 = arith.constant 0 : index
    %2 = vector.load %arg3[%c0_1, %c0_2] : memref<32x64xf32, #tpu.memory_space<vmem>>, vector<32x64xf32>
    %3 = arith.truncf %2 : vector<32x64xf32> to vector<32x64xbf16>
    %cst = arith.constant dense<0.000000e+00> : vector<16x64xf32>
    %4 = tpu.matmul %1, %3, %cst {dimension_numbers = #tpu.dot_dimension_numbers<[1], [0], [0], [1], [0, 0, 1, 1], [], []>} : vector<16x32xbf16>, vector<32x64xbf16>, vector<16x64xf32> -> vector<16x64xf32>
    %c0_3 = arith.constant 0 : index
    %c0_4 = arith.constant 0 : index
    %5 = vector.load %arg4[%c0_3, %c0_4] : memref<1x64xf32, #tpu.memory_space<vmem>>, vector<1x64xf32>
    %6 = vector.broadcast %5 : vector<1x64xf32> to vector<16x64xf32>
    %7 = arith.addf %4, %6 : vector<16x64xf32>
    %c0_5 = arith.constant 0 : index
    %c0_6 = arith.constant 0 : index
    %8 = vector.load %arg5[%c0_5, %c0_6] : memref<16x64xf32, #tpu.memory_space<vmem>>, vector<16x64xf32>
    tpu.vector_store %arg5[%c0_5, %c0_6], %7 {strides = array<i32>} : memref<16x64xf32, #tpu.memory_space<vmem>>, vector<16x64xf32>,
    return
  }
  func.func @transform_0(%arg0: i32, %arg1: i32) -> (i32, i32) {
    %c0_i32 = arith.constant 0 : i32
    %c0_i32_0 = arith.constant 0 : i32
    return %arg0, %c0_i32 : i32, i32
  }
  func.func @transform_1(%arg0: i32, %arg1: i32) -> (i32, i32) {
    %c0_i32 = arith.constant 0 : i32
    %c0_i32_0 = arith.constant 0 : i32
    return %c0_i32, %arg1 : i32, i32
  }
  func.func @transform_2(%arg0: i32, %arg1: i32) -> (i32, i32) {
    %c0_i32 = arith.constant 0 : i32
    %c0_i32_0 = arith.constant 0 : i32
    return %c0_i32, %arg1 : i32, i32
  }
  func.func @transform_3(%arg0: i32, %arg1: i32) -> (i32, i32) {
    %c0_i32 = arith.constant 0 : i32
    return %arg0, %arg1 : i32, i32
  }
}

module attributes {stable_mosaic.version = 11 : i64} {
  func.func @_attention_kernel(%arg0: i32, %arg1: memref<1x8x96xf32, #tpu.memory_space<vmem>>, %arg2: memref<8x8xf32, #tpu.memory_space<vmem>>, %arg3: memref<1x1x8xf32, #tpu.memory_space<vmem>>, %arg4: memref<1x8x32xf32, #tpu.memory_space<vmem>>, %arg5: memref<1x8x8xf32, #tpu.memory_space<vmem>>) attributes {dimension_semantics = [#tpu.dimension_semantics<parallel>], iteration_bounds = array<i64: 2>, scalar_prefetch = 0 : i64, scratch_operands = 0 : i64, tpu.core_type = #tpu.core_type<tc>, window_params = [{transform_indices = @transform_0, window_bounds = array<i64: 1, 8, 96>}, {pipeline_mode = #tpu.pipeline_mode<synchronous>, transform_indices = @transform_1, window_bounds = array<i64: 8, 8>}, {transform_indices = @transform_2, window_bounds = array<i64: 1, 1, 8>}, {transform_indices = @transform_3, window_bounds = array<i64: 1, 8, 32>}, {transform_indices = @transform_4, window_bounds = array<i64: 1, 8, 8>}]} {
    %c0 = arith.constant 0 : index
    %c0_0 = arith.constant 0 : index
    %c0_1 = arith.constant 0 : index
    %0 = vector.load %arg1[%c0, %c0_0, %c0_1] : memref<1x8x96xf32, #tpu.memory_space<vmem>>, vector<1x8x96xf32>
    %1 = vector.shape_cast %0 : vector<1x8x96xf32> to vector<8x96xf32>
    %2 = vector.extract_strided_slice %1 {offsets = [0, 0], sizes = [8, 32], strides = [1, 1]} : vector<8x96xf32> to vector<8x32xf32>
    %3 = vector.extract_strided_slice %1 {offsets = [0, 32], sizes = [8, 32], strides = [1, 1]} : vector<8x96xf32> to vector<8x32xf32>
    %4 = vector.extract_strided_slice %1 {offsets = [0, 64], sizes = [8, 32], strides = [1, 1]} : vector<8x96xf32> to vector<8x32xf32>
    %c0_2 = arith.constant 0 : index
    %c0_3 = arith.constant 0 : index
    %c0_4 = arith.constant 0 : index
    %5 = vector.load %arg3[%c0_2, %c0_3, %c0_4] : memref<1x1x8xf32, #tpu.memory_space<vmem>>, vector<1x1x8xf32>
    %6 = vector.shape_cast %5 : vector<1x1x8xf32> to vector<1x8xf32>
    %c0_5 = arith.constant 0 : index
    %c0_6 = arith.constant 0 : index
    %7 = vector.load %arg2[%c0_5, %c0_6] : memref<8x8xf32, #tpu.memory_space<vmem>>, vector<8x8xf32>
    %8 = vector.broadcast %6 : vector<1x8xf32> to vector<8x8xf32>
    %9 = arith.addf %7, %8 : vector<8x8xf32>
    %10 = vector.extract_strided_slice %2 {offsets = [0, 0], sizes = [8, 8], strides = [1, 1]} : vector<8x32xf32> to vector<8x8xf32>
    %11 = arith.truncf %10 : vector<8x8xf32> to vector<8x8xbf16>
    %12 = vector.extract_strided_slice %3 {offsets = [0, 0], sizes = [8, 8], strides = [1, 1]} : vector<8x32xf32> to vector<8x8xf32>
    %13 = arith.truncf %12 : vector<8x8xf32> to vector<8x8xbf16>
    %14 = vector.extract_strided_slice %4 {offsets = [0, 0], sizes = [8, 8], strides = [1, 1]} : vector<8x32xf32> to vector<8x8xf32>
    %15 = arith.truncf %14 : vector<8x8xf32> to vector<8x8xbf16>
    %cst = arith.constant dense<0.000000e+00> : vector<8x8xf32>
    %16 = tpu.matmul %11, %13, %cst {dimension_numbers = #tpu.dot_dimension_numbers<[1], [1], [0], [0], [0, 0, 1, 0], [], []>} : vector<8x8xbf16>, vector<8x8xbf16>, vector<8x8xf32> -> vector<8x8xf32>
    %cst_7 = arith.constant 0.353553385 : f32
    %17 = vector.broadcast %cst_7 : f32 to vector<8x8xf32>
    %18 = arith.mulf %16, %17 : vector<8x8xf32>
    %19 = arith.addf %18, %9 : vector<8x8xf32>
    %cst_8 = arith.constant dense<0xFF800000> : vector<8xf32>
    %20 = vector.multi_reduction <maximumf>, %19, %cst_8 [1] : vector<8x8xf32> to vector<8xf32>
    %21 = vector.shape_cast %20 : vector<8xf32> to vector<8x1xf32>
    %22 = vector.broadcast %21 : vector<8x1xf32> to vector<8x8xf32>
    %23 = arith.subf %19, %22 : vector<8x8xf32>
    %24 = math.exp %23 : vector<8x8xf32>
    %cst_9 = arith.constant dense<0.000000e+00> : vector<8xf32>
    %25 = vector.multi_reduction <add>, %24, %cst_9 [1] : vector<8x8xf32> to vector<8xf32>
    %26 = vector.shape_cast %25 : vector<8xf32> to vector<8x1xf32>
    %27 = vector.broadcast %26 : vector<8x1xf32> to vector<8x8xf32>
    %28 = arith.divf %24, %27 : vector<8x8xf32>
    %29 = arith.truncf %28 : vector<8x8xf32> to vector<8x8xbf16>
    %cst_10 = arith.constant dense<0.000000e+00> : vector<8x8xf32>
    %30 = tpu.matmul %29, %15, %cst_10 {dimension_numbers = #tpu.dot_dimension_numbers<[1], [0], [0], [1], [0, 0, 1, 1], [], []>} : vector<8x8xbf16>, vector<8x8xbf16>, vector<8x8xf32> -> vector<8x8xf32>
    %31 = vector.extract_strided_slice %2 {offsets = [0, 8], sizes = [8, 8], strides = [1, 1]} : vector<8x32xf32> to vector<8x8xf32>
    %32 = arith.truncf %31 : vector<8x8xf32> to vector<8x8xbf16>
    %33 = vector.extract_strided_slice %3 {offsets = [0, 8], sizes = [8, 8], strides = [1, 1]} : vector<8x32xf32> to vector<8x8xf32>
    %34 = arith.truncf %33 : vector<8x8xf32> to vector<8x8xbf16>
    %35 = vector.extract_strided_slice %4 {offsets = [0, 8], sizes = [8, 8], strides = [1, 1]} : vector<8x32xf32> to vector<8x8xf32>
    %36 = arith.truncf %35 : vector<8x8xf32> to vector<8x8xbf16>
    %cst_11 = arith.constant dense<0.000000e+00> : vector<8x8xf32>
    %37 = tpu.matmul %32, %34, %cst_11 {dimension_numbers = #tpu.dot_dimension_numbers<[1], [1], [0], [0], [0, 0, 1, 0], [], []>} : vector<8x8xbf16>, vector<8x8xbf16>, vector<8x8xf32> -> vector<8x8xf32>
    %cst_12 = arith.constant 0.353553385 : f32
    %38 = vector.broadcast %cst_12 : f32 to vector<8x8xf32>
    %39 = arith.mulf %37, %38 : vector<8x8xf32>
    %40 = arith.addf %39, %9 : vector<8x8xf32>
    %cst_13 = arith.constant dense<0xFF800000> : vector<8xf32>
    %41 = vector.multi_reduction <maximumf>, %40, %cst_13 [1] : vector<8x8xf32> to vector<8xf32>
    %42 = vector.shape_cast %41 : vector<8xf32> to vector<8x1xf32>
    %43 = vector.broadcast %42 : vector<8x1xf32> to vector<8x8xf32>
    %44 = arith.subf %40, %43 : vector<8x8xf32>
    %45 = math.exp %44 : vector<8x8xf32>
    %cst_14 = arith.constant dense<0.000000e+00> : vector<8xf32>
    %46 = vector.multi_reduction <add>, %45, %cst_14 [1] : vector<8x8xf32> to vector<8xf32>
    %47 = vector.shape_cast %46 : vector<8xf32> to vector<8x1xf32>
    %48 = vector.broadcast %47 : vector<8x1xf32> to vector<8x8xf32>
    %49 = arith.divf %45, %48 : vector<8x8xf32>
    %50 = arith.truncf %49 : vector<8x8xf32> to vector<8x8xbf16>
    %cst_15 = arith.constant dense<0.000000e+00> : vector<8x8xf32>
    %51 = tpu.matmul %50, %36, %cst_15 {dimension_numbers = #tpu.dot_dimension_numbers<[1], [0], [0], [1], [0, 0, 1, 1], [], []>} : vector<8x8xbf16>, vector<8x8xbf16>, vector<8x8xf32> -> vector<8x8xf32>
    %52 = arith.addf %28, %49 : vector<8x8xf32>
    %53 = vector.extract_strided_slice %2 {offsets = [0, 16], sizes = [8, 8], strides = [1, 1]} : vector<8x32xf32> to vector<8x8xf32>
    %54 = arith.truncf %53 : vector<8x8xf32> to vector<8x8xbf16>
    %55 = vector.extract_strided_slice %3 {offsets = [0, 16], sizes = [8, 8], strides = [1, 1]} : vector<8x32xf32> to vector<8x8xf32>
    %56 = arith.truncf %55 : vector<8x8xf32> to vector<8x8xbf16>
    %57 = vector.extract_strided_slice %4 {offsets = [0, 16], sizes = [8, 8], strides = [1, 1]} : vector<8x32xf32> to vector<8x8xf32>
    %58 = arith.truncf %57 : vector<8x8xf32> to vector<8x8xbf16>
    %cst_16 = arith.constant dense<0.000000e+00> : vector<8x8xf32>
    %59 = tpu.matmul %54, %56, %cst_16 {dimension_numbers = #tpu.dot_dimension_numbers<[1], [1], [0], [0], [0, 0, 1, 0], [], []>} : vector<8x8xbf16>, vector<8x8xbf16>, vector<8x8xf32> -> vector<8x8xf32>
    %cst_17 = arith.constant 0.353553385 : f32
    %60 = vector.broadcast %cst_17 : f32 to vector<8x8xf32>
    %61 = arith.mulf %59, %60 : vector<8x8xf32>
    %62 = arith.addf %61, %9 : vector<8x8xf32>
    %cst_18 = arith.constant dense<0xFF800000> : vector<8xf32>
    %63 = vector.multi_reduction <maximumf>, %62, %cst_18 [1] : vector<8x8xf32> to vector<8xf32>
    %64 = vector.shape_cast %63 : vector<8xf32> to vector<8x1xf32>
    %65 = vector.broadcast %64 : vector<8x1xf32> to vector<8x8xf32>
    %66 = arith.subf %62, %65 : vector<8x8xf32>
    %67 = math.exp %66 : vector<8x8xf32>
    %cst_19 = arith.constant dense<0.000000e+00> : vector<8xf32>
    %68 = vector.multi_reduction <add>, %67, %cst_19 [1] : vector<8x8xf32> to vector<8xf32>
    %69 = vector.shape_cast %68 : vector<8xf32> to vector<8x1xf32>
    %70 = vector.broadcast %69 : vector<8x1xf32> to vector<8x8xf32>
    %71 = arith.divf %67, %70 : vector<8x8xf32>
    %72 = arith.truncf %71 : vector<8x8xf32> to vector<8x8xbf16>
    %cst_20 = arith.constant dense<0.000000e+00> : vector<8x8xf32>
    %73 = tpu.matmul %72, %58, %cst_20 {dimension_numbers = #tpu.dot_dimension_numbers<[1], [0], [0], [1], [0, 0, 1, 1], [], []>} : vector<8x8xbf16>, vector<8x8xbf16>, vector<8x8xf32> -> vector<8x8xf32>
    %74 = arith.addf %52, %71 : vector<8x8xf32>
    %75 = vector.extract_strided_slice %2 {offsets = [0, 24], sizes = [8, 8], strides = [1, 1]} : vector<8x32xf32> to vector<8x8xf32>
    %76 = arith.truncf %75 : vector<8x8xf32> to vector<8x8xbf16>
    %77 = vector.extract_strided_slice %3 {offsets = [0, 24], sizes = [8, 8], strides = [1, 1]} : vector<8x32xf32> to vector<8x8xf32>
    %78 = arith.truncf %77 : vector<8x8xf32> to vector<8x8xbf16>
    %79 = vector.extract_strided_slice %4 {offsets = [0, 24], sizes = [8, 8], strides = [1, 1]} : vector<8x32xf32> to vector<8x8xf32>
    %80 = arith.truncf %79 : vector<8x8xf32> to vector<8x8xbf16>
    %cst_21 = arith.constant dense<0.000000e+00> : vector<8x8xf32>
    %81 = tpu.matmul %76, %78, %cst_21 {dimension_numbers = #tpu.dot_dimension_numbers<[1], [1], [0], [0], [0, 0, 1, 0], [], []>} : vector<8x8xbf16>, vector<8x8xbf16>, vector<8x8xf32> -> vector<8x8xf32>
    %cst_22 = arith.constant 0.353553385 : f32
    %82 = vector.broadcast %cst_22 : f32 to vector<8x8xf32>
    %83 = arith.mulf %81, %82 : vector<8x8xf32>
    %84 = arith.addf %83, %9 : vector<8x8xf32>
    %cst_23 = arith.constant dense<0xFF800000> : vector<8xf32>
    %85 = vector.multi_reduction <maximumf>, %84, %cst_23 [1] : vector<8x8xf32> to vector<8xf32>
    %86 = vector.shape_cast %85 : vector<8xf32> to vector<8x1xf32>
    %87 = vector.broadcast %86 : vector<8x1xf32> to vector<8x8xf32>
    %88 = arith.subf %84, %87 : vector<8x8xf32>
    %89 = math.exp %88 : vector<8x8xf32>
    %cst_24 = arith.constant dense<0.000000e+00> : vector<8xf32>
    %90 = vector.multi_reduction <add>, %89, %cst_24 [1] : vector<8x8xf32> to vector<8xf32>
    %91 = vector.shape_cast %90 : vector<8xf32> to vector<8x1xf32>
    %92 = vector.broadcast %91 : vector<8x1xf32> to vector<8x8xf32>
    %93 = arith.divf %89, %92 : vector<8x8xf32>
    %94 = arith.truncf %93 : vector<8x8xf32> to vector<8x8xbf16>
    %cst_25 = arith.constant dense<0.000000e+00> : vector<8x8xf32>
    %95 = tpu.matmul %94, %80, %cst_25 {dimension_numbers = #tpu.dot_dimension_numbers<[1], [0], [0], [1], [0, 0, 1, 1], [], []>} : vector<8x8xbf16>, vector<8x8xbf16>, vector<8x8xf32> -> vector<8x8xf32>
    %96 = arith.addf %74, %93 : vector<8x8xf32>
    %97 = tpu.concatenate %30, %51, %73, %95 in 1 : vector<8x8xf32>, vector<8x8xf32>, vector<8x8xf32>, vector<8x8xf32> -> vector<8x32xf32>
    %c0_26 = arith.constant 0 : index
    %c0_27 = arith.constant 0 : index
    %c0_28 = arith.constant 0 : index
    %98 = vector.load %arg4[%c0_26, %c0_27, %c0_28] : memref<1x8x32xf32, #tpu.memory_space<vmem>>, vector<1x8x32xf32>
    %99 = vector.shape_cast %98 : vector<1x8x32xf32> to vector<8x32xf32>
    %100 = vector.shape_cast %97 : vector<8x32xf32> to vector<1x8x32xf32>
    tpu.vector_store %arg4[%c0_26, %c0_27, %c0_28], %100 {strides = array<i32>} : memref<1x8x32xf32, #tpu.memory_space<vmem>>, vector<1x8x32xf32>,
    %cst_29 = arith.constant 2.500000e-01 : f32
    %101 = vector.broadcast %cst_29 : f32 to vector<8x8xf32>
    %102 = arith.mulf %96, %101 : vector<8x8xf32>
    %c0_30 = arith.constant 0 : index
    %c0_31 = arith.constant 0 : index
    %c0_32 = arith.constant 0 : index
    %103 = vector.load %arg5[%c0_30, %c0_31, %c0_32] : memref<1x8x8xf32, #tpu.memory_space<vmem>>, vector<1x8x8xf32>
    %104 = vector.shape_cast %103 : vector<1x8x8xf32> to vector<8x8xf32>
    %105 = vector.shape_cast %102 : vector<8x8xf32> to vector<1x8x8xf32>
    tpu.vector_store %arg5[%c0_30, %c0_31, %c0_32], %105 {strides = array<i32>} : memref<1x8x8xf32, #tpu.memory_space<vmem>>, vector<1x8x8xf32>,
    return
  }
  func.func @transform_0(%arg0: i32) -> (i32, i32, i32) {
    %c0_i32 = arith.constant 0 : i32
    %c0_i32_0 = arith.constant 0 : i32
    %c0_i32_1 = arith.constant 0 : i32
    return %arg0, %c0_i32, %c0_i32_0 : i32, i32, i32
  }
  func.func @transform_1(%arg0: i32) -> (i32, i32) {
    %c0_i32 = arith.constant 0 : i32
    %c0_i32_0 = arith.constant 0 : i32
    %c0_i32_1 = arith.constant 0 : i32
    return %c0_i32, %c0_i32_0 : i32, i32
  }
  func.func @transform_2(%arg0: i32) -> (i32, i32, i32) {
    %c0_i32 = arith.constant 0 : i32
    %c0_i32_0 = arith.constant 0 : i32
    %c0_i32_1 = arith.constant 0 : i32
    return %arg0, %c0_i32, %c0_i32_0 : i32, i32, i32
  }
  func.func @transform_3(%arg0: i32) -> (i32, i32, i32) {
    %c0_i32 = arith.constant 0 : i32
    %c0_i32_0 = arith.constant 0 : i32
    %c0_i32_1 = arith.constant 0 : i32
    return %arg0, %c0_i32, %c0_i32_0 : i32, i32, i32
  }
  func.func @transform_4(%arg0: i32) -> (i32, i32, i32) {
    %c0_i32 = arith.constant 0 : i32
    %c0_i32_0 = arith.constant 0 : i32
    %c0_i32_1 = arith.constant 0 : i32
    return %arg0, %c0_i32, %c0_i32_0 : i32, i32, i32
  }
}

module attributes {stable_mosaic.version = 11 : i64} {
  func.func @_fused_linear_kernel(%arg0: i32, %arg1: i32, %arg2: memref<16x32xf32, #tpu.memory_space<vmem>>, %arg3: memref<1x32xf32, #tpu.memory_space<vmem>>, %arg4: memref<1x32xf32, #tpu.memory_space<vmem>>, %arg5: memref<32x32xf32, #tpu.memory_space<vmem>>, %arg6: memref<1x32xf32, #tpu.memory_space<vmem>>, %arg7: memref<16x32xf32, #tpu.memory_space<vmem>>) attributes {dimension_semantics = [#tpu.dimension_semantics<parallel>, #tpu.dimension_semantics<parallel>], iteration_bounds = array<i64: 1, 1>, scalar_prefetch = 0 : i64, scratch_operands = 0 : i64, tpu.core_type = #tpu.core_type<tc>, window_params = [{transform_indices = @transform_0, window_bounds = array<i64: 16, 32>}, {pipeline_mode = #tpu.pipeline_mode<synchronous>, transform_indices = @transform_1, window_bounds = array<i64: 1, 32>}, {pipeline_mode = #tpu.pipeline_mode<synchronous>, transform_indices = @transform_2, window_bounds = array<i64: 1, 32>}, {transform_indices = @transform_3, window_bounds = array<i64: 32, 32>}, {transform_indices = @transform_4, window_bounds = array<i64: 1, 32>}, {transform_indices = @transform_5, window_bounds = array<i64: 16, 32>}]} {
    %c0 = arith.constant 0 : index
    %c0_0 = arith.constant 0 : index
    %0 = vector.load %arg2[%c0, %c0_0] : memref<16x32xf32, #tpu.memory_space<vmem>>, vector<16x32xf32>
    %cst = arith.constant dense<0.000000e+00> : vector<16xf32>
    %1 = vector.multi_reduction <add>, %0, %cst [1] : vector<16x32xf32> to vector<16xf32>
    %2 = vector.shape_cast %1 : vector<16xf32> to vector<16x1xf32>
    %cst_1 = arith.constant 3.200000e+01 : f32
    %3 = vector.broadcast %cst_1 : f32 to vector<16x1xf32>
    %4 = arith.divf %2, %3 : vector<16x1xf32>
    %5 = vector.broadcast %4 : vector<16x1xf32> to vector<16x32xf32>
    %6 = arith.subf %0, %5 : vector<16x32xf32>
    %7 = arith.mulf %6, %6 : vector<16x32xf32>
    %cst_2 = arith.constant dense<0.000000e+00> : vector<16xf32>
    %8 = vector.multi_reduction <add>, %7, %cst_2 [1] : vector<16x32xf32> to vector<16xf32>
    %9 = vector.shape_cast %8 : vector<16xf32> to vector<16x1xf32>
    %cst_3 = arith.constant 3.200000e+01 : f32
    %10 = vector.broadcast %cst_3 : f32 to vector<16x1xf32>
    %11 = arith.divf %9, %10 : vector<16x1xf32>
    %12 = vector.broadcast %4 : vector<16x1xf32> to vector<16x32xf32>
    %13 = arith.subf %0, %12 : vector<16x32xf32>
    %cst_4 = arith.constant 9.99999997E-7 : f32
    %14 = vector.broadcast %cst_4 : f32 to vector<16x1xf32>
    %15 = arith.addf %11, %14 : vector<16x1xf32>
    %16 = math.rsqrt %15 : vector<16x1xf32>
    %17 = vector.broadcast %16 : vector<16x1xf32> to vector<16x32xf32>
    %18 = arith.mulf %13, %17 : vector<16x32xf32>
    %c0_5 = arith.constant 0 : index
    %c0_6 = arith.constant 0 : index
    %19 = vector.load %arg3[%c0_5, %c0_6] : memref<1x32xf32, #tpu.memory_space<vmem>>, vector<1x32xf32>
    %20 = vector.broadcast %19 : vector<1x32xf32> to vector<16x32xf32>
    %21 = arith.mulf %18, %20 : vector<16x32xf32>
    %c0_7 = arith.constant 0 : index
    %c0_8 = arith.constant 0 : index
    %22 = vector.load %arg4[%c0_7, %c0_8] : memref<1x32xf32, #tpu.memory_space<vmem>>, vector<1x32xf32>
    %23 = vector.broadcast %22 : vector<1x32xf32> to vector<16x32xf32>
    %24 = arith.addf %21, %23 : vector<16x32xf32>
    %25 = arith.truncf %24 : vector<16x32xf32> to vector<16x32xbf16>
    %c0_9 = arith.constant 0 : index
    %c0_10 = arith.constant 0 : index
    %26 = vector.load %arg5[%c0_9, %c0_10] : memref<32x32xf32, #tpu.memory_space<vmem>>, vector<32x32xf32>
    %27 = arith.truncf %26 : vector<32x32xf32> to vector<32x32xbf16>
    %cst_11 = arith.constant dense<0.000000e+00> : vector<16x32xf32>
    %28 = tpu.matmul %25, %27, %cst_11 {dimension_numbers = #tpu.dot_dimension_numbers<[1], [0], [0], [1], [0, 0, 1, 1], [], []>} : vector<16x32xbf16>, vector<32x32xbf16>, vector<16x32xf32> -> vector<16x32xf32>
    %c0_12 = arith.constant 0 : index
    %c0_13 = arith.constant 0 : index
    %29 = vector.load %arg6[%c0_12, %c0_13] : memref<1x32xf32, #tpu.memory_space<vmem>>, vector<1x32xf32>
    %30 = vector.broadcast %29 : vector<1x32xf32> to vector<16x32xf32>
    %31 = arith.addf %28, %30 : vector<16x32xf32>
    %c0_14 = arith.constant 0 : index
    %c0_15 = arith.constant 0 : index
    %32 = vector.load %arg7[%c0_14, %c0_15] : memref<16x32xf32, #tpu.memory_space<vmem>>, vector<16x32xf32>
    tpu.vector_store %arg7[%c0_14, %c0_15], %31 {strides = array<i32>} : memref<16x32xf32, #tpu.memory_space<vmem>>, vector<16x32xf32>,
    return
  }
  func.func @transform_0(%arg0: i32, %arg1: i32) -> (i32, i32) {
    %c0_i32 = arith.constant 0 : i32
    %c0_i32_0 = arith.constant 0 : i32
    return %arg0, %c0_i32 : i32, i32
  }
  func.func @transform_1(%arg0: i32, %arg1: i32) -> (i32, i32) {
    %c0_i32 = arith.constant 0 : i32
    %c0_i32_0 = arith.constant 0 : i32
    %c0_i32_1 = arith.constant 0 : i32
    return %c0_i32, %c0_i32_0 : i32, i32
  }
  func.func @transform_2(%arg0: i32, %arg1: i32) -> (i32, i32) {
    %c0_i32 = arith.constant 0 : i32
    %c0_i32_0 = arith.constant 0 : i32
    %c0_i32_1 = arith.constant 0 : i32
    return %c0_i32, %c0_i32_0 : i32, i32
  }
  func.func @transform_3(%arg0: i32, %arg1: i32) -> (i32, i32) {
    %c0_i32 = arith.constant 0 : i32
    %c0_i32_0 = arith.constant 0 : i32
    return %c0_i32, %arg1 : i32, i32
  }
  func.func @transform_4(%arg0: i32, %arg1: i32) -> (i32, i32) {
    %c0_i32 = arith.constant 0 : i32
    %c0_i32_0 = arith.constant 0 : i32
    return %c0_i32, %arg1 : i32, i32
  }
  func.func @transform_5(%arg0: i32, %arg1: i32) -> (i32, i32) {
    %c0_i32 = arith.constant 0 : i32
    return %arg0, %arg1 : i32, i32
  }
}

module attributes {stable_mosaic.version = 11 : i64} {
  func.func @_fused_linear_kernel(%arg0: i32, %arg1: i32, %arg2: memref<16x32xf32, #tpu.memory_space<vmem>>, %arg3: memref<32x32xf32, #tpu.memory_space<vmem>>, %arg4: memref<1x32xf32, #tpu.memory_space<vmem>>, %arg5: memref<16x32xf32, #tpu.memory_space<vmem>>, %arg6: memref<16x32xf32, #tpu.memory_space<vmem>>) attributes {dimension_semantics = [#tpu.dimension_semantics<parallel>, #tpu.dimension_semantics<parallel>], iteration_bounds = array<i64: 1, 1>, scalar_prefetch = 0 : i64, scratch_operands = 0 : i64, tpu.core_type = #tpu.core_type<tc>, window_params = [{transform_indices = @transform_0, window_bounds = array<i64: 16, 32>}, {transform_indices = @transform_1, window_bounds = array<i64: 32, 32>}, {transform_indices = @transform_2, window_bounds = array<i64: 1, 32>}, {transform_indices = @transform_3, window_bounds = array<i64: 16, 32>}, {transform_indices = @transform_4, window_bounds = array<i64: 16, 32>}]} {
    %c0 = arith.constant 0 : index
    %c0_0 = arith.constant 0 : index
    %0 = vector.load %arg2[%c0, %c0_0] : memref<16x32xf32, #tpu.memory_space<vmem>>, vector<16x32xf32>
    %1 = arith.truncf %0 : vector<16x32xf32> to vector<16x32xbf16>
    %c0_1 = arith.constant 0 : index
    %c0_2 = arith.constant 0 : index
    %2 = vector.load %arg3[%c0_1, %c0_2] : memref<32x32xf32, #tpu.memory_space<vmem>>, vector<32x32xf32>
    %3 = arith.truncf %2 : vector<32x32xf32> to vector<32x32xbf16>
    %cst = arith.constant dense<0.000000e+00> : vector<16x32xf32>
    %4 = tpu.matmul %1, %3, %cst {dimension_numbers = #tpu.dot_dimension_numbers<[1], [0], [0], [1], [0, 0, 1, 1], [], []>} : vector<16x32xbf16>, vector<32x32xbf16>, vector<16x32xf32> -> vector<16x32xf32>
    %c0_3 = arith.constant 0 : index
    %c0_4 = arith.constant 0 : index
    %5 = vector.load %arg4[%c0_3, %c0_4] : memref<1x32xf32, #tpu.memory_space<vmem>>, vector<1x32xf32>
    %6 = vector.broadcast %5 : vector<1x32xf32> to vector<16x32xf32>
    %7 = arith.addf %4, %6 : vector<16x32xf32>
    %c0_5 = arith.constant 0 : index
    %c0_6 = arith.constant 0 : index
    %8 = vector.load %arg5[%c0_5, %c0_6] : memref<16x32xf32, #tpu.memory_space<vmem>>, vector<16x32xf32>
    %9 = arith.addf %7, %8 : vector<16x32xf32>
    %c0_7 = arith.constant 0 : index
    %c0_8 = arith.constant 0 : index
    %10 = vector.load %arg6[%c0_7, %c0_8] : memref<16x32xf32, #tpu.memory_space<vmem>>, vector<16x32xf32>
    tpu.vector_store %arg6[%c0_7, %c0_8], %9 {strides = array<i32>} : memref<16x32xf32, #tpu.memory_space<vmem>>, vector<16x32xf32>,
    return
  }
  func.func @transform_0(%arg0: i32, %arg1: i32) -> (i32, i32) {
    %c0_i32 = arith.constant 0 : i32
    %c0_i32_0 = arith.constant 0 : i32
    return %arg0, %c0_i32 : i32, i32
  }
  func.func @transform_1(%arg0: i32, %arg1: i32) -> (i32, i32) {
    %c0_i32 = arith.constant 0 : i32
    %c0_i32_0 = arith.constant 0 : i32
    return %c0_i32, %arg1 : i32, i32
  }
  func.func @transform_2(%arg0: i32, %arg1: i32) -> (i32, i32) {
    %c0_i32 = arith.constant 0 : i32
    %c0_i32_0 = arith.constant 0 : i32
    return %c0_i32, %arg1 : i32, i32
  }
  func.func @transform_3(%arg0: i32, %arg1: i32) -> (i32, i32) {
    %c0_i32 = arith.constant 0 : i32
    return %arg0, %arg1 : i32, i32
  }
  func.func @transform_4(%arg0: i32, %arg1: i32) -> (i32, i32) {
    %c0_i32 = arith.constant 0 : i32
    return %arg0, %arg1 : i32, i32
  }
}

module attributes {stable_mosaic.version = 11 : i64} {
  func.func @_attention_kernel(%arg0: i32, %arg1: memref<1x8x32xf32, #tpu.memory_space<vmem>>, %arg2: memref<1x8x64xf32, #tpu.memory_space<vmem>>, %arg3: memref<1x1x8xf32, #tpu.memory_space<vmem>>, %arg4: memref<1x8x32xf32, #tpu.memory_space<vmem>>, %arg5: memref<1x8x8xf32, #tpu.memory_space<vmem>>) attributes {dimension_semantics = [#tpu.dimension_semantics<parallel>], iteration_bounds = array<i64: 2>, scalar_prefetch = 0 : i64, scratch_operands = 0 : i64, tpu.core_type = #tpu.core_type<tc>, window_params = [{transform_indices = @transform_0, window_bounds = array<i64: 1, 8, 32>}, {transform_indices = @transform_1, window_bounds = array<i64: 1, 8, 64>}, {transform_indices = @transform_2, window_bounds = array<i64: 1, 1, 8>}, {transform_indices = @transform_3, window_bounds = array<i64: 1, 8, 32>}, {transform_indices = @transform_4, window_bounds = array<i64: 1, 8, 8>}]} {
    %c0 = arith.constant 0 : index
    %c0_0 = arith.constant 0 : index
    %c0_1 = arith.constant 0 : index
    %0 = vector.load %arg1[%c0, %c0_0, %c0_1] : memref<1x8x32xf32, #tpu.memory_space<vmem>>, vector<1x8x32xf32>
    %1 = vector.shape_cast %0 : vector<1x8x32xf32> to vector<8x32xf32>
    %c0_2 = arith.constant 0 : index
    %c0_3 = arith.constant 0 : index
    %c0_4 = arith.constant 0 : index
    %2 = vector.load %arg2[%c0_2, %c0_3, %c0_4] : memref<1x8x64xf32, #tpu.memory_space<vmem>>, vector<1x8x64xf32>
    %3 = vector.shape_cast %2 : vector<1x8x64xf32> to vector<8x64xf32>
    %4 = vector.extract_strided_slice %3 {offsets = [0, 0], sizes = [8, 32], strides = [1, 1]} : vector<8x64xf32> to vector<8x32xf32>
    %5 = vector.extract_strided_slice %3 {offsets = [0, 32], sizes = [8, 32], strides = [1, 1]} : vector<8x64xf32> to vector<8x32xf32>
    %c0_5 = arith.constant 0 : index
    %c0_6 = arith.constant 0 : index
    %c0_7 = arith.constant 0 : index
    %6 = vector.load %arg3[%c0_5, %c0_6, %c0_7] : memref<1x1x8xf32, #tpu.memory_space<vmem>>, vector<1x1x8xf32>
    %7 = vector.shape_cast %6 : vector<1x1x8xf32> to vector<1x8xf32>
    %8 = vector.extract_strided_slice %1 {offsets = [0, 0], sizes = [8, 8], strides = [1, 1]} : vector<8x32xf32> to vector<8x8xf32>
    %9 = arith.truncf %8 : vector<8x8xf32> to vector<8x8xbf16>
    %10 = vector.extract_strided_slice %4 {offsets = [0, 0], sizes = [8, 8], strides = [1, 1]} : vector<8x32xf32> to vector<8x8xf32>
    %11 = arith.truncf %10 : vector<8x8xf32> to vector<8x8xbf16>
    %12 = vector.extract_strided_slice %5 {offsets = [0, 0], sizes = [8, 8], strides = [1, 1]} : vector<8x32xf32> to vector<8x8xf32>
    %13 = arith.truncf %12 : vector<8x8xf32> to vector<8x8xbf16>
    %cst = arith.constant dense<0.000000e+00> : vector<8x8xf32>
    %14 = tpu.matmul %9, %11, %cst {dimension_numbers = #tpu.dot_dimension_numbers<[1], [1], [0], [0], [0, 0, 1, 0], [], []>} : vector<8x8xbf16>, vector<8x8xbf16>, vector<8x8xf32> -> vector<8x8xf32>
    %cst_8 = arith.constant 0.353553385 : f32
    %15 = vector.broadcast %cst_8 : f32 to vector<8x8xf32>
    %16 = arith.mulf %14, %15 : vector<8x8xf32>
    %17 = vector.broadcast %7 : vector<1x8xf32> to vector<8x8xf32>
    %18 = arith.addf %16, %17 : vector<8x8xf32>
    %cst_9 = arith.constant dense<0xFF800000> : vector<8xf32>
    %19 = vector.multi_reduction <maximumf>, %18, %cst_9 [1] : vector<8x8xf32> to vector<8xf32>
    %20 = vector.shape_cast %19 : vector<8xf32> to vector<8x1xf32>
    %21 = vector.broadcast %20 : vector<8x1xf32> to vector<8x8xf32>
    %22 = arith.subf %18, %21 : vector<8x8xf32>
    %23 = math.exp %22 : vector<8x8xf32>
    %cst_10 = arith.constant dense<0.000000e+00> : vector<8xf32>
    %24 = vector.multi_reduction <add>, %23, %cst_10 [1] : vector<8x8xf32> to vector<8xf32>
    %25 = vector.shape_cast %24 : vector<8xf32> to vector<8x1xf32>
    %26 = vector.broadcast %25 : vector<8x1xf32> to vector<8x8xf32>
    %27 = arith.divf %23, %26 : vector<8x8xf32>
    %28 = arith.truncf %27 : vector<8x8xf32> to vector<8x8xbf16>
    %cst_11 = arith.constant dense<0.000000e+00> : vector<8x8xf32>
    %29 = tpu.matmul %28, %13, %cst_11 {dimension_numbers = #tpu.dot_dimension_numbers<[1], [0], [0], [1], [0, 0, 1, 1], [], []>} : vector<8x8xbf16>, vector<8x8xbf16>, vector<8x8xf32> -> vector<8x8xf32>
    %30 = vector.extract_strided_slice %1 {offsets = [0, 8], sizes = [8, 8], strides = [1, 1]} : vector<8x32xf32> to vector<8x8xf32>
    %31 = arith.truncf %30 : vector<8x8xf32> to vector<8x8xbf16>
    %32 = vector.extract_strided_slice %4 {offsets = [0, 8], sizes = [8, 8], strides = [1, 1]} : vector<8x32xf32> to vector<8x8xf32>
    %33 = arith.truncf %32 : vector<8x8xf32> to vector<8x8xbf16>
    %34 = vector.extract_strided_slice %5 {offsets = [0, 8], sizes = [8, 8], strides = [1, 1]} : vector<8x32xf32> to vector<8x8xf32>
    %35 = arith.truncf %34 : vector<8x8xf32> to vector<8x8xbf16>
    %cst_12 = arith.constant dense<0.000000e+00> : vector<8x8xf32>
    %36 = tpu.matmul %31, %33, %cst_12 {dimension_numbers = #tpu.dot_dimension_numbers<[1], [1], [0], [0], [0, 0, 1, 0], [], []>} : vector<8x8xbf16>, vector<8x8xbf16>, vector<8x8xf32> -> vector<8x8xf32>
    %cst_13 = arith.constant 0.353553385 : f32
    %37 = vector.broadcast %cst_13 : f32 to vector<8x8xf32>
    %38 = arith.mulf %36, %37 : vector<8x8xf32>
    %39 = vector.broadcast %7 : vector<1x8xf32> to vector<8x8xf32>
    %40 = arith.addf %38, %39 : vector<8x8xf32>
    %cst_14 = arith.constant dense<0xFF800000> : vector<8xf32>
    %41 = vector.multi_reduction <maximumf>, %40, %cst_14 [1] : vector<8x8xf32> to vector<8xf32>
    %42 = vector.shape_cast %41 : vector<8xf32> to vector<8x1xf32>
    %43 = vector.broadcast %42 : vector<8x1xf32> to vector<8x8xf32>
    %44 = arith.subf %40, %43 : vector<8x8xf32>
    %45 = math.exp %44 : vector<8x8xf32>
    %cst_15 = arith.constant dense<0.000000e+00> : vector<8xf32>
    %46 = vector.multi_reduction <add>, %45, %cst_15 [1] : vector<8x8xf32> to vector<8xf32>
    %47 = vector.shape_cast %46 : vector<8xf32> to vector<8x1xf32>
    %48 = vector.broadcast %47 : vector<8x1xf32> to vector<8x8xf32>
    %49 = arith.divf %45, %48 : vector<8x8xf32>
    %50 = arith.truncf %49 : vector<8x8xf32> to vector<8x8xbf16>
    %cst_16 = arith.constant dense<0.000000e+00> : vector<8x8xf32>
    %51 = tpu.matmul %50, %35, %cst_16 {dimension_numbers = #tpu.dot_dimension_numbers<[1], [0], [0], [1], [0, 0, 1, 1], [], []>} : vector<8x8xbf16>, vector<8x8xbf16>, vector<8x8xf32> -> vector<8x8xf32>
    %52 = arith.addf %27, %49 : vector<8x8xf32>
    %53 = vector.extract_strided_slice %1 {offsets = [0, 16], sizes = [8, 8], strides = [1, 1]} : vector<8x32xf32> to vector<8x8xf32>
    %54 = arith.truncf %53 : vector<8x8xf32> to vector<8x8xbf16>
    %55 = vector.extract_strided_slice %4 {offsets = [0, 16], sizes = [8, 8], strides = [1, 1]} : vector<8x32xf32> to vector<8x8xf32>
    %56 = arith.truncf %55 : vector<8x8xf32> to vector<8x8xbf16>
    %57 = vector.extract_strided_slice %5 {offsets = [0, 16], sizes = [8, 8], strides = [1, 1]} : vector<8x32xf32> to vector<8x8xf32>
    %58 = arith.truncf %57 : vector<8x8xf32> to vector<8x8xbf16>
    %cst_17 = arith.constant dense<0.000000e+00> : vector<8x8xf32>
    %59 = tpu.matmul %54, %56, %cst_17 {dimension_numbers = #tpu.dot_dimension_numbers<[1], [1], [0], [0], [0, 0, 1, 0], [], []>} : vector<8x8xbf16>, vector<8x8xbf16>, vector<8x8xf32> -> vector<8x8xf32>
    %cst_18 = arith.constant 0.353553385 : f32
    %60 = vector.broadcast %cst_18 : f32 to vector<8x8xf32>
    %61 = arith.mulf %59, %60 : vector<8x8xf32>
    %62 = vector.broadcast %7 : vector<1x8xf32> to vector<8x8xf32>
    %63 = arith.addf %61, %62 : vector<8x8xf32>
    %cst_19 = arith.constant dense<0xFF800000> : vector<8xf32>
    %64 = vector.multi_reduction <maximumf>, %63, %cst_19 [1] : vector<8x8xf32> to vector<8xf32>
    %65 = vector.shape_cast %64 : vector<8xf32> to vector<8x1xf32>
    %66 = vector.broadcast %65 : vector<8x1xf32> to vector<8x8xf32>
    %67 = arith.subf %63, %66 : vector<8x8xf32>
    %68 = math.exp %67 : vector<8x8xf32>
    %cst_20 = arith.constant dense<0.000000e+00> : vector<8xf32>
    %69 = vector.multi_reduction <add>, %68, %cst_20 [1] : vector<8x8xf32> to vector<8xf32>
    %70 = vector.shape_cast %69 : vector<8xf32> to vector<8x1xf32>
    %71 = vector.broadcast %70 : vector<8x1xf32> to vector<8x8xf32>
    %72 = arith.divf %68, %71 : vector<8x8xf32>
    %73 = arith.truncf %72 : vector<8x8xf32> to vector<8x8xbf16>
    %cst_21 = arith.constant dense<0.000000e+00> : vector<8x8xf32>
    %74 = tpu.matmul %73, %58, %cst_21 {dimension_numbers = #tpu.dot_dimension_numbers<[1], [0], [0], [1], [0, 0, 1, 1], [], []>} : vector<8x8xbf16>, vector<8x8xbf16>, vector<8x8xf32> -> vector<8x8xf32>
    %75 = arith.addf %52, %72 : vector<8x8xf32>
    %76 = vector.extract_strided_slice %1 {offsets = [0, 24], sizes = [8, 8], strides = [1, 1]} : vector<8x32xf32> to vector<8x8xf32>
    %77 = arith.truncf %76 : vector<8x8xf32> to vector<8x8xbf16>
    %78 = vector.extract_strided_slice %4 {offsets = [0, 24], sizes = [8, 8], strides = [1, 1]} : vector<8x32xf32> to vector<8x8xf32>
    %79 = arith.truncf %78 : vector<8x8xf32> to vector<8x8xbf16>
    %80 = vector.extract_strided_slice %5 {offsets = [0, 24], sizes = [8, 8], strides = [1, 1]} : vector<8x32xf32> to vector<8x8xf32>
    %81 = arith.truncf %80 : vector<8x8xf32> to vector<8x8xbf16>
    %cst_22 = arith.constant dense<0.000000e+00> : vector<8x8xf32>
    %82 = tpu.matmul %77, %79, %cst_22 {dimension_numbers = #tpu.dot_dimension_numbers<[1], [1], [0], [0], [0, 0, 1, 0], [], []>} : vector<8x8xbf16>, vector<8x8xbf16>, vector<8x8xf32> -> vector<8x8xf32>
    %cst_23 = arith.constant 0.353553385 : f32
    %83 = vector.broadcast %cst_23 : f32 to vector<8x8xf32>
    %84 = arith.mulf %82, %83 : vector<8x8xf32>
    %85 = vector.broadcast %7 : vector<1x8xf32> to vector<8x8xf32>
    %86 = arith.addf %84, %85 : vector<8x8xf32>
    %cst_24 = arith.constant dense<0xFF800000> : vector<8xf32>
    %87 = vector.multi_reduction <maximumf>, %86, %cst_24 [1] : vector<8x8xf32> to vector<8xf32>
    %88 = vector.shape_cast %87 : vector<8xf32> to vector<8x1xf32>
    %89 = vector.broadcast %88 : vector<8x1xf32> to vector<8x8xf32>
    %90 = arith.subf %86, %89 : vector<8x8xf32>
    %91 = math.exp %90 : vector<8x8xf32>
    %cst_25 = arith.constant dense<0.000000e+00> : vector<8xf32>
    %92 = vector.multi_reduction <add>, %91, %cst_25 [1] : vector<8x8xf32> to vector<8xf32>
    %93 = vector.shape_cast %92 : vector<8xf32> to vector<8x1xf32>
    %94 = vector.broadcast %93 : vector<8x1xf32> to vector<8x8xf32>
    %95 = arith.divf %91, %94 : vector<8x8xf32>
    %96 = arith.truncf %95 : vector<8x8xf32> to vector<8x8xbf16>
    %cst_26 = arith.constant dense<0.000000e+00> : vector<8x8xf32>
    %97 = tpu.matmul %96, %81, %cst_26 {dimension_numbers = #tpu.dot_dimension_numbers<[1], [0], [0], [1], [0, 0, 1, 1], [], []>} : vector<8x8xbf16>, vector<8x8xbf16>, vector<8x8xf32> -> vector<8x8xf32>
    %98 = arith.addf %75, %95 : vector<8x8xf32>
    %99 = tpu.concatenate %29, %51, %74, %97 in 1 : vector<8x8xf32>, vector<8x8xf32>, vector<8x8xf32>, vector<8x8xf32> -> vector<8x32xf32>
    %c0_27 = arith.constant 0 : index
    %c0_28 = arith.constant 0 : index
    %c0_29 = arith.constant 0 : index
    %100 = vector.load %arg4[%c0_27, %c0_28, %c0_29] : memref<1x8x32xf32, #tpu.memory_space<vmem>>, vector<1x8x32xf32>
    %101 = vector.shape_cast %100 : vector<1x8x32xf32> to vector<8x32xf32>
    %102 = vector.shape_cast %99 : vector<8x32xf32> to vector<1x8x32xf32>
    tpu.vector_store %arg4[%c0_27, %c0_28, %c0_29], %102 {strides = array<i32>} : memref<1x8x32xf32, #tpu.memory_space<vmem>>, vector<1x8x32xf32>,
    %cst_30 = arith.constant 2.500000e-01 : f32
    %103 = vector.broadcast %cst_30 : f32 to vector<8x8xf32>
    %104 = arith.mulf %98, %103 : vector<8x8xf32>
    %c0_31 = arith.constant 0 : index
    %c0_32 = arith.constant 0 : index
    %c0_33 = arith.constant 0 : index
    %105 = vector.load %arg5[%c0_31, %c0_32, %c0_33] : memref<1x8x8xf32, #tpu.memory_space<vmem>>, vector<1x8x8xf32>
    %106 = vector.shape_cast %105 : vector<1x8x8xf32> to vector<8x8xf32>
    %107 = vector.shape_cast %104 : vector<8x8xf32> to vector<1x8x8xf32>
    tpu.vector_store %arg5[%c0_31, %c0_32, %c0_33], %107 {strides = array<i32>} : memref<1x8x8xf32, #tpu.memory_space<vmem>>, vector<1x8x8xf32>,
    return
  }
  func.func @transform_0(%arg0: i32) -> (i32, i32, i32) {
    %c0_i32 = arith.constant 0 : i32
    %c0_i32_0 = arith.constant 0 : i32
    %c0_i32_1 = arith.constant 0 : i32
    return %arg0, %c0_i32, %c0_i32_0 : i32, i32, i32
  }
  func.func @transform_1(%arg0: i32) -> (i32, i32, i32) {
    %c0_i32 = arith.constant 0 : i32
    %c0_i32_0 = arith.constant 0 : i32
    %c0_i32_1 = arith.constant 0 : i32
    return %arg0, %c0_i32, %c0_i32_0 : i32, i32, i32
  }
  func.func @transform_2(%arg0: i32) -> (i32, i32, i32) {
    %c0_i32 = arith.constant 0 : i32
    %c0_i32_0 = arith.constant 0 : i32
    %c0_i32_1 = arith.constant 0 : i32
    return %arg0, %c0_i32, %c0_i32_0 : i32, i32, i32
  }
  func.func @transform_3(%arg0: i32) -> (i32, i32, i32) {
    %c0_i32 = arith.constant 0 : i32
    %c0_i32_0 = arith.constant 0 : i32
    %c0_i32_1 = arith.constant 0 : i32
    return %arg0, %c0_i32, %c0_i32_0 : i32, i32, i32
  }
  func.func @transform_4(%arg0: i32) -> (i32, i32, i32) {
    %c0_i32 = arith.constant 0 : i32
    %c0_i32_0 = arith.constant 0 : i32
    %c0_i32_1 = arith.constant 0 : i32
    return %arg0, %c0_i32, %c0_i32_0 : i32, i32, i32
  }
}

module attributes {stable_mosaic.version = 11 : i64} {
  func.func @_fused_linear_kernel(%arg0: i32, %arg1: i32, %arg2: memref<16x32xf32, #tpu.memory_space<vmem>>, %arg3: memref<1x32xf32, #tpu.memory_space<vmem>>, %arg4: memref<1x32xf32, #tpu.memory_space<vmem>>, %arg5: memref<32x64xf32, #tpu.memory_space<vmem>>, %arg6: memref<1x64xf32, #tpu.memory_space<vmem>>, %arg7: memref<16x64xf32, #tpu.memory_space<vmem>>) attributes {dimension_semantics = [#tpu.dimension_semantics<parallel>, #tpu.dimension_semantics<parallel>], iteration_bounds = array<i64: 1, 1>, scalar_prefetch = 0 : i64, scratch_operands = 0 : i64, tpu.core_type = #tpu.core_type<tc>, window_params = [{transform_indices = @transform_0, window_bounds = array<i64: 16, 32>}, {pipeline_mode = #tpu.pipeline_mode<synchronous>, transform_indices = @transform_1, window_bounds = array<i64: 1, 32>}, {pipeline_mode = #tpu.pipeline_mode<synchronous>, transform_indices = @transform_2, window_bounds = array<i64: 1, 32>}, {transform_indices = @transform_3, window_bounds = array<i64: 32, 64>}, {transform_indices = @transform_4, window_bounds = array<i64: 1, 64>}, {transform_indices = @transform_5, window_bounds = array<i64: 16, 64>}]} {
    %c0 = arith.constant 0 : index
    %c0_0 = arith.constant 0 : index
    %0 = vector.load %arg2[%c0, %c0_0] : memref<16x32xf32, #tpu.memory_space<vmem>>, vector<16x32xf32>
    %cst = arith.constant dense<0.000000e+00> : vector<16xf32>
    %1 = vector.multi_reduction <add>, %0, %cst [1] : vector<16x32xf32> to vector<16xf32>
    %2 = vector.shape_cast %1 : vector<16xf32> to vector<16x1xf32>
    %cst_1 = arith.constant 3.200000e+01 : f32
    %3 = vector.broadcast %cst_1 : f32 to vector<16x1xf32>
    %4 = arith.divf %2, %3 : vector<16x1xf32>
    %5 = vector.broadcast %4 : vector<16x1xf32> to vector<16x32xf32>
    %6 = arith.subf %0, %5 : vector<16x32xf32>
    %7 = arith.mulf %6, %6 : vector<16x32xf32>
    %cst_2 = arith.constant dense<0.000000e+00> : vector<16xf32>
    %8 = vector.multi_reduction <add>, %7, %cst_2 [1] : vector<16x32xf32> to vector<16xf32>
    %9 = vector.shape_cast %8 : vector<16xf32> to vector<16x1xf32>
    %cst_3 = arith.constant 3.200000e+01 : f32
    %10 = vector.broadcast %cst_3 : f32 to vector<16x1xf32>
    %11 = arith.divf %9, %10 : vector<16x1xf32>
    %12 = vector.broadcast %4 : vector<16x1xf32> to vector<16x32xf32>
    %13 = arith.subf %0, %12 : vector<16x32xf32>
    %cst_4 = arith.constant 9.99999997E-7 : f32
    %14 = vector.broadcast %cst_4 : f32 to vector<16x1xf32>
    %15 = arith.addf %11, %14 : vector<16x1xf32>
    %16 = math.rsqrt %15 : vector<16x1xf32>
    %17 = vector.broadcast %16 : vector<16x1xf32> to vector<16x32xf32>
    %18 = arith.mulf %13, %17 : vector<16x32xf32>
    %c0_5 = arith.constant 0 : index
    %c0_6 = arith.constant 0 : index
    %19 = vector.load %arg3[%c0_5, %c0_6] : memref<1x32xf32, #tpu.memory_space<vmem>>, vector<1x32xf32>
    %20 = vector.broadcast %19 : vector<1x32xf32> to vector<16x32xf32>
    %21 = arith.mulf %18, %20 : vector<16x32xf32>
    %c0_7 = arith.constant 0 : index
    %c0_8 = arith.constant 0 : index
    %22 = vector.load %arg4[%c0_7, %c0_8] : memref<1x32xf32, #tpu.memory_space<vmem>>, vector<1x32xf32>
    %23 = vector.broadcast %22 : vector<1x32xf32> to vector<16x32xf32>
    %24 = arith.addf %21, %23 : vector<16x32xf32>
    %25 = arith.truncf %24 : vector<16x32xf32> to vector<16x32xbf16>
    %c0_9 = arith.constant 0 : index
    %c0_10 = arith.constant 0 : index
    %26 = vector.load %arg5[%c0_9, %c0_10] : memref<32x64xf32, #tpu.memory_space<vmem>>, vector<32x64xf32>
    %27 = arith.truncf %26 : vector<32x64xf32> to vector<32x64xbf16>
    %cst_11 = arith.constant dense<0.000000e+00> : vector<16x64xf32>
    %28 = tpu.matmul %25, %27, %cst_11 {dimension_numbers = #tpu.dot_dimension_numbers<[1], [0], [0], [1], [0, 0, 1, 1], [], []>} : vector<16x32xbf16>, vector<32x64xbf16>, vector<16x64xf32> -> vector<16x64xf32>
    %c0_12 = arith.constant 0 : index
    %c0_13 = arith.constant 0 : index
    %29 = vector.load %arg6[%c0_12, %c0_13] : memref<1x64xf32, #tpu.memory_space<vmem>>, vector<1x64xf32>
    %30 = vector.broadcast %29 : vector<1x64xf32> to vector<16x64xf32>
    %31 = arith.addf %28, %30 : vector<16x64xf32>
    %cst_14 = arith.constant 0.000000e+00 : f32
    %32 = vector.broadcast %cst_14 : f32 to vector<16x64xf32>
    %33 = arith.maximumf %31, %32 : vector<16x64xf32>
    %c0_15 = arith.constant 0 : index
    %c0_16 = arith.constant 0 : index
    %34 = vector.load %arg7[%c0_15, %c0_16] : memref<16x64xf32, #tpu.memory_space<vmem>>, vector<16x64xf32>
    tpu.vector_store %arg7[%c0_15, %c0_16], %33 {strides = array<i32>} : memref<16x64xf32, #tpu.memory_space<vmem>>, vector<16x64xf32>,
    return
  }
  func.func @transform_0(%arg0: i32, %arg1: i32) -> (i32, i32) {
    %c0_i32 = arith.constant 0 : i32
    %c0_i32_0 = arith.constant 0 : i32
    return %arg0, %c0_i32 : i32, i32
  }
  func.func @transform_1(%arg0: i32, %arg1: i32) -> (i32, i32) {
    %c0_i32 = arith.constant 0 : i32
    %c0_i32_0 = arith.constant 0 : i32
    %c0_i32_1 = arith.constant 0 : i32
    return %c0_i32, %c0_i32_0 : i32, i32
  }
  func.func @transform_2(%arg0: i32, %arg1: i32) -> (i32, i32) {
    %c0_i32 = arith.constant 0 : i32
    %c0_i32_0 = arith.constant 0 : i32
    %c0_i32_1 = arith.constant 0 : i32
    return %c0_i32, %c0_i32_0 : i32, i32
  }
  func.func @transform_3(%arg0: i32, %arg1: i32) -> (i32, i32) {
    %c0_i32 = arith.constant 0 : i32
    %c0_i32_0 = arith.constant 0 : i32
    return %c0_i32, %arg1 : i32, i32
  }
  func.func @transform_4(%arg0: i32, %arg1: i32) -> (i32, i32) {
    %c0_i32 = arith.constant 0 : i32
    %c0_i32_0 = arith.constant 0 : i32
    return %c0_i32, %arg1 : i32, i32
  }
  func.func @transform_5(%arg0: i32, %arg1: i32) -> (i32, i32) {
    %c0_i32 = arith.constant 0 : i32
    return %arg0, %arg1 : i32, i32
  }
}

module attributes {stable_mosaic.version = 11 : i64} {
  func.func @_fused_linear_kernel(%arg0: i32, %arg1: i32, %arg2: memref<16x64xf32, #tpu.memory_space<vmem>>, %arg3: memref<64x32xf32, #tpu.memory_space<vmem>>, %arg4: memref<1x32xf32, #tpu.memory_space<vmem>>, %arg5: memref<16x32xf32, #tpu.memory_space<vmem>>, %arg6: memref<16x32xf32, #tpu.memory_space<vmem>>) attributes {dimension_semantics = [#tpu.dimension_semantics<parallel>, #tpu.dimension_semantics<parallel>], iteration_bounds = array<i64: 1, 1>, scalar_prefetch = 0 : i64, scratch_operands = 0 : i64, tpu.core_type = #tpu.core_type<tc>, window_params = [{transform_indices = @transform_0, window_bounds = array<i64: 16, 64>}, {transform_indices = @transform_1, window_bounds = array<i64: 64, 32>}, {transform_indices = @transform_2, window_bounds = array<i64: 1, 32>}, {transform_indices = @transform_3, window_bounds = array<i64: 16, 32>}, {transform_indices = @transform_4, window_bounds = array<i64: 16, 32>}]} {
    %c0 = arith.constant 0 : index
    %c0_0 = arith.constant 0 : index
    %0 = vector.load %arg2[%c0, %c0_0] : memref<16x64xf32, #tpu.memory_space<vmem>>, vector<16x64xf32>
    %1 = arith.truncf %0 : vector<16x64xf32> to vector<16x64xbf16>
    %c0_1 = arith.constant 0 : index
    %c0_2 = arith.constant 0 : index
    %2 = vector.load %arg3[%c0_1, %c0_2] : memref<64x32xf32, #tpu.memory_space<vmem>>, vector<64x32xf32>
    %3 = arith.truncf %2 : vector<64x32xf32> to vector<64x32xbf16>
    %cst = arith.constant dense<0.000000e+00> : vector<16x32xf32>
    %4 = tpu.matmul %1, %3, %cst {dimension_numbers = #tpu.dot_dimension_numbers<[1], [0], [0], [1], [0, 0, 1, 1], [], []>} : vector<16x64xbf16>, vector<64x32xbf16>, vector<16x32xf32> -> vector<16x32xf32>
    %c0_3 = arith.constant 0 : index
    %c0_4 = arith.constant 0 : index
    %5 = vector.load %arg4[%c0_3, %c0_4] : memref<1x32xf32, #tpu.memory_space<vmem>>, vector<1x32xf32>
    %6 = vector.broadcast %5 : vector<1x32xf32> to vector<16x32xf32>
    %7 = arith.addf %4, %6 : vector<16x32xf32>
    %c0_5 = arith.constant 0 : index
    %c0_6 = arith.constant 0 : index
    %8 = vector.load %arg5[%c0_5, %c0_6] : memref<16x32xf32, #tpu.memory_space<vmem>>, vector<16x32xf32>
    %9 = arith.addf %7, %8 : vector<16x32xf32>
    %c0_7 = arith.constant 0 : index
    %c0_8 = arith.constant 0 : index
    %10 = vector.load %arg6[%c0_7, %c0_8] : memref<16x32xf32, #tpu.memory_space<vmem>>, vector<16x32xf32>
    tpu.vector_store %arg6[%c0_7, %c0_8], %9 {strides = array<i32>} : memref<16x32xf32, #tpu.memory_space<vmem>>, vector<16x32xf32>,
    return
  }
  func.func @transform_0(%arg0: i32, %arg1: i32) -> (i32, i32) {
    %c0_i32 = arith.constant 0 : i32
    %c0_i32_0 = arith.constant 0 : i32
    return %arg0, %c0_i32 : i32, i32
  }
  func.func @transform_1(%arg0: i32, %arg1: i32) -> (i32, i32) {
    %c0_i32 = arith.constant 0 : i32
    %c0_i32_0 = arith.constant 0 : i32
    return %c0_i32, %arg1 : i32, i32
  }
  func.func @transform_2(%arg0: i32, %arg1: i32) -> (i32, i32) {
    %c0_i32 = arith.constant 0 : i32
    %c0_i32_0 = arith.constant 0 : i32
    return %c0_i32, %arg1 : i32, i32
  }
  func.func @transform_3(%arg0: i32, %arg1: i32) -> (i32, i32) {
    %c0_i32 = arith.constant 0 : i32
    return %arg0, %arg1 : i32, i32
  }
  func.func @transform_4(%arg0: i32, %arg1: i32) -> (i32, i32) {
    %c0_i32 = arith.constant 0 : i32
    return %arg0, %arg1 : i32, i32
  }
}

module attributes {stable_mosaic.version = 11 : i64} {
  func.func @_layernorm_kernel(%arg0: i32, %arg1: memref<16x32xf32, #tpu.memory_space<vmem>>, %arg2: memref<1x32xf32, #tpu.memory_space<vmem>>, %arg3: memref<1x32xf32, #tpu.memory_space<vmem>>, %arg4: memref<16x32xf32, #tpu.memory_space<vmem>>) attributes {dimension_semantics = [#tpu.dimension_semantics<parallel>], iteration_bounds = array<i64: 1>, scalar_prefetch = 0 : i64, scratch_operands = 0 : i64, tpu.core_type = #tpu.core_type<tc>, window_params = [{transform_indices = @transform_0, window_bounds = array<i64: 16, 32>}, {pipeline_mode = #tpu.pipeline_mode<synchronous>, transform_indices = @transform_1, window_bounds = array<i64: 1, 32>}, {pipeline_mode = #tpu.pipeline_mode<synchronous>, transform_indices = @transform_2, window_bounds = array<i64: 1, 32>}, {transform_indices = @transform_3, window_bounds = array<i64: 16, 32>}]} {
    %c0 = arith.constant 0 : index
    %c0_0 = arith.constant 0 : index
    %0 = vector.load %arg1[%c0, %c0_0] : memref<16x32xf32, #tpu.memory_space<vmem>>, vector<16x32xf32>
    %cst = arith.constant dense<0.000000e+00> : vector<16xf32>
    %1 = vector.multi_reduction <add>, %0, %cst [1] : vector<16x32xf32> to vector<16xf32>
    %2 = vector.shape_cast %1 : vector<16xf32> to vector<16x1xf32>
    %cst_1 = arith.constant 3.200000e+01 : f32
    %3 = vector.broadcast %cst_1 : f32 to vector<16x1xf32>
    %4 = arith.divf %2, %3 : vector<16x1xf32>
    %5 = vector.broadcast %4 : vector<16x1xf32> to vector<16x32xf32>
    %6 = arith.subf %0, %5 : vector<16x32xf32>
    %7 = arith.mulf %6, %6 : vector<16x32xf32>
    %cst_2 = arith.constant dense<0.000000e+00> : vector<16xf32>
    %8 = vector.multi_reduction <add>, %7, %cst_2 [1] : vector<16x32xf32> to vector<16xf32>
    %9 = vector.shape_cast %8 : vector<16xf32> to vector<16x1xf32>
    %cst_3 = arith.constant 3.200000e+01 : f32
    %10 = vector.broadcast %cst_3 : f32 to vector<16x1xf32>
    %11 = arith.divf %9, %10 : vector<16x1xf32>
    %12 = vector.broadcast %4 : vector<16x1xf32> to vector<16x32xf32>
    %13 = arith.subf %0, %12 : vector<16x32xf32>
    %cst_4 = arith.constant 9.99999997E-7 : f32
    %14 = vector.broadcast %cst_4 : f32 to vector<16x1xf32>
    %15 = arith.addf %11, %14 : vector<16x1xf32>
    %16 = math.rsqrt %15 : vector<16x1xf32>
    %17 = vector.broadcast %16 : vector<16x1xf32> to vector<16x32xf32>
    %18 = arith.mulf %13, %17 : vector<16x32xf32>
    %c0_5 = arith.constant 0 : index
    %c0_6 = arith.constant 0 : index
    %19 = vector.load %arg2[%c0_5, %c0_6] : memref<1x32xf32, #tpu.memory_space<vmem>>, vector<1x32xf32>
    %20 = vector.broadcast %19 : vector<1x32xf32> to vector<16x32xf32>
    %21 = arith.mulf %18, %20 : vector<16x32xf32>
    %c0_7 = arith.constant 0 : index
    %c0_8 = arith.constant 0 : index
    %22 = vector.load %arg3[%c0_7, %c0_8] : memref<1x32xf32, #tpu.memory_space<vmem>>, vector<1x32xf32>
    %23 = vector.broadcast %22 : vector<1x32xf32> to vector<16x32xf32>
    %24 = arith.addf %21, %23 : vector<16x32xf32>
    %c0_9 = arith.constant 0 : index
    %c0_10 = arith.constant 0 : index
    %25 = vector.load %arg4[%c0_9, %c0_10] : memref<16x32xf32, #tpu.memory_space<vmem>>, vector<16x32xf32>
    tpu.vector_store %arg4[%c0_9, %c0_10], %24 {strides = array<i32>} : memref<16x32xf32, #tpu.memory_space<vmem>>, vector<16x32xf32>,
    return
  }
  func.func @transform_0(%arg0: i32) -> (i32, i32) {
    %c0_i32 = arith.constant 0 : i32
    %c0_i32_0 = arith.constant 0 : i32
    return %arg0, %c0_i32 : i32, i32
  }
  func.func @transform_1(%arg0: i32) -> (i32, i32) {
    %c0_i32 = arith.constant 0 : i32
    %c0_i32_0 = arith.constant 0 : i32
    %c0_i32_1 = arith.constant 0 : i32
    return %c0_i32, %c0_i32_0 : i32, i32
  }
  func.func @transform_2(%arg0: i32) -> (i32, i32) {
    %c0_i32 = arith.constant 0 : i32
    %c0_i32_0 = arith.constant 0 : i32
    %c0_i32_1 = arith.constant 0 : i32
    return %c0_i32, %c0_i32_0 : i32, i32
  }
  func.func @transform_3(%arg0: i32) -> (i32, i32) {
    %c0_i32 = arith.constant 0 : i32
    %c0_i32_0 = arith.constant 0 : i32
    return %arg0, %c0_i32 : i32, i32
  }
}

</mosaic_0001>

<bundles_post_ra>
// kernel: decoder_forward_pallas.32
= control target key start
LH: loop header
LB: loop body
LE: loop exit
PB: predicated region body
PF: predicated region fallthrough
CT: control target
= control target key end

     0   :  { %vm28_vm0 = vcmask 261120   ;;  %vm46_vm1 = vcmask 523264   ;;  %s102_s1 = inlined_call_operand.vmem [shape: f32[32,64], index: 1, kind: input, shape index: {}]   ;;  %s103_s0 = inlined_call_operand.vmem [shape: f32[16,32], index: 0, kind: input, shape index: {}]   ;;  %s104_s2 = inlined_call_operand.vmem [shape: f32[1,64], index: 2, kind: input, shape index: {}]   ;;  %s105_s3 = inlined_call_operand.vmem [shape: f32[16,64], index: 3, kind: output, shape index: {}]  }
   0x1   :  { %v20_v0 = vld [vmem:[%s102_s1 + $0x10] sm:$0xff]  ;;  %v21_v1 = vld [vmem:[%s102_s1 + $0x18] sm:$0xff]  ;;  %v18_v2 = vld [vmem:[%s102_s1] sm:$0xff] }
   0x2   :  { %v23_v3 = vpack.c.bf16 %v21_v1, %v20_v0  ;;  %v19_v4 = vld [vmem:[%s102_s1 + $0x8] sm:$0xff]  ;;  %v15_v6 = vld [vmem:[%s103_s0] sm:$0xff] }
   0x3   :  { %v22_v5 = vpack.c.bf16 %v19_v4, %v18_v2  ;;  %v16_v7 = vld [vmem:[%s103_s0 + $0x8] sm:$0xff]  ;;  %v54_v9 = vld [vmem:[%s104_s2] ss:$0 sm:$0xff] }
   0x4   :  { %38 = vmatpush.bf16.msra.mxu0 %v23_v3  ;;  %v17_v8 = vpack.c.bf16 %v16_v7, %v15_v6 }
   0x8   :  { %39 = vmatpush.bf16.msra.mxu0 %v22_v5 }
   0xb   :  { %53 = vmatmul.msk.bf16.vlgmr.msra.gmra.mxu0 %vm28_vm0, %v17_v8 }
  0x88   :  { %v41_v10 = vpop.f32.mrf.mxu0 }
  0x89   :  { %v42_v11 = vadd.f32 %v54_v9, %v41_v10 }
  0x8b   :  { %47 = vst.msk [vmem:[%s105_s3] sm:$0xff] %vm46_vm1, %v42_v11 }
  0x90   :  { %v43_v12 = vpop.f32.mrf.mxu0 }
  0x91   :  { %v44_v13 = vadd.f32 %v54_v9, %v43_v12 }
  0x93   :  { %48 = vst.msk [vmem:[%s105_s3 + $0x8] sm:$0xff] %vm46_vm1, %v44_v13 }

// kernel: decoder_forward_pallas.19
= control target key start
LH: loop header
LB: loop body
LE: loop exit
PB: predicated region body
PF: predicated region fallthrough
CT: control target
= control target key end

     0   :  { %vm23_vm0 = vcmask 261120   ;;  %v133_v4 = vmov 32.0   ;;  %vm115_vm8 = vcmask 785408   ;;  %s202_s0 = inlined_call_operand.vmem [shape: f32[16,32], index: 0, kind: input, shape index: {}]   ;;  %s203_s1 = inlined_call_operand.vmem [shape: f32[1,32], index: 1, kind: input, shape index: {}]   ;;  %s204_s2 = inlined_call_operand.vmem [shape: f32[1,32], index: 2, kind: input, shape index: {}]   ;;  %s205_s4 = inlined_call_operand.vmem [shape: f32[1,96], index: 4, kind: input, shape index: {}]   ;;  %s206_s3 = inlined_call_operand.vmem [shape: f32[32,96], index: 3, kind: input, shape index: {}]   ;;  %s207_s5 = inlined_call_operand.vmem [shape: f32[16,96], index: 5, kind: output, shape index: {}]  }
   0x1   :  { %v21_v0 = vld [vmem:[%s202_s0] sm:$0xff]  ;;  %v22_v2 = vld [vmem:[%s202_s0 + $0x8] sm:$0xff]  ;;  %127 = vrcp.f32 %v133_v4  ;;  %v90_v21 = vld [vmem:[%s206_s3 + $0x10] sm:$0xff] }
   0x2   :  { %v24_v1 = vsel %vm23_vm0, %v21_v0, 0.0  ;;  %v27_v3 = vsel %vm23_vm0, %v22_v2, 0.0  ;;  %v91_v22 = vld [vmem:[%s206_s3 + $0x18] sm:$0xff]  ;;  %v88_v24 = vld [vmem:[%s206_s3] sm:$0xff]  ;;  %v89_v25 = vld [vmem:[%s206_s3 + $0x8] sm:$0xff] }
   0x3   :  { %25 = vadd.xlane.f32.xlu0 %v24_v1  ;;  %v93_v23 = vpack.c.bf16 %v91_v22, %v90_v21  ;;  %v92_v27 = vpack.c.bf16 %v89_v25, %v88_v24  ;;  %v124_v46 = vld [vmem:[%s203_s1] ss:$0 sm:$0xff] }
   0x4   :  { %v125_v51 = vld [vmem:[%s204_s2] ss:$0 sm:$0xff] }
   0x5   :  { %107 = vmatpush.bf16.msra.mxu0 %v93_v23  ;;  %v126_v56 = vld [vmem:[%s205_s4] ss:$0 sm:$0xff] }
   0x7   :  { %v128_v5 = vpop.eup %127 }
   0x8   :  { %v31_v6 = vmul.f32 32.0, %v128_v5  ;;  %vm35_vm1 = vweird.f32 %v128_v5 }
   0x9   :  { %108 = vmatpush.bf16.msra.mxu0 %v92_v27 }
   0xa   :  { %v32_v7 = vsub.f32 1.0, %v31_v6 }
   0xb   :  { %28 = vadd.xlane.f32.xlu0 %v27_v3 }
   0xc   :  { %v33_v8 = vmul.f32 %v128_v5, %v32_v7 }
   0xe   :  { %v34_v9 = vadd.f32 %v128_v5, %v33_v8 }
  0x10   :  { %v36_v10 = vsel %vm35_vm1, %v128_v5, %v34_v9 }
  0x76   :  { %v26_v11 = vpop.xlane.xlu0 %25 }
  0x77   :  { %v37_v12 = vmul.f32 %v36_v10, %v26_v11 }
  0x79   :  { %v39_v13 = vsub.f32 %v21_v0, %v37_v12 }
  0x7b   :  { %v41_v14 = vmul.f32 %v39_v13, %v39_v13 }
  0x7d   :  { %v43_v15 = vsel %vm23_vm0, %v41_v14, 0.0 }
  0x7e   :  { %44 = vadd.xlane.f32.xlu1 %v43_v15  ;;  %v29_v16 = vpop.xlane.xlu0 %28 }
  0x7f   :  { %v38_v17 = vmul.f32 %v36_v10, %v29_v16 }
  0x81   :  { %v40_v18 = vsub.f32 %v22_v2, %v38_v17 }
  0x83   :  { %v42_v19 = vmul.f32 %v40_v18, %v40_v18 }
  0x85   :  { %v46_v20 = vsel %vm23_vm0, %v42_v19, 0.0 }
  0x86   :  { %47 = vadd.xlane.f32.xlu1 %v46_v20 }
  0xf1   :  { %v45_v26 = vpop.xlane.xlu1 %44 }
  0xf2   :  { %v49_v28 = vmul.f32 %v45_v26, %v36_v10 }
  0xf4   :  { %v51_v29 = vadd.f32 1e-06, %v49_v28 }
  0xf6   :  { %129 = vrsqrt.f32 %v51_v29  ;;  %vm59_vm3 = vweird.f32 %v51_v29 }
  0xf9   :  { %v48_v30 = vpop.xlane.xlu1 %47 }
  0xfa   :  { %v50_v31 = vmul.f32 %v48_v30, %v36_v10 }
  0xfc   :  { %v130_v32 = vpop.eup %129  ;;  %v52_v33 = vadd.f32 1e-06, %v50_v31 }
  0xfd   :  { %v54_v34 = vmul.f32 %v130_v32, %v51_v29  ;;  %vm60_vm2 = vweird.f32 %v130_v32 }
  0xfe   :  { %131 = vrsqrt.f32 %v52_v33  ;;  %vm61_vm4 = vmor %vm59_vm3, %vm60_vm2  ;;  %vm69_vm6 = vweird.f32 %v52_v33 }
  0xff   :  { %v55_v35 = vmul.f32 %v130_v32, %v54_v34 }
 0x101   :  { %v56_v36 = vmul.f32 0.5, %v55_v35 }
 0x103   :  { %v57_v37 = vsub.f32 1.5, %v56_v36 }
 0x104   :  { %v132_v38 = vpop.eup %131 }
 0x105   :  { %v58_v39 = vmul.f32 %v130_v32, %v57_v37  ;;  %v64_v40 = vmul.f32 %v132_v38, %v52_v33  ;;  %vm70_vm5 = vweird.f32 %v132_v38 }
 0x106   :  { %vm71_vm7 = vmor %vm69_vm6, %vm70_vm5 }
 0x107   :  { %v65_v41 = vmul.f32 %v132_v38, %v64_v40  ;;  %v62_v42 = vsel %vm61_vm4, %v130_v32, %v58_v39 }
 0x108   :  { %v73_v45 = vmul.f32 %v62_v42, %v39_v13 }
 0x109   :  { %v66_v43 = vmul.f32 0.5, %v65_v41 }
 0x10a   :  { %v79_v50 = vmul.f32 %v124_v46, %v73_v45 }
 0x10b   :  { %v67_v44 = vsub.f32 1.5, %v66_v43 }
 0x10c   :  { %v85_v53 = vadd.f32 %v125_v51, %v79_v50 }
 0x10d   :  { %v68_v47 = vmul.f32 %v132_v38, %v67_v44 }
 0x10f   :  { %v72_v48 = vsel %vm71_vm7, %v132_v38, %v68_v47 }
 0x110   :  { %v74_v49 = vmul.f32 %v72_v48, %v40_v18 }
 0x112   :  { %v80_v52 = vmul.f32 %v124_v46, %v74_v49 }
 0x114   :  { %v86_v54 = vadd.f32 %v125_v51, %v80_v52 }
 0x116   :  { %v87_v55 = vpack.c.bf16 %v86_v54, %v85_v53 }
 0x118   :  { %122 = vmatmul.msk.bf16.vlgmr.msra.gmra.mxu0 %vm23_vm0, %v87_v55 }
 0x195   :  { %v110_v57 = vpop.f32.mrf.mxu0 }
 0x196   :  { %v111_v58 = vadd.f32 %v126_v56, %v110_v57 }
 0x198   :  { %116 = vst.msk [vmem:[%s207_s5] sm:$0xff] %vm115_vm8, %v111_v58 }
 0x19d   :  { %v112_v59 = vpop.f32.mrf.mxu0 }
 0x19e   :  { %v113_v60 = vadd.f32 %v126_v56, %v112_v59 }
 0x1a0   :  { %117 = vst.msk [vmem:[%s207_s5 + $0x8] sm:$0xff] %vm115_vm8, %v113_v60 }

// kernel: decoder_forward_pallas.23
= control target key start
LH: loop header
LB: loop body
LE: loop exit
PB: predicated region body
PF: predicated region fallthrough
CT: control target
= control target key end

     0   :  { %8 = vsyncpa [#allocation3], 0  ;;  %s101_s15 = smov [#allocation2]   ;;  %s102_s17 = smov 128   ;;  %s142_s0 = inlined_call_operand.vmem [shape: f32[16,32], index: 0, kind: input, shape index: {}]   ;;  %s143_s1 = inlined_call_operand.hbm [shape: f32[32,64], index: 1, kind: input, shape index: {}]   ;;  %s144_s2 = inlined_call_operand.vmem [shape: f32[1,64], index: 2, kind: input, shape index: {}]   ;;  %s145_s3 = inlined_call_operand.vmem [shape: f32[16,64], index: 3, kind: output, shape index: {}]  }
   0x1   :  { %s15_s14 = sshll.u32 %s143_s1, 4  ;;  %s17_s16 = sshll.u32 %s101_s15, 4  ;;  %s16_s14 = int_to_ptr.hbm [resolvable:$true] %s15_s14  ;;  %s18_s16 = int_to_ptr.vmem [resolvable:$true] %s17_s16 }
   0x2   :  { %s103_s18 = smov 8  }
   0x3   :  { %23 = dma.hbm_to_vmem [thread:$0]  %s16_s14, 512, %s18_s16, [#allocation3], %s102_s17, %s102_s17, %s103_s18  }
   0x4   :  { %99 = dma.done.wait [#allocation3], 512  }
   0x5   :  { %100 = vsyncadd [#allocation3], 4294966784  ;;  %v36_v0 = vld [vmem:[#allocation2 + $0x10] sm:$0xff]  ;;  %v37_v1 = vld [vmem:[#allocation2 + $0x18] sm:$0xff]  ;;  %vm44_vm0 = vcmask 261120   ;;  %vm62_vm1 = vcmask 523264  }
   0x6   :  { %v34_v2 = vld [vmem:[#allocation2] sm:$0xff]  ;;  %v39_v3 = vpack.c.bf16 %v37_v1, %v36_v0  ;;  %v35_v4 = vld [vmem:[#allocation2 + $0x8] sm:$0xff] }
   0x7   :  { %v38_v5 = vpack.c.bf16 %v35_v4, %v34_v2  ;;  %v31_v6 = vld [vmem:[%s142_s0] sm:$0xff]  ;;  %v32_v7 = vld [vmem:[%s142_s0 + $0x8] sm:$0xff] }
   0x8   :  { %54 = vmatpush.bf16.msra.mxu0 %v39_v3  ;;  %v33_v8 = vpack.c.bf16 %v32_v7, %v31_v6  ;;  %v74_v9 = vld [vmem:[%s144_s2] ss:$0 sm:$0xff] }
   0xc   :  { %55 = vmatpush.bf16.msra.mxu0 %v38_v5 }
   0xf   :  { %70 = vmatmul.msk.bf16.vlgmr.msra.gmra.mxu0 %vm44_vm0, %v33_v8 }
  0x8c   :  { %v57_v10 = vpop.f32.mrf.mxu0 }
  0x8d   :  { %v58_v11 = vadd.f32 %v74_v9, %v57_v10 }
  0x8f   :  { %63 = vst.msk [vmem:[%s145_s3] sm:$0xff] %vm62_vm1, %v58_v11 }
  0x94   :  { %v59_v12 = vpop.f32.mrf.mxu0 }
  0x95   :  { %v60_v13 = vadd.f32 %v74_v9, %v59_v12 }
  0x97   :  { %64 = vst.msk [vmem:[%s145_s3 + $0x8] sm:$0xff] %vm62_vm1, %v60_v13 }
  0x98   :  { %69 = vsyncpa [#allocation3], 1 }

// kernel: decoder_forward_pallas.20
= control target key start
LH: loop header
LB: loop body
LE: loop exit
PB: predicated region body
PF: predicated region fallthrough
CT: control target
= control target key end

     0   :  { %10 = vsyncpa [#allocation3], 0  ;;  %s999_s0 = inlined_call_operand.vmem [shape: f32[2,8,96], index: 0, kind: input, shape index: {}]   ;;  %s1000_s1 = inlined_call_operand.vmem [shape: f32[8,8], index: 1, kind: input, shape index: {}]   ;;  %s1001_s2 = inlined_call_operand.vmem [shape: f32[2,1,8], index: 2, kind: input, shape index: {}]   ;;  %s1002_s3 = inlined_call_operand.vmem [shape: f32[2,8,32], index: 3, kind: output, shape index: {0}]   ;;  %s1003_s4 = inlined_call_operand.hbm [shape: f32[2,8,8], index: 4, kind: output, shape index: {1}]  }
   0x1   :  { %12 = vsyncpa [#allocation3 + $0x1], 0  ;;  %s843_s15 = smov 0   ;;  %s845_s16 = smov 0  }
   0x2   :  { %s847_s17 = smov 0   ;;  %s849_s18 = smov 0  }
   0x3 LB: > { %s864_s19 = sadd.s32 4294967295, %s802_s18   ;;  %s651_s20 = sadd.s32 4294967294, %s802_s18   ;;  %s802_s18 = sphi %s849_s18, %s1009_s18   ;;  %s798_s17 = sphi %s847_s17, %s1008_s17   ;;  %s794_s16 = sphi %s845_s16, %s1007_s16   ;;  %s790_s15 = sphi %s843_s15, %s1006_s15  }
   0x4   : > { %s868_s21 = sadd.s32 1, %s802_s18   ;;  %s124_s22 = sadd.s32 1, %s798_s17 }
   0x5   : > { %s121_s23 = ssub.s32 %s802_s18, %s868_s21  ;;  %p134_p0 = scmp.ne.s32.totalorder %s798_s17, %s794_s16 }
   0x6   : > { %p122_p1 = scmp.eq.s32.totalorder %s121_s23, 0  ;;  %p135_p2 = scmp.eq.s32.totalorder %s864_s19, 1 }
   0x7   : > { %p140_p3 = scmp.ne.s32.totalorder %s794_s16, %s790_s15  ;;  %p141_p4 = scmp.eq.s32.totalorder %s651_s20, 1 }
   0x8   : > { %s879_s24 = scalar_select %p122_p1, %s798_s17, %s124_s22  }
   0x9   : > { %p881_p5 = por %p135_p2, %p134_p0  ;;  %p885_p6 = por %p141_p4, %p140_p3 }
   0xa   : > { %p654_p7 = scmp.ge.s32.totalorder %s802_s18, 1  ;;  %p175_p8 = scmp.lt.s32.totalorder %s802_s18, 3 }
   0xc   : > { %p176_p9 = pnand %p654_p7, %p175_p8 }
   0xd   : > { %p207_p10 = scmp.lt.s32.totalorder (!%p176_p9), %s864_s19, 1  ;;  %s804_s6 = smov (!%p176_p9), 96  }
   0xe   : > { %179 = sbr.rel (%p176_p9) target bundleno = 1193 (0x4a9), region = 32  ;;  %s805_s7 = smov (!%p176_p9), 88  }
   0xf   : > { %s806_s11 = smov (!%p176_p9), 120   ;;  %s807_s14 = smov (!%p176_p9), 64  }
  0x10   : > { %s808_s20 = smov (!%p176_p9), 80   ;;  %s809_s22 = smov (!%p176_p9), 72  }
  0x11   : > { %s810_s23 = smov (!%p176_p9), 112   ;;  %s811_s29 = smov (!%p176_p9), 104  }
  0x12   : > { %s812_s30 = smov (!%p176_p9), 56   ;;  %s815_s9 = smov (!%p176_p9), 8  }
  0x13   : > { %s893_s27 = scalar_select %p207_p10, %s864_s19, 1  ;;  %vm230_vm0 = vcmask 64512   ;;  %v221_v8 = vld [vmem:[%s1000_s1] sm:$0xff]  ;;  %vm282_vm1 = vcmask 1043456  }
  0x15   : > { %s656_s28 = sshll.u32 %s893_s27, 3  ;;  %s213_s10 = scalar_lea.vmem %s1001_s2, %s893_s27 }
  0x16   : > { %s210_s5 = scalar_lea.vmem %s999_s0, %s656_s28  ;;  %v723_v7 = vld [vmem:[%s213_s10] ss:$0 sm:$0xff] }
  0x17   : > { %v219_v0 = vld [vmem:[%s210_s5] sm:$0xff]  ;;  %v918_v9 = vadd.f32 %v723_v7, %v221_v8  ;;  %s813_s5 = smov 40  }
  0x18   : > { %v901_v1 = vpack.c.bf16 %v219_v0, %v219_v0 }
  0x1a   : > { %228 = vrot.lane.b32.xlu0 %v901_v1, %s804_s6  ;;  %301 = vrot.lane.b32.xlu1 %v901_v1, %s805_s7  ;;  %s814_s6 = smov 48   ;;  %s204_s7 = sand.u32 1, %s794_s16  }
  0x1b   : > { %299 = vrot.lane.b32.xlu2 %v901_v1, %s806_s11  ;;  %s655_s8 = sshll.u32 %s204_s7, 3  ;;  %s667_s11 = sshll.u32 %s864_s19, 3 }
  0x1c   : > { %s206_s10 = scalar_lea.vmem [#allocation2], %s655_s8  ;;  %s760_s19 = scalar_lea.hbm %s1003_s4, 16 }
  0x23   : > { %277 = vrot.lane.b32.xlu2 %v901_v1, %s807_s14  ;;  %s554_s14 = scalar_lea.hbm %s1003_s4, %s667_s11 }
  0x2b   : > { %373 = vrot.lane.b32.xlu2 %v901_v1, %s808_s20  ;;  %s556_s20 = sshll.u32 %s206_s10, 4  ;;  %s557_s20 = int_to_ptr.vmem [resolvable:$true] %s556_s20 }
  0x33   : > { %445 = vrot.lane.b32.xlu2 %v901_v1, %s809_s22  ;;  %s558_s22 = sshll.u32 %s554_s14, 4  ;;  %s559_s22 = int_to_ptr.hbm [resolvable:$true] %s558_s22 }
  0x3b   : > { %371 = vrot.lane.b32.xlu2 %v901_v1, %s810_s23  ;;  %s541_s23 = scalar_lea.sflag [#allocation3], %s204_s7 }
  0x75   : > { %v300_v6 = vpop.permute.xlu2 %299 }
  0x7d   : > { %v278_v18 = vpop.permute.xlu2 %277 }
  0x7e   : > { %v284_v19 = vsel %vm282_vm1, %v278_v18, 0 }
  0x7f   : > { %293 = vmatpush.bf16.msra.mxu1 %v284_v19 }
  0x85   : > { %v374_v24 = vpop.permute.xlu2 %373 }
  0x86   : > { %v379_v25 = vsel %vm230_vm0, %v374_v24, 0 }
  0x87   : > { %388 = vmatpush.bf16.xpose.msrb.mxu1 %v379_v25 }
  0x8c   : > { %v229_v2 = vpop.permute.xlu0 %228  ;;  %v302_v4 = vpop.permute.xlu1 %301 }
  0x8d   : > { %v235_v3 = vsel %vm230_vm0, %v229_v2, 0  ;;  %v307_v5 = vsel %vm230_vm0, %v302_v4, 0  ;;  %v446_v29 = vpop.permute.xlu2 %445 }
  0x8e   : > { %244 = vmatpush.bf16.xpose.msra.mxu0 %v235_v3  ;;  %316 = vmatpush.bf16.xpose.msra.mxu2 %v307_v5  ;;  %v451_v30 = vsel %vm230_vm0, %v446_v29, 0 }
  0x95   : > { %658 = vmatmul.msk.bf16.vlgmr.msra.gmra.mxu0 %vm230_vm0, %v901_v1  ;;  %660 = vmatmul.msk.bf16.vlgmr.msra.gmra.mxu2 %vm230_vm0, %v300_v6  ;;  %v372_v45 = vpop.permute.xlu2 %371 }
  0x96   : > { %460 = vmatpush.bf16.xpose.msrb.mxu0 %v451_v30 }
 0x112   : > { %v246_v10 = vpop.f32.mrf.mxu0 }
 0x113   : > { %v250_v11 = vmul.f32 0.35355338, %v246_v10 }
 0x115   : > { %v251_v12 = vadd.f32 %v250_v11, %v918_v9 }
 0x117   : > { %v252_v13 = vsel %vm230_vm0, %v251_v12, -inf }
 0x118   : > { %253 = vmax.xlane.f32.xlu0 %v252_v13  ;;  %v318_v22 = vpop.f32.mrf.mxu2 }
 0x119   : > { %v322_v23 = vmul.f32 0.35355338, %v318_v22 }
 0x11a   : > { %v248_v14 = vpop.f32.mrf.mxu0 }
 0x11b   : > { %v323_v26 = vadd.f32 %v322_v23, %v918_v9 }
 0x11d   : > { %v324_v27 = vsel %vm230_vm0, %v323_v26, -inf }
 0x11e   : > { %325 = vmax.xlane.f32.xlu2 %v324_v27 }
 0x120   : > { %v320_v28 = vpop.f32.mrf.mxu2 }
 0x136   : > { %349 = vrot.lane.b32.xlu2 %v901_v1, %s812_s30 }
 0x18b   : > { %v254_v15 = vpop.xlane.xlu0 %253 }
 0x18c   : > { %v255_v16 = vsub.f32 %v251_v12, %v254_v15 }
 0x18e   : > { %v256_v17 = vmul.f32 1.442695, %v255_v16 }
 0x190   : > { %724 = vpow2.f32 %v256_v17 }
 0x191   : > { %v326_v46 = vpop.xlane.xlu2 %325 }
 0x192   : > { %v327_v47 = vsub.f32 %v323_v26, %v326_v46 }
 0x194   : > { %v328_v49 = vmul.f32 1.442695, %v327_v47 }
 0x196   : > { %v725_v20 = vpop.eup %724 }
 0x197   : > { %v258_v21 = vsel %vm230_vm0, %v725_v20, 0.0 }
 0x198   : > { %259 = vadd.xlane.f32.xlu1 %v258_v21 }
 0x199   : > { %v350_v63 = vpop.permute.xlu2 %349 }
 0x19a   : > { %v355_v0 = vsel %vm282_vm1, %v350_v63, 0 }
 0x19b   : > { %364 = vmatpush.bf16.msra.mxu3 %v355_v0 }
 0x1b1   : > { %443 = vrot.lane.b32.xlu1 %v901_v1, %s811_s29  ;;  %s754_s29 = sshra.s32 %s559_s22, 4  ;;  %s755_s29 = int_to_ptr.hbm [resolvable:$true] %s754_s29 }
 0x1b2   : > { %s756_s30 = scalar_lea.hbm %s755_s29, 8  ;;  %p761_p0 = scmp.lt.s32.totalorder %s755_s29, %s1003_s4 }
 0x1b3   : > { %p757_p11 = scmp.ne.s32.totalorder %s755_s29, %s756_s30  ;;  %p762_p1 = scmp.lt.s32.totalorder %s760_s19, %s756_s30 }
 0x1b5   : > { %p758_p12 = pnand %p757_p11, %p881_p5  ;;  %p763_p2 = por %p762_p1, %p761_p0 }
 0x1b7   : > { %p759_p13 = pneg %p758_p12 }
 0x1b9   : > { %p764_p3 = pnand %p763_p2, %p759_p13 }
 0x20b   : > { %v260_v31 = vpop.xlane.xlu1 %259 }
 0x20c   : > { %726 = vrcp.f32 %v260_v31  ;;  %v272_v35 = vand.u32 2147483648, %v260_v31  ;;  %v270_v37 = vand.u32 2147483647, %v260_v31  ;;  %vm266_vm3 = vweird.f32 %v260_v31 }
 0x20d   : > { %728 = vpow2.f32 %v328_v49 }
 0x20e   : > { %v273_v39 = vor.u32 1.1754944e-38, %v272_v35  ;;  %vm271_vm5 = vcmp.eq.f32.partialorder %v270_v37, 8.507059e+37 }
 0x212   : > { %v727_v32 = vpop.eup %726 }
 0x213   : > { %v262_v33 = vmul.f32 %v727_v32, %v260_v31  ;;  %vm267_vm2 = vweird.f32 %v727_v32  ;;  %v729_v56 = vpop.eup %728 }
 0x214   : > { %vm268_vm4 = vmor %vm266_vm3, %vm267_vm2  ;;  %v330_v58 = vsel %vm230_vm0, %v729_v56, 0.0 }
 0x215   : > { %v263_v34 = vsub.f32 1.0, %v262_v33 }
 0x217   : > { %v264_v36 = vmul.f32 %v727_v32, %v263_v34 }
 0x219   : > { %v265_v38 = vadd.f32 %v727_v32, %v264_v36 }
 0x21b   : > { %v269_v40 = vsel %vm268_vm4, %v727_v32, %v265_v38 }
 0x21c   : > { %v274_v41 = vsel %vm271_vm5, %v273_v39, %v269_v40 }
 0x21d   : > { %v933_v42 = vmul.f32 %v725_v20, %v274_v41 }
 0x21f   : > { %v276_v43 = vpack.c.bf16 %v933_v42, %v933_v42 }
 0x221   : > { %659 = vmatmul.msk.bf16.vlgmr.msra.gmra.mxu1 %vm230_vm0, %v276_v43 }
 0x223   : > { %v444_v44 = vpop.permute.xlu1 %443 }
 0x224   : > { %664 = vmatmul.msk.bf16.vlgmr.msrb.gmra.mxu0 %vm230_vm0, %v444_v44 }
 0x231   : > { %662 = vmatmul.msk.bf16.vlgmr.msrb.gmra.mxu1 %vm230_vm0, %v372_v45 }
 0x29e   : > { %v941_v48 = vpop.f32.mrf.mxu1 }
 0x2a1   : > { %v462_v50 = vpop.f32.mrf.mxu0 }
 0x2a2   : > { %v466_v51 = vmul.f32 0.35355338, %v462_v50 }
 0x2a4   : > { %v467_v52 = vadd.f32 %v466_v51, %v918_v9 }
 0x2a6   : > { %v297_v53 = vpop.f32.mrf.mxu1  ;;  %v468_v54 = vsel %vm230_vm0, %v467_v52, -inf }
 0x2a7   : > { %469 = vmax.xlane.f32.xlu0 %v468_v54 }
 0x2a9   : > { %v464_v55 = vpop.f32.mrf.mxu0 }
 0x2ae   : > { %v390_v57 = vpop.f32.mrf.mxu1 }
 0x2af   : > { %v394_v59 = vmul.f32 0.35355338, %v390_v57  ;;  %331 = vadd.xlane.f32.xlu0 %v330_v58 }
 0x2b1   : > { %v395_v60 = vadd.f32 %v394_v59, %v918_v9 }
 0x2b3   : > { %v396_v61 = vsel %vm230_vm0, %v395_v60, -inf }
 0x2b4   : > { %397 = vmax.xlane.f32.xlu1 %v396_v61 }
 0x2b6   : > { %v392_v62 = vpop.f32.mrf.mxu1 }
 0x2cd   : > { %493 = vrot.lane.b32.xlu1 %v901_v1, %s813_s5 }
 0x31a   : > { %v470_v2 = vpop.xlane.xlu0 %469 }
 0x31b   : > { %v471_v3 = vsub.f32 %v467_v52, %v470_v2 }
 0x31d   : > { %v472_v4 = vmul.f32 1.442695, %v471_v3 }
 0x31f   : > { %730 = vpow2.f32 %v472_v4 }
 0x322   : > { %v332_v5 = vpop.xlane.xlu0 %331 }
 0x323   : > { %732 = vrcp.f32 %v332_v5  ;;  %v344_v14 = vand.u32 2147483648, %v332_v5  ;;  %v342_v16 = vand.u32 2147483647, %v332_v5  ;;  %vm338_vm7 = vweird.f32 %v332_v5 }
 0x325   : > { %v731_v6 = vpop.eup %730  ;;  %v345_v18 = vor.u32 1.1754944e-38, %v344_v14  ;;  %vm343_vm9 = vcmp.eq.f32.partialorder %v342_v16, 8.507059e+37 }
 0x326   : > { %v474_v7 = vsel %vm230_vm0, %v731_v6, 0.0 }
 0x327   : > { %v398_v8 = vpop.xlane.xlu1 %397  ;;  %475 = vadd.xlane.f32.xlu0 %v474_v7 }
 0x328   : > { %v399_v9 = vsub.f32 %v395_v60, %v398_v8 }
 0x329   : > { %v733_v10 = vpop.eup %732 }
 0x32a   : > { %v334_v11 = vmul.f32 %v733_v10, %v332_v5  ;;  %v400_v12 = vmul.f32 1.442695, %v399_v9  ;;  %vm339_vm6 = vweird.f32 %v733_v10 }
 0x32b   : > { %vm340_vm8 = vmor %vm338_vm7, %vm339_vm6 }
 0x32c   : > { %v335_v13 = vsub.f32 1.0, %v334_v11  ;;  %734 = vpow2.f32 %v400_v12 }
 0x32e   : > { %v336_v15 = vmul.f32 %v733_v10, %v335_v13 }
 0x330   : > { %v337_v17 = vadd.f32 %v733_v10, %v336_v15 }
 0x332   : > { %v735_v19 = vpop.eup %734  ;;  %v341_v20 = vsel %vm340_vm8, %v733_v10, %v337_v17 }
 0x333   : > { %v402_v21 = vsel %vm230_vm0, %v735_v19, 0.0  ;;  %v346_v22 = vsel %vm343_vm9, %v345_v18, %v341_v20 }
 0x334   : > { %403 = vadd.xlane.f32.xlu0 %v402_v21  ;;  %v347_v23 = vmul.f32 %v729_v56, %v346_v22 }
 0x336   : > { %v348_v24 = vpack.c.bf16 %v347_v23, %v347_v23  ;;  %v370_v52 = vadd.f32 %v347_v23, %v933_v42 }
 0x338   : > { %661 = vmatmul.msk.bf16.vlgmr.msra.gmra.mxu3 %vm230_vm0, %v348_v24 }
 0x33f   : > { %v494_v25 = vpop.permute.xlu1 %493 }
 0x340   : > { %v499_v26 = vsel %vm282_vm1, %v494_v25, 0 }
 0x341   : > { %508 = vmatpush.bf16.msrb.mxu2 %v499_v26 }
 0x348   : > { %421 = vrot.lane.b32.xlu0 %v901_v1, %s814_s6 }
 0x39a   : > { %v476_v27 = vpop.xlane.xlu0 %475 }
 0x39b   : > { %736 = vrcp.f32 %v476_v27  ;;  %v488_v31 = vand.u32 2147483648, %v476_v27  ;;  %v486_v33 = vand.u32 2147483647, %v476_v27  ;;  %vm482_vm11 = vweird.f32 %v476_v27 }
 0x39d   : > { %v489_v36 = vor.u32 1.1754944e-38, %v488_v31  ;;  %vm487_vm13 = vcmp.eq.f32.partialorder %v486_v33, 8.507059e+37 }
 0x3a1   : > { %v737_v28 = vpop.eup %736 }
 0x3a2   : > { %v478_v29 = vmul.f32 %v737_v28, %v476_v27  ;;  %vm483_vm10 = vweird.f32 %v737_v28 }
 0x3a3   : > { %vm484_vm12 = vmor %vm482_vm11, %vm483_vm10 }
 0x3a4   : > { %v479_v30 = vsub.f32 1.0, %v478_v29 }
 0x3a6   : > { %v480_v32 = vmul.f32 %v737_v28, %v479_v30 }
 0x3a7   : > { %v404_v34 = vpop.xlane.xlu0 %403 }
 0x3a8   : > { %v481_v35 = vadd.f32 %v737_v28, %v480_v32  ;;  %738 = vrcp.f32 %v404_v34  ;;  %v416_v44 = vand.u32 2147483648, %v404_v34  ;;  %v414_v46 = vand.u32 2147483647, %v404_v34 }
 0x3a9   : > { %vm410_vm15 = vweird.f32 %v404_v34 }
 0x3aa   : > { %v485_v1 = vsel %vm484_vm12, %v737_v28, %v481_v35  ;;  %v417_v49 = vor.u32 1.1754944e-38, %v416_v44  ;;  %vm415_vm3 = vcmp.eq.f32.partialorder %v414_v46, 8.507059e+37 }
 0x3ab   : > { %v490_v37 = vsel %vm487_vm13, %v489_v36, %v485_v1 }
 0x3ac   : > { %v491_v38 = vmul.f32 %v731_v6, %v490_v37 }
 0x3ae   : > { %v739_v39 = vpop.eup %738  ;;  %v492_v40 = vpack.c.bf16 %v491_v38, %v491_v38 }
 0x3af   : > { %v406_v41 = vmul.f32 %v739_v39, %v404_v34  ;;  %vm411_vm14 = vweird.f32 %v739_v39 }
 0x3b0   : > { %665 = vmatmul.msk.bf16.vlgmr.msrb.gmra.mxu2 %vm230_vm0, %v492_v40  ;;  %vm412_vm2 = vmor %vm410_vm15, %vm411_vm14 }
 0x3b1   : > { %v407_v43 = vsub.f32 1.0, %v406_v41 }
 0x3b3   : > { %v408_v45 = vmul.f32 %v739_v39, %v407_v43 }
 0x3b5   : > { %v409_v47 = vadd.f32 %v739_v39, %v408_v45 }
 0x3b7   : > { %v413_v50 = vsel %vm412_vm2, %v739_v39, %v409_v47 }
 0x3b8   : > { %v418_v51 = vsel %vm415_vm3, %v417_v49, %v413_v50 }
 0x3b9   : > { %v419_v53 = vmul.f32 %v735_v19, %v418_v51 }
 0x3ba   : > { %v422_v54 = vpop.permute.xlu0 %421 }
 0x3bb   : > { %v366_v55 = vpop.f32.mrf.mxu3  ;;  %v427_v56 = vsel %vm282_vm1, %v422_v54, 0  ;;  %v442_v57 = vadd.f32 %v419_v53, %v370_v52  ;;  %v420_v58 = vpack.c.bf16 %v419_v53, %v419_v53 }
 0x3bc   : > { %516 = vrot.lane.b32.xlu0 %v366_v55, %s815_s9  ;;  %436 = vmatpush.bf16.msrb.mxu3 %v427_v56 }
 0x3bd   : > { %v514_v59 = vadd.f32 %v491_v38, %v442_v57 }
 0x3bf   : > { %663 = vmatmul.msk.bf16.vlgmr.msrb.gmra.mxu3 %vm230_vm0, %v420_v58  ;;  %v534_v60 = vmul.f32 0.25, %v514_v59 }
 0x3c1   : > { %535 = vst.msk [vmem:[%s206_s10] sm:$0xff] %vm230_vm0, %v534_v60 }
 0x3c3   : > { %v368_v42 = vpop.f32.mrf.mxu3 }
 0x3c4   : > { %767 = shalt.err (!%p764_p3)
}
 0x3c5   : > { %670 = dma.vmem_to_hbm [thread:$0]  (%p881_p5), %s557_s20, 128, %s559_s22, %s541_s23   ;;  %vm528_vm1 = vcmask 130048   ;;  %vm530_vm4 = vcmask 195584   ;;  %vm532_vm5 = vcmask 261120  }
 0x3c6   : > { %s816_s7 = smov 24   ;;  %s817_s10 = smov 16  }
 0x3c7   : > { %s217_s12 = scalar_lea.vmem %s1002_s3, %s656_s28 }
 0x42e   : > { %v517_v2 = vpop.permute.xlu0 %516 }
 0x42f   : > { %v527_v4 = vsel %vm230_vm0, %v941_v48, %v517_v2 }
 0x433   : > { %v510_v61 = vpop.f32.mrf.mxu2 }
 0x434   : > { %524 = vrot.lane.b32.xlu1 %v510_v61, %s816_s7 }
 0x43b   : > { %v512_v62 = vpop.f32.mrf.mxu2 }
 0x442   : > { %v438_v63 = vpop.f32.mrf.mxu3 }
 0x443   : > { %520 = vrot.lane.b32.xlu2 %v438_v63, %s817_s10 }
 0x44a   : > { %v440_v0 = vpop.f32.mrf.mxu3 }
 0x49d   : > { %v521_v3 = vpop.permute.xlu2 %520 }
 0x49e   : > { %v529_v5 = vsel %vm528_vm1, %v527_v4, %v521_v3 }
 0x4a6   : > { %v525_v6 = vpop.permute.xlu1 %524 }
 0x4a7   : > { %v531_v7 = vsel %vm530_vm4, %v529_v5, %v525_v6 }
 0x4a8   : > { %533 = vst.msk [vmem:[%s217_s12] sm:$0xff] %vm532_vm5, %v531_v7 }
 0x4a9 PF: > { %p676_p4 = scmp.ge.s32.totalorder %s802_s18, 2  ;;  %s577_s13 = sand.u32 1, %s790_s15  }
 0x4aa   : > { %s578_s14 = scalar_lea.sflag [#allocation3], %s577_s13 }
 0x4ab   : > { %p673_p5 = pnand %p676_p4, %p885_p6 }
 0x4ad   : > { %p674_p7 = pneg %p673_p5 }
 0x4af   : > { %785 = dma.done.wait (%p674_p7), %s578_s14, 128  }
 0x4b0   : > { %787 = vsyncadd (%p674_p7), %s578_s14, 4294967168  ;;  %p15_p8 = scmp.ge.s32.totalorder %s868_s21, 4   ;;  %s1006_s15 = smov %s794_s16 }
 0x4b1   : > { %s1007_s16 = smov %s798_s17  ;;  %s1008_s17 = smov %s879_s24 }
 0x4b2   : > { %s1009_s18 = smov %s868_s21  ;;  %17 = sbr.rel (!%p15_p8) target bundleno = 3 (0x3), region = 82 }
 0x4b7   :  { %584 = vsyncpa [#allocation3], 1 }
 0x4b8   :  { %586 = vsyncpa [#allocation3 + $0x1], 1 }

// kernel: decoder_forward_pallas.21
= control target key start
LH: loop header
LB: loop body
LE: loop exit
PB: predicated region body
PF: predicated region fallthrough
CT: control target
= control target key end

     0   :  { %vm31_vm0 = vcmask 261120   ;;  %s119_s1 = inlined_call_operand.vmem [shape: f32[32,32], index: 1, kind: input, shape index: {}]   ;;  %s120_s0 = inlined_call_operand.vmem [shape: f32[16,32], index: 0, kind: input, shape index: {}]   ;;  %s121_s2 = inlined_call_operand.vmem [shape: f32[1,32], index: 2, kind: input, shape index: {}]   ;;  %s122_s3 = inlined_call_operand.vmem [shape: f32[16,32], index: 3, kind: input, shape index: {}]   ;;  %s123_s4 = inlined_call_operand.vmem [shape: f32[16,32], index: 4, kind: output, shape index: {}]  }
   0x1   :  { %v23_v0 = vld [vmem:[%s119_s1 + $0x10] sm:$0xff]  ;;  %v24_v1 = vld [vmem:[%s119_s1 + $0x18] sm:$0xff]  ;;  %v21_v2 = vld [vmem:[%s119_s1] sm:$0xff] }
   0x2   :  { %v26_v3 = vpack.c.bf16 %v24_v1, %v23_v0  ;;  %v22_v4 = vld [vmem:[%s119_s1 + $0x8] sm:$0xff]  ;;  %v18_v6 = vld [vmem:[%s120_s0] sm:$0xff] }
   0x3   :  { %v25_v5 = vpack.c.bf16 %v22_v4, %v21_v2  ;;  %v19_v7 = vld [vmem:[%s120_s0 + $0x8] sm:$0xff]  ;;  %v60_v9 = vld [vmem:[%s121_s2] ss:$0 sm:$0xff] }
   0x4   :  { %41 = vmatpush.bf16.msra.mxu0 %v26_v3  ;;  %v20_v8 = vpack.c.bf16 %v19_v7, %v18_v6  ;;  %v49_v11 = vld [vmem:[%s122_s3] sm:$0xff]  ;;  %v50_v15 = vld [vmem:[%s122_s3 + $0x8] sm:$0xff] }
   0x8   :  { %42 = vmatpush.bf16.msra.mxu0 %v25_v5 }
   0xb   :  { %59 = vmatmul.msk.bf16.vlgmr.msra.gmra.mxu0 %vm31_vm0, %v20_v8 }
  0x88   :  { %v44_v10 = vpop.f32.mrf.mxu0 }
  0x89   :  { %v45_v12 = vadd.f32 %v60_v9, %v44_v10 }
  0x8b   :  { %v51_v13 = vadd.f32 %v49_v11, %v45_v12 }
  0x8d   :  { %53 = vst.msk [vmem:[%s123_s4] sm:$0xff] %vm31_vm0, %v51_v13 }
  0x90   :  { %v46_v14 = vpop.f32.mrf.mxu0 }
  0x91   :  { %v47_v16 = vadd.f32 %v60_v9, %v46_v14 }
  0x93   :  { %v52_v17 = vadd.f32 %v50_v15, %v47_v16 }
  0x95   :  { %54 = vst.msk [vmem:[%s123_s4 + $0x8] sm:$0xff] %vm31_vm0, %v52_v17 }

// kernel: decoder_forward_pallas.22
= control target key start
LH: loop header
LB: loop body
LE: loop exit
PB: predicated region body
PF: predicated region fallthrough
CT: control target
= control target key end

     0   :  { %vm23_vm0 = vcmask 261120   ;;  %v132_v4 = vmov 32.0   ;;  %s203_s0 = inlined_call_operand.vmem [shape: f32[16,32], index: 0, kind: input, shape index: {}]   ;;  %s204_s1 = inlined_call_operand.vmem [shape: f32[1,32], index: 1, kind: input, shape index: {}]   ;;  %s205_s2 = inlined_call_operand.vmem [shape: f32[1,32], index: 2, kind: input, shape index: {}]   ;;  %s206_s4 = inlined_call_operand.vmem [shape: f32[1,32], index: 4, kind: input, shape index: {}]   ;;  %s207_s3 = inlined_call_operand.vmem [shape: f32[32,32], index: 3, kind: input, shape index: {}]   ;;  %s208_s5 = inlined_call_operand.vmem [shape: f32[16,32], index: 5, kind: output, shape index: {}]  }
   0x1   :  { %v21_v0 = vld [vmem:[%s203_s0] sm:$0xff]  ;;  %v22_v2 = vld [vmem:[%s203_s0 + $0x8] sm:$0xff]  ;;  %126 = vrcp.f32 %v132_v4  ;;  %v90_v21 = vld [vmem:[%s207_s3 + $0x10] sm:$0xff] }
   0x2   :  { %v24_v1 = vsel %vm23_vm0, %v21_v0, 0.0  ;;  %v27_v3 = vsel %vm23_vm0, %v22_v2, 0.0  ;;  %v91_v22 = vld [vmem:[%s207_s3 + $0x18] sm:$0xff]  ;;  %v88_v24 = vld [vmem:[%s207_s3] sm:$0xff]  ;;  %v89_v25 = vld [vmem:[%s207_s3 + $0x8] sm:$0xff] }
   0x3   :  { %25 = vadd.xlane.f32.xlu0 %v24_v1  ;;  %v93_v23 = vpack.c.bf16 %v91_v22, %v90_v21  ;;  %v92_v27 = vpack.c.bf16 %v89_v25, %v88_v24  ;;  %v123_v46 = vld [vmem:[%s204_s1] ss:$0 sm:$0xff] }
   0x4   :  { %v124_v51 = vld [vmem:[%s205_s2] ss:$0 sm:$0xff] }
   0x5   :  { %107 = vmatpush.bf16.msra.mxu0 %v93_v23  ;;  %v125_v56 = vld [vmem:[%s206_s4] ss:$0 sm:$0xff] }
   0x7   :  { %v127_v5 = vpop.eup %126 }
   0x8   :  { %v31_v6 = vmul.f32 32.0, %v127_v5  ;;  %vm35_vm1 = vweird.f32 %v127_v5 }
   0x9   :  { %108 = vmatpush.bf16.msra.mxu0 %v92_v27 }
   0xa   :  { %v32_v7 = vsub.f32 1.0, %v31_v6 }
   0xb   :  { %28 = vadd.xlane.f32.xlu0 %v27_v3 }
   0xc   :  { %v33_v8 = vmul.f32 %v127_v5, %v32_v7 }
   0xe   :  { %v34_v9 = vadd.f32 %v127_v5, %v33_v8 }
  0x10   :  { %v36_v10 = vsel %vm35_vm1, %v127_v5, %v34_v9 }
  0x76   :  { %v26_v11 = vpop.xlane.xlu0 %25 }
  0x77   :  { %v37_v12 = vmul.f32 %v36_v10, %v26_v11 }
  0x79   :  { %v39_v13 = vsub.f32 %v21_v0, %v37_v12 }
  0x7b   :  { %v41_v14 = vmul.f32 %v39_v13, %v39_v13 }
  0x7d   :  { %v43_v15 = vsel %vm23_vm0, %v41_v14, 0.0 }
  0x7e   :  { %44 = vadd.xlane.f32.xlu1 %v43_v15  ;;  %v29_v16 = vpop.xlane.xlu0 %28 }
  0x7f   :  { %v38_v17 = vmul.f32 %v36_v10, %v29_v16 }
  0x81   :  { %v40_v18 = vsub.f32 %v22_v2, %v38_v17 }
  0x83   :  { %v42_v19 = vmul.f32 %v40_v18, %v40_v18 }
  0x85   :  { %v46_v20 = vsel %vm23_vm0, %v42_v19, 0.0 }
  0x86   :  { %47 = vadd.xlane.f32.xlu1 %v46_v20 }
  0xf1   :  { %v45_v26 = vpop.xlane.xlu1 %44 }
  0xf2   :  { %v49_v28 = vmul.f32 %v45_v26, %v36_v10 }
  0xf4   :  { %v51_v29 = vadd.f32 1e-06, %v49_v28 }
  0xf6   :  { %128 = vrsqrt.f32 %v51_v29  ;;  %vm59_vm3 = vweird.f32 %v51_v29 }
  0xf9   :  { %v48_v30 = vpop.xlane.xlu1 %47 }
  0xfa   :  { %v50_v31 = vmul.f32 %v48_v30, %v36_v10 }
  0xfc   :  { %v129_v32 = vpop.eup %128  ;;  %v52_v33 = vadd.f32 1e-06, %v50_v31 }
  0xfd   :  { %v54_v34 = vmul.f32 %v129_v32, %v51_v29  ;;  %vm60_vm2 = vweird.f32 %v129_v32 }
  0xfe   :  { %130 = vrsqrt.f32 %v52_v33  ;;  %vm61_vm4 = vmor %vm59_vm3, %vm60_vm2  ;;  %vm69_vm6 = vweird.f32 %v52_v33 }
  0xff   :  { %v55_v35 = vmul.f32 %v129_v32, %v54_v34 }
 0x101   :  { %v56_v36 = vmul.f32 0.5, %v55_v35 }
 0x103   :  { %v57_v37 = vsub.f32 1.5, %v56_v36 }
 0x104   :  { %v131_v38 = vpop.eup %130 }
 0x105   :  { %v58_v39 = vmul.f32 %v129_v32, %v57_v37  ;;  %v64_v40 = vmul.f32 %v131_v38, %v52_v33  ;;  %vm70_vm5 = vweird.f32 %v131_v38 }
 0x106   :  { %vm71_vm7 = vmor %vm69_vm6, %vm70_vm5 }
 0x107   :  { %v65_v41 = vmul.f32 %v131_v38, %v64_v40  ;;  %v62_v42 = vsel %vm61_vm4, %v129_v32, %v58_v39 }
 0x108   :  { %v73_v45 = vmul.f32 %v62_v42, %v39_v13 }
 0x109   :  { %v66_v43 = vmul.f32 0.5, %v65_v41 }
 0x10a   :  { %v79_v50 = vmul.f32 %v123_v46, %v73_v45 }
 0x10b   :  { %v67_v44 = vsub.f32 1.5, %v66_v43 }
 0x10c   :  { %v85_v53 = vadd.f32 %v124_v51, %v79_v50 }
 0x10d   :  { %v68_v47 = vmul.f32 %v131_v38, %v67_v44 }
 0x10f   :  { %v72_v48 = vsel %vm71_vm7, %v131_v38, %v68_v47 }
 0x110   :  { %v74_v49 = vmul.f32 %v72_v48, %v40_v18 }
 0x112   :  { %v80_v52 = vmul.f32 %v123_v46, %v74_v49 }
 0x114   :  { %v86_v54 = vadd.f32 %v124_v51, %v80_v52 }
 0x116   :  { %v87_v55 = vpack.c.bf16 %v86_v54, %v85_v53 }
 0x118   :  { %121 = vmatmul.msk.bf16.vlgmr.msra.gmra.mxu0 %vm23_vm0, %v87_v55 }
 0x195   :  { %v110_v57 = vpop.f32.mrf.mxu0 }
 0x196   :  { %v111_v58 = vadd.f32 %v125_v56, %v110_v57 }
 0x198   :  { %115 = vst.msk [vmem:[%s208_s5] sm:$0xff] %vm23_vm0, %v111_v58 }
 0x19d   :  { %v112_v59 = vpop.f32.mrf.mxu0 }
 0x19e   :  { %v113_v60 = vadd.f32 %v125_v56, %v112_v59 }
 0x1a0   :  { %116 = vst.msk [vmem:[%s208_s5 + $0x8] sm:$0xff] %vm23_vm0, %v113_v60 }

// kernel: decoder_forward_pallas.24
= control target key start
LH: loop header
LB: loop body
LE: loop exit
PB: predicated region body
PF: predicated region fallthrough
CT: control target
= control target key end

     0   :  { %10 = vsyncpa [#allocation3], 0  ;;  %s1025_s0 = inlined_call_operand.vmem [shape: f32[2,8,32], index: 0, kind: input, shape index: {}]   ;;  %s1026_s1 = inlined_call_operand.vmem [shape: f32[2,8,64], index: 1, kind: input, shape index: {}]   ;;  %s1027_s2 = inlined_call_operand.vmem [shape: f32[2,1,8], index: 2, kind: input, shape index: {}]   ;;  %s1028_s3 = inlined_call_operand.vmem [shape: f32[2,8,32], index: 3, kind: output, shape index: {0}]   ;;  %s1029_s4 = inlined_call_operand.hbm [shape: f32[2,8,8], index: 4, kind: output, shape index: {1}]  }
   0x1   :  { %12 = vsyncpa [#allocation3 + $0x1], 0  ;;  %s864_s15 = smov 0   ;;  %s866_s16 = smov 0  }
   0x2   :  { %s868_s17 = smov 0   ;;  %s870_s18 = smov 0  }
   0x3 LB: > { %s885_s19 = sadd.s32 4294967295, %s827_s18   ;;  %s679_s20 = sadd.s32 4294967294, %s827_s18   ;;  %s827_s18 = sphi %s870_s18, %s1035_s18   ;;  %s823_s17 = sphi %s868_s17, %s1034_s17   ;;  %s819_s16 = sphi %s866_s16, %s1033_s16   ;;  %s815_s15 = sphi %s864_s15, %s1032_s15  }
   0x4   : > { %s889_s21 = sadd.s32 1, %s827_s18   ;;  %s129_s22 = sadd.s32 1, %s823_s17 }
   0x5   : > { %s126_s23 = ssub.s32 %s827_s18, %s889_s21  ;;  %p139_p0 = scmp.ne.s32.totalorder %s823_s17, %s819_s16 }
   0x6   : > { %p127_p1 = scmp.eq.s32.totalorder %s126_s23, 0  ;;  %p140_p2 = scmp.eq.s32.totalorder %s885_s19, 1 }
   0x7   : > { %p145_p3 = scmp.ne.s32.totalorder %s819_s16, %s815_s15  ;;  %p146_p4 = scmp.eq.s32.totalorder %s679_s20, 1 }
   0x8   : > { %s900_s24 = scalar_select %p127_p1, %s823_s17, %s129_s22  }
   0x9   : > { %p902_p5 = por %p140_p2, %p139_p0  ;;  %p906_p6 = por %p146_p4, %p145_p3 }
   0xa   : > { %p682_p7 = scmp.ge.s32.totalorder %s827_s18, 1  ;;  %p184_p8 = scmp.lt.s32.totalorder %s827_s18, 3 }
   0xc   : > { %p185_p9 = pnand %p682_p7, %p184_p8 }
   0xd   : > { %p220_p10 = scmp.lt.s32.totalorder (!%p185_p9), %s885_s19, 1  ;;  %s829_s12 = smov (!%p185_p9), 120  }
   0xe   : > { %188 = sbr.rel (%p185_p9) target bundleno = 1115 (0x45b), region = 32  ;;  %s830_s13 = smov (!%p185_p9), 96  }
   0xf   : > { %s831_s14 = smov (!%p185_p9), 112   ;;  %s832_s20 = smov (!%p185_p9), 104  }
  0x10   : > { %s833_s22 = smov (!%p185_p9), 80   ;;  %s834_s23 = smov (!%p185_p9), 72  }
  0x11   : > { %s217_s29 = sand.u32 (!%p185_p9), 1, %s819_s16   ;;  %s836_s6 = smov (!%p185_p9), 24  }
  0x12   : > { %s683_s30 = sshll.u32 (!%p185_p9), %s217_s29, 3  ;;  %s837_s7 = smov (!%p185_p9), 8  }
  0x13   : > { %s221_s27 = scalar_select %p220_p10, %s885_s19, 1  ;;  %vm241_vm0 = vcmask 64512   ;;  %vm297_vm1 = vcmask 1043456  }
  0x15   : > { %s914_s28 = sshll.u32 %s221_s27, 3  ;;  %s230_s11 = scalar_lea.vmem %s1027_s2, %s221_s27 }
  0x16   : > { %s227_s5 = scalar_lea.vmem %s1026_s1, %s914_s28  ;;  %s223_s8 = scalar_lea.vmem %s1025_s0, %s914_s28  ;;  %v933_v5 = vld [vmem:[%s230_s11] ss:$0 sm:$0xff] }
  0x17   : > { %v237_v0 = vld [vmem:[%s227_s5] sm:$0xff]  ;;  %s835_s27 = smov 88   ;;  %s219_s5 = scalar_lea.vmem [#allocation2], %s683_s30 }
  0x18   : > { %v920_v1 = vpack.c.bf16 %v237_v0, %v237_v0  ;;  %v236_v3 = vld [vmem:[%s223_s8] sm:$0xff]  ;;  %s696_s8 = sshll.u32 %s885_s19, 3  ;;  %s785_s19 = scalar_lea.hbm %s1029_s4, 16 }
  0x19   : > { %v239_v4 = vpack.c.bf16 %v236_v3, %v236_v3  ;;  %s570_s11 = scalar_lea.hbm %s1029_s4, %s696_s8 }
  0x1a   : > { %v246_v2 = vsel %vm241_vm0, %v920_v1, 0  ;;  %317 = vrot.lane.b32.xlu1 %v920_v1, %s829_s12  ;;  %292 = vrot.lane.b32.xlu2 %v920_v1, %s830_s13  ;;  %s574_s13 = sshll.u32 %s570_s11, 4  ;;  %s575_s13 = int_to_ptr.hbm [resolvable:$true] %s574_s13 }
  0x1b   : > { %255 = vmatpush.bf16.xpose.msra.mxu0 %v246_v2 }
  0x22   : > { %687 = vmatmul.msk.bf16.vlgmr.msra.gmra.mxu0 %vm241_vm0, %v239_v4  ;;  %315 = vrot.lane.b32.xlu1 %v239_v4, %s829_s12  ;;  %s572_s12 = sshll.u32 %s219_s5, 4  ;;  %s573_s12 = int_to_ptr.vmem [resolvable:$true] %s572_s12 }
  0x23   : > { %389 = vrot.lane.b32.xlu2 %v920_v1, %s831_s14 }
  0x2a   : > { %387 = vrot.lane.b32.xlu1 %v239_v4, %s831_s14  ;;  %s557_s14 = scalar_lea.sflag [#allocation3], %s217_s29 }
  0x2b   : > { %459 = vrot.lane.b32.xlu2 %v239_v4, %s832_s20 }
  0x74   : > { %v293_v19 = vpop.permute.xlu2 %292 }
  0x75   : > { %v299_v20 = vsel %vm297_vm1, %v293_v19, 0 }
  0x76   : > { %308 = vmatpush.bf16.msra.mxu1 %v299_v20 }
  0x7d   : > { %v390_v21 = vpop.permute.xlu2 %389 }
  0x7e   : > { %v395_v22 = vsel %vm241_vm0, %v390_v21, 0 }
  0x7f   : > { %404 = vmatpush.bf16.xpose.msrb.mxu1 %v395_v22 }
  0x85   : > { %v460_v43 = vpop.permute.xlu2 %459 }
  0x8c   : > { %v318_v11 = vpop.permute.xlu1 %317 }
  0x8d   : > { %v323_v12 = vsel %vm241_vm0, %v318_v11, 0 }
  0x8e   : > { %332 = vmatpush.bf16.xpose.msra.mxu2 %v323_v12 }
  0x94   : > { %v316_v15 = vpop.permute.xlu1 %315 }
  0x95   : > { %689 = vmatmul.msk.bf16.vlgmr.msra.gmra.mxu2 %vm241_vm0, %v316_v15 }
  0x9c   : > { %v388_v44 = vpop.permute.xlu1 %387 }
  0x9f   : > { %v257_v6 = vpop.f32.mrf.mxu0 }
  0xa0   : > { %v261_v7 = vmul.f32 0.35355338, %v257_v6 }
  0xa2   : > { %v265_v8 = vadd.f32 %v933_v5, %v261_v7 }
  0xa4   : > { %v266_v9 = vsel %vm241_vm0, %v265_v8, -inf }
  0xa5   : > { %267 = vmax.xlane.f32.xlu0 %v266_v9 }
  0xa7   : > { %v259_v10 = vpop.f32.mrf.mxu0 }
 0x118   : > { %v268_v13 = vpop.xlane.xlu0 %267  ;;  %v334_v24 = vpop.f32.mrf.mxu2 }
 0x119   : > { %v269_v14 = vsub.f32 %v265_v8, %v268_v13  ;;  %v338_v26 = vmul.f32 0.35355338, %v334_v24 }
 0x11b   : > { %v270_v16 = vmul.f32 1.442695, %v269_v14  ;;  %v339_v28 = vadd.f32 %v933_v5, %v338_v26 }
 0x11d   : > { %749 = vpow2.f32 %v270_v16  ;;  %v340_v31 = vsel %vm241_vm0, %v339_v28, -inf }
 0x11e   : > { %341 = vmax.xlane.f32.xlu1 %v340_v31 }
 0x120   : > { %v336_v35 = vpop.f32.mrf.mxu2 }
 0x123   : > { %v750_v17 = vpop.eup %749 }
 0x124   : > { %v272_v18 = vsel %vm241_vm0, %v750_v17, 0.0 }
 0x125   : > { %273 = vadd.xlane.f32.xlu0 %v272_v18 }
 0x139   : > { %461 = vrot.lane.b32.xlu0 %v920_v1, %s832_s20  ;;  %s779_s20 = sshra.s32 %s575_s13, 4  ;;  %s780_s20 = int_to_ptr.hbm [resolvable:$true] %s779_s20 }
 0x13a   : > { %p786_p0 = scmp.lt.s32.totalorder %s780_s20, %s1029_s4 }
 0x191   : > { %v342_v48 = vpop.xlane.xlu1 %341 }
 0x192   : > { %v343_v51 = vsub.f32 %v339_v28, %v342_v48 }
 0x194   : > { %v344_v53 = vmul.f32 1.442695, %v343_v51 }
 0x198   : > { %v274_v23 = vpop.xlane.xlu0 %273 }
 0x199   : > { %751 = vrcp.f32 %v274_v23  ;;  %v286_v30 = vand.u32 2147483648, %v274_v23  ;;  %v284_v33 = vand.u32 2147483647, %v274_v23  ;;  %vm280_vm3 = vweird.f32 %v274_v23 }
 0x19a   : > { %753 = vpow2.f32 %v344_v53 }
 0x19b   : > { %v287_v36 = vor.u32 1.1754944e-38, %v286_v30  ;;  %vm285_vm5 = vcmp.eq.f32.partialorder %v284_v33, 8.507059e+37 }
 0x19f   : > { %v752_v25 = vpop.eup %751 }
 0x1a0   : > { %v276_v27 = vmul.f32 %v752_v25, %v274_v23  ;;  %vm281_vm2 = vweird.f32 %v752_v25  ;;  %v961_v59 = vpop.eup %753 }
 0x1a1   : > { %vm282_vm4 = vmor %vm280_vm3, %vm281_vm2  ;;  %v346_v61 = vsel %vm241_vm0, %v961_v59, 0.0 }
 0x1a2   : > { %v277_v29 = vsub.f32 1.0, %v276_v27 }
 0x1a4   : > { %v278_v32 = vmul.f32 %v752_v25, %v277_v29 }
 0x1a6   : > { %v279_v34 = vadd.f32 %v752_v25, %v278_v32 }
 0x1a8   : > { %v283_v37 = vsel %vm282_vm4, %v752_v25, %v279_v34 }
 0x1a9   : > { %v288_v38 = vsel %vm285_vm5, %v287_v36, %v283_v37 }
 0x1aa   : > { %v947_v39 = vmul.f32 %v750_v17, %v288_v38 }
 0x1ab   : > { %v462_v40 = vpop.permute.xlu0 %461 }
 0x1ac   : > { %v467_v41 = vsel %vm241_vm0, %v462_v40, 0  ;;  %v290_v42 = vpack.c.bf16 %v947_v39, %v947_v39 }
 0x1ad   : > { %476 = vmatpush.bf16.xpose.msrb.mxu0 %v467_v41 }
 0x1ae   : > { %688 = vmatmul.msk.bf16.vlgmr.msra.gmra.mxu1 %vm241_vm0, %v290_v42 }
 0x1b4   : > { %693 = vmatmul.msk.bf16.vlgmr.msrb.gmra.mxu0 %vm241_vm0, %v460_v43 }
 0x1be   : > { %691 = vmatmul.msk.bf16.vlgmr.msrb.gmra.mxu1 %vm241_vm0, %v388_v44 }
 0x22b   : > { %v955_v45 = vpop.f32.mrf.mxu1 }
 0x231   : > { %v478_v46 = vpop.f32.mrf.mxu0 }
 0x232   : > { %v482_v47 = vmul.f32 0.35355338, %v478_v46 }
 0x233   : > { %v312_v49 = vpop.f32.mrf.mxu1 }
 0x234   : > { %v483_v50 = vadd.f32 %v933_v5, %v482_v47 }
 0x236   : > { %v484_v52 = vsel %vm241_vm0, %v483_v50, -inf }
 0x237   : > { %485 = vmax.xlane.f32.xlu0 %v484_v52 }
 0x239   : > { %v480_v54 = vpop.f32.mrf.mxu0 }
 0x23b   : > { %v406_v55 = vpop.f32.mrf.mxu1 }
 0x23c   : > { %v410_v56 = vmul.f32 0.35355338, %v406_v55 }
 0x23e   : > { %v411_v57 = vadd.f32 %v933_v5, %v410_v56 }
 0x240   : > { %v412_v58 = vsel %vm241_vm0, %v411_v57, -inf }
 0x241   : > { %413 = vmax.xlane.f32.xlu2 %v412_v58 }
 0x243   : > { %v408_v60 = vpop.f32.mrf.mxu1 }
 0x249   : > { %347 = vadd.xlane.f32.xlu2 %v346_v61 }
 0x24b   : > { %437 = vrot.lane.b32.xlu0 %v920_v1, %s833_s22  ;;  %s781_s22 = scalar_lea.hbm %s780_s20, 8 }
 0x24c   : > { %p782_p11 = scmp.ne.s32.totalorder %s780_s20, %s781_s22  ;;  %p787_p1 = scmp.lt.s32.totalorder %s785_s19, %s781_s22 }
 0x24e   : > { %p783_p12 = pnand %p782_p11, %p902_p5  ;;  %p788_p2 = por %p787_p1, %p786_p0 }
 0x250   : > { %p784_p13 = pneg %p783_p12 }
 0x252   : > { %p789_p3 = pnand %p788_p2, %p784_p13 }
 0x2aa   : > { %v486_v62 = vpop.xlane.xlu0 %485 }
 0x2ab   : > { %v487_v63 = vsub.f32 %v483_v50, %v486_v62 }
 0x2ad   : > { %v488_v0 = vmul.f32 1.442695, %v487_v63 }
 0x2af   : > { %755 = vpow2.f32 %v488_v0 }
 0x2b4   : > { %v414_v2 = vpop.xlane.xlu2 %413 }
 0x2b5   : > { %v756_v3 = vpop.eup %755  ;;  %v415_v4 = vsub.f32 %v411_v57, %v414_v2 }
 0x2b6   : > { %v490_v5 = vsel %vm241_vm0, %v756_v3, 0.0 }
 0x2b7   : > { %v416_v6 = vmul.f32 1.442695, %v415_v4  ;;  %491 = vadd.xlane.f32.xlu2 %v490_v5 }
 0x2b9   : > { %757 = vpow2.f32 %v416_v6 }
 0x2bc   : > { %v348_v9 = vpop.xlane.xlu2 %347 }
 0x2bd   : > { %759 = vrcp.f32 %v348_v9  ;;  %v360_v25 = vand.u32 2147483648, %v348_v9  ;;  %vm354_vm10 = vweird.f32 %v348_v9  ;;  %v358_v27 = vand.u32 2147483647, %v348_v9  ;;  %v438_v51 = vpop.permute.xlu0 %437 }
 0x2be   : > { %v443_v54 = vsel %vm297_vm1, %v438_v51, 0 }
 0x2bf   : > { %v967_v7 = vpop.eup %757  ;;  %v361_v34 = vor.u32 1.1754944e-38, %v360_v25  ;;  %vm359_vm13 = vcmp.eq.f32.partialorder %v358_v27, 8.507059e+37 }
 0x2c0   : > { %v418_v8 = vsel %vm241_vm0, %v967_v7, 0.0 }
 0x2c1   : > { %419 = vadd.xlane.f32.xlu1 %v418_v8 }
 0x2c3   : > { %v760_v10 = vpop.eup %759 }
 0x2c4   : > { %v350_v12 = vmul.f32 %v760_v10, %v348_v9  ;;  %vm355_vm7 = vweird.f32 %v760_v10 }
 0x2c5   : > { %vm356_vm12 = vmor %vm354_vm10, %vm355_vm7 }
 0x2c6   : > { %v351_v13 = vsub.f32 1.0, %v350_v12 }
 0x2c8   : > { %v352_v18 = vmul.f32 %v760_v10, %v351_v13 }
 0x2ca   : > { %v353_v23 = vadd.f32 %v760_v10, %v352_v18 }
 0x2cc   : > { %v357_v33 = vsel %vm356_vm12, %v760_v10, %v353_v23 }
 0x2cd   : > { %v362_v38 = vsel %vm359_vm13, %v361_v34, %v357_v33 }
 0x2ce   : > { %v363_v43 = vmul.f32 %v961_v59, %v362_v38 }
 0x2cf   : > { %509 = vrot.lane.b32.xlu2 %v920_v1, %s834_s23 }
 0x2d0   : > { %v386_v48 = vadd.f32 %v363_v43, %v947_v39  ;;  %v364_v57 = vpack.c.bf16 %v363_v43, %v363_v43 }
 0x2da   : > { %365 = vrot.lane.b32.xlu1 %v920_v1, %s835_s27 }
 0x32a   : > { %v492_v11 = vpop.xlane.xlu2 %491 }
 0x32b   : > { %761 = vrcp.f32 %v492_v11  ;;  %v504_v21 = vand.u32 2147483648, %v492_v11  ;;  %v502_v1 = vand.u32 2147483647, %v492_v11  ;;  %vm498_vm8 = vweird.f32 %v492_v11 }
 0x32d   : > { %v505_v26 = vor.u32 1.1754944e-38, %v504_v21  ;;  %vm503_vm11 = vcmp.eq.f32.partialorder %v502_v1, 8.507059e+37 }
 0x331   : > { %v762_v14 = vpop.eup %761 }
 0x332   : > { %v494_v15 = vmul.f32 %v762_v14, %v492_v11  ;;  %v510_v16 = vpop.permute.xlu2 %509  ;;  %vm499_vm6 = vweird.f32 %v762_v14 }
 0x333   : > { %v515_v17 = vsel %vm297_vm1, %v510_v16, 0  ;;  %vm500_vm9 = vmor %vm498_vm8, %vm499_vm6 }
 0x334   : > { %v495_v19 = vsub.f32 1.0, %v494_v15  ;;  %v420_v20 = vpop.xlane.xlu1 %419  ;;  %524 = vmatpush.bf16.msrb.mxu2 %v515_v17 }
 0x335   : > { %763 = vrcp.f32 %v420_v20  ;;  %v432_v37 = vand.u32 2147483648, %v420_v20  ;;  %v430_v41 = vand.u32 2147483647, %v420_v20  ;;  %vm426_vm15 = vweird.f32 %v420_v20 }
 0x336   : > { %v496_v22 = vmul.f32 %v762_v14, %v495_v19 }
 0x337   : > { %v433_v44 = vor.u32 1.1754944e-38, %v432_v37  ;;  %vm431_vm3 = vcmp.eq.f32.partialorder %v430_v41, 8.507059e+37 }
 0x338   : > { %v497_v24 = vadd.f32 %v762_v14, %v496_v22 }
 0x33a   : > { %v501_v28 = vsel %vm500_vm9, %v762_v14, %v497_v24 }
 0x33b   : > { %v764_v29 = vpop.eup %763  ;;  %v506_v30 = vsel %vm503_vm11, %v505_v26, %v501_v28 }
 0x33c   : > { %v422_v31 = vmul.f32 %v764_v29, %v420_v20  ;;  %v507_v32 = vmul.f32 %v756_v3, %v506_v30  ;;  %vm427_vm14 = vweird.f32 %v764_v29 }
 0x33d   : > { %vm428_vm2 = vmor %vm426_vm15, %vm427_vm14 }
 0x33e   : > { %v423_v35 = vsub.f32 1.0, %v422_v31  ;;  %v508_v36 = vpack.c.bf16 %v507_v32, %v507_v32 }
 0x340   : > { %v424_v40 = vmul.f32 %v764_v29, %v423_v35  ;;  %694 = vmatmul.msk.bf16.vlgmr.msrb.gmra.mxu2 %vm241_vm0, %v508_v36 }
 0x342   : > { %v425_v42 = vadd.f32 %v764_v29, %v424_v40 }
 0x344   : > { %v429_v46 = vsel %vm428_vm2, %v764_v29, %v425_v42 }
 0x345   : > { %v434_v47 = vsel %vm431_vm3, %v433_v44, %v429_v46 }
 0x346   : > { %v435_v49 = vmul.f32 %v967_v7, %v434_v47 }
 0x348   : > { %v458_v50 = vadd.f32 %v435_v49, %v386_v48  ;;  %v436_v39 = vpack.c.bf16 %v435_v49, %v435_v49 }
 0x34a   : > { %v530_v52 = vadd.f32 %v507_v32, %v458_v50 }
 0x34c   : > { %v366_v53 = vpop.permute.xlu1 %365  ;;  %v550_v55 = vmul.f32 0.25, %v530_v52 }
 0x34d   : > { %v371_v56 = vsel %vm297_vm1, %v366_v53, 0 }
 0x34e   : > { %380 = vmatpush.bf16.msra.mxu3 %v371_v56  ;;  %551 = vst.msk [vmem:[%s219_s5] sm:$0xff] %vm241_vm0, %v550_v55 }
 0x351   : > { %690 = vmatmul.msk.bf16.vlgmr.msra.gmra.mxu3 %vm241_vm0, %v364_v57 }
 0x352   : > { %452 = vmatpush.bf16.msrb.mxu3 %v443_v54 }
 0x361   : > { %692 = vmatmul.msk.bf16.vlgmr.msrb.gmra.mxu3 %vm241_vm0, %v436_v39 }
 0x3c3   : > { %v526_v58 = vpop.f32.mrf.mxu2 }
 0x3c4   : > { %540 = vrot.lane.b32.xlu2 %v526_v58, %s836_s6 }
 0x3cb   : > { %v528_v59 = vpop.f32.mrf.mxu2 }
 0x3d4   : > { %v382_v60 = vpop.f32.mrf.mxu3 }
 0x3d5   : > { %532 = vrot.lane.b32.xlu0 %v382_v60, %s837_s7 }
 0x3d6   : > { %792 = shalt.err (!%p789_p3)
}
 0x3d7   : > { %699 = dma.vmem_to_hbm [thread:$0]  (%p902_p5), %s573_s12, 128, %s575_s13, %s557_s14   ;;  %vm544_vm1 = vcmask 130048   ;;  %vm546_vm4 = vcmask 195584   ;;  %vm548_vm5 = vcmask 261120  }
 0x3d8   : > { %s838_s29 = smov 16   ;;  %s234_s8 = scalar_lea.vmem %s1028_s3, %s914_s28 }
 0x3dc   : > { %v384_v61 = vpop.f32.mrf.mxu3 }
 0x3e4   : > { %v454_v62 = vpop.f32.mrf.mxu3 }
 0x3e5   : > { %536 = vrot.lane.b32.xlu1 %v454_v62, %s838_s29 }
 0x3ec   : > { %v456_v63 = vpop.f32.mrf.mxu3 }
 0x41e   : > { %v541_v4 = vpop.permute.xlu2 %540 }
 0x447   : > { %v533_v0 = vpop.permute.xlu0 %532 }
 0x448   : > { %v543_v2 = vsel %vm241_vm0, %v955_v45, %v533_v0 }
 0x457   : > { %v537_v3 = vpop.permute.xlu1 %536 }
 0x458   : > { %v545_v5 = vsel %vm544_vm1, %v543_v2, %v537_v3 }
 0x459   : > { %v547_v6 = vsel %vm546_vm4, %v545_v5, %v541_v4 }
 0x45a   : > { %549 = vst.msk [vmem:[%s234_s8] sm:$0xff] %vm548_vm5, %v547_v6 }
 0x45b PF: > { %p705_p4 = scmp.ge.s32.totalorder %s827_s18, 2  ;;  %s593_s25 = sand.u32 1, %s815_s15  }
 0x45c   : > { %s594_s9 = scalar_lea.sflag [#allocation3], %s593_s25 }
 0x45d   : > { %p702_p5 = pnand %p705_p4, %p906_p6 }
 0x45f   : > { %p703_p7 = pneg %p702_p5 }
 0x461   : > { %810 = dma.done.wait (%p703_p7), %s594_s9, 128  }
 0x462   : > { %812 = vsyncadd (%p703_p7), %s594_s9, 4294967168  ;;  %p15_p8 = scmp.ge.s32.totalorder %s889_s21, 4   ;;  %s1032_s15 = smov %s819_s16 }
 0x463   : > { %s1033_s16 = smov %s823_s17  ;;  %s1034_s17 = smov %s900_s24 }
 0x464   : > { %s1035_s18 = smov %s889_s21  ;;  %17 = sbr.rel (!%p15_p8) target bundleno = 3 (0x3), region = 85 }
 0x469   :  { %600 = vsyncpa [#allocation3], 1 }
 0x46a   :  { %602 = vsyncpa [#allocation3 + $0x1], 1 }

// kernel: decoder_forward_pallas.26
= control target key start
LH: loop header
LB: loop body
LE: loop exit
PB: predicated region body
PF: predicated region fallthrough
CT: control target
= control target key end

     0   :  { %vm23_vm0 = vcmask 261120   ;;  %v135_v4 = vmov 32.0   ;;  %vm117_vm8 = vcmask 523264   ;;  %s204_s0 = inlined_call_operand.vmem [shape: f32[16,32], index: 0, kind: input, shape index: {}]   ;;  %s205_s1 = inlined_call_operand.vmem [shape: f32[1,32], index: 1, kind: input, shape index: {}]   ;;  %s206_s2 = inlined_call_operand.vmem [shape: f32[1,32], index: 2, kind: input, shape index: {}]   ;;  %s207_s4 = inlined_call_operand.vmem [shape: f32[1,64], index: 4, kind: input, shape index: {}]   ;;  %s208_s3 = inlined_call_operand.vmem [shape: f32[32,64], index: 3, kind: input, shape index: {}]   ;;  %s209_s5 = inlined_call_operand.vmem [shape: f32[16,64], index: 5, kind: output, shape index: {}]  }
   0x1   :  { %v21_v0 = vld [vmem:[%s204_s0] sm:$0xff]  ;;  %v22_v2 = vld [vmem:[%s204_s0 + $0x8] sm:$0xff]  ;;  %129 = vrcp.f32 %v135_v4  ;;  %v90_v21 = vld [vmem:[%s208_s3 + $0x10] sm:$0xff] }
   0x2   :  { %v24_v1 = vsel %vm23_vm0, %v21_v0, 0.0  ;;  %v27_v3 = vsel %vm23_vm0, %v22_v2, 0.0  ;;  %v91_v22 = vld [vmem:[%s208_s3 + $0x18] sm:$0xff]  ;;  %v88_v24 = vld [vmem:[%s208_s3] sm:$0xff]  ;;  %v89_v25 = vld [vmem:[%s208_s3 + $0x8] sm:$0xff] }
   0x3   :  { %25 = vadd.xlane.f32.xlu0 %v24_v1  ;;  %v93_v23 = vpack.c.bf16 %v91_v22, %v90_v21  ;;  %v92_v27 = vpack.c.bf16 %v89_v25, %v88_v24  ;;  %v126_v46 = vld [vmem:[%s205_s1] ss:$0 sm:$0xff] }
   0x4   :  { %v127_v51 = vld [vmem:[%s206_s2] ss:$0 sm:$0xff] }
   0x5   :  { %107 = vmatpush.bf16.msra.mxu0 %v93_v23  ;;  %v128_v56 = vld [vmem:[%s207_s4] ss:$0 sm:$0xff] }
   0x7   :  { %v130_v5 = vpop.eup %129 }
   0x8   :  { %v31_v6 = vmul.f32 32.0, %v130_v5  ;;  %vm35_vm1 = vweird.f32 %v130_v5 }
   0x9   :  { %108 = vmatpush.bf16.msra.mxu0 %v92_v27 }
   0xa   :  { %v32_v7 = vsub.f32 1.0, %v31_v6 }
   0xb   :  { %28 = vadd.xlane.f32.xlu0 %v27_v3 }
   0xc   :  { %v33_v8 = vmul.f32 %v130_v5, %v32_v7 }
   0xe   :  { %v34_v9 = vadd.f32 %v130_v5, %v33_v8 }
  0x10   :  { %v36_v10 = vsel %vm35_vm1, %v130_v5, %v34_v9 }
  0x76   :  { %v26_v11 = vpop.xlane.xlu0 %25 }
  0x77   :  { %v37_v12 = vmul.f32 %v36_v10, %v26_v11 }
  0x79   :  { %v39_v13 = vsub.f32 %v21_v0, %v37_v12 }
  0x7b   :  { %v41_v14 = vmul.f32 %v39_v13, %v39_v13 }
  0x7d   :  { %v43_v15 = vsel %vm23_vm0, %v41_v14, 0.0 }
  0x7e   :  { %44 = vadd.xlane.f32.xlu1 %v43_v15  ;;  %v29_v16 = vpop.xlane.xlu0 %28 }
  0x7f   :  { %v38_v17 = vmul.f32 %v36_v10, %v29_v16 }
  0x81   :  { %v40_v18 = vsub.f32 %v22_v2, %v38_v17 }
  0x83   :  { %v42_v19 = vmul.f32 %v40_v18, %v40_v18 }
  0x85   :  { %v46_v20 = vsel %vm23_vm0, %v42_v19, 0.0 }
  0x86   :  { %47 = vadd.xlane.f32.xlu1 %v46_v20 }
  0xf1   :  { %v45_v26 = vpop.xlane.xlu1 %44 }
  0xf2   :  { %v49_v28 = vmul.f32 %v45_v26, %v36_v10 }
  0xf4   :  { %v51_v29 = vadd.f32 1e-06, %v49_v28 }
  0xf6   :  { %131 = vrsqrt.f32 %v51_v29  ;;  %vm59_vm3 = vweird.f32 %v51_v29 }
  0xf9   :  { %v48_v30 = vpop.xlane.xlu1 %47 }
  0xfa   :  { %v50_v31 = vmul.f32 %v48_v30, %v36_v10 }
  0xfc   :  { %v132_v32 = vpop.eup %131  ;;  %v52_v33 = vadd.f32 1e-06, %v50_v31 }
  0xfd   :  { %v54_v34 = vmul.f32 %v132_v32, %v51_v29  ;;  %vm60_vm2 = vweird.f32 %v132_v32 }
  0xfe   :  { %133 = vrsqrt.f32 %v52_v33  ;;  %vm61_vm4 = vmor %vm59_vm3, %vm60_vm2  ;;  %vm69_vm6 = vweird.f32 %v52_v33 }
  0xff   :  { %v55_v35 = vmul.f32 %v132_v32, %v54_v34 }
 0x101   :  { %v56_v36 = vmul.f32 0.5, %v55_v35 }
 0x103   :  { %v57_v37 = vsub.f32 1.5, %v56_v36 }
 0x104   :  { %v134_v38 = vpop.eup %133 }
 0x105   :  { %v58_v39 = vmul.f32 %v132_v32, %v57_v37  ;;  %v64_v40 = vmul.f32 %v134_v38, %v52_v33  ;;  %vm70_vm5 = vweird.f32 %v134_v38 }
 0x106   :  { %vm71_vm7 = vmor %vm69_vm6, %vm70_vm5 }
 0x107   :  { %v65_v41 = vmul.f32 %v134_v38, %v64_v40  ;;  %v62_v42 = vsel %vm61_vm4, %v132_v32, %v58_v39 }
 0x108   :  { %v73_v45 = vmul.f32 %v62_v42, %v39_v13 }
 0x109   :  { %v66_v43 = vmul.f32 0.5, %v65_v41 }
 0x10a   :  { %v79_v50 = vmul.f32 %v126_v46, %v73_v45 }
 0x10b   :  { %v67_v44 = vsub.f32 1.5, %v66_v43 }
 0x10c   :  { %v85_v53 = vadd.f32 %v127_v51, %v79_v50 }
 0x10d   :  { %v68_v47 = vmul.f32 %v134_v38, %v67_v44 }
 0x10f   :  { %v72_v48 = vsel %vm71_vm7, %v134_v38, %v68_v47 }
 0x110   :  { %v74_v49 = vmul.f32 %v72_v48, %v40_v18 }
 0x112   :  { %v80_v52 = vmul.f32 %v126_v46, %v74_v49 }
 0x114   :  { %v86_v54 = vadd.f32 %v127_v51, %v80_v52 }
 0x116   :  { %v87_v55 = vpack.c.bf16 %v86_v54, %v85_v53 }
 0x118   :  { %124 = vmatmul.msk.bf16.vlgmr.msra.gmra.mxu0 %vm23_vm0, %v87_v55 }
 0x195   :  { %v110_v57 = vpop.f32.mrf.mxu0 }
 0x196   :  { %v111_v58 = vadd.f32 %v128_v56, %v110_v57 }
 0x198   :  { %v115_v59 = vmax.f32 %v111_v58, 0.0 }
 0x19a   :  { %118 = vst.msk [vmem:[%s209_s5] sm:$0xff] %vm117_vm8, %v115_v59 }
 0x19d   :  { %v112_v60 = vpop.f32.mrf.mxu0 }
 0x19e   :  { %v113_v61 = vadd.f32 %v128_v56, %v112_v60 }
 0x1a0   :  { %v116_v62 = vmax.f32 %v113_v61, 0.0 }
 0x1a2   :  { %119 = vst.msk [vmem:[%s209_s5 + $0x8] sm:$0xff] %vm117_vm8, %v116_v62 }

// kernel: decoder_forward_pallas.27
= control target key start
LH: loop header
LB: loop body
LE: loop exit
PB: predicated region body
PF: predicated region fallthrough
CT: control target
= control target key end

     0   :  { %vm37_vm0 = vcmask 523264   ;;  %vm59_vm1 = vcmask 261120   ;;  %s138_s1 = inlined_call_operand.vmem [shape: f32[64,32], index: 1, kind: input, shape index: {}]   ;;  %s139_s2 = inlined_call_operand.vmem [shape: f32[1,32], index: 2, kind: input, shape index: {}]   ;;  %s140_s0 = inlined_call_operand.vmem [shape: f32[16,64], index: 0, kind: input, shape index: {}]   ;;  %s141_s3 = inlined_call_operand.vmem [shape: f32[16,32], index: 3, kind: input, shape index: {}]   ;;  %s142_s4 = inlined_call_operand.vmem [shape: f32[16,32], index: 4, kind: output, shape index: {}]  }
   0x1   :  { %v27_v0 = vld [vmem:[%s138_s1 + $0x30] sm:$0xff]  ;;  %v28_v1 = vld [vmem:[%s138_s1 + $0x38] sm:$0xff]  ;;  %v25_v2 = vld [vmem:[%s138_s1 + $0x20] sm:$0xff] }
   0x2   :  { %v32_v3 = vpack.c.bf16 %v28_v1, %v27_v0  ;;  %v26_v4 = vld [vmem:[%s138_s1 + $0x28] sm:$0xff]  ;;  %v23_v6 = vld [vmem:[%s138_s1 + $0x10] sm:$0xff]  ;;  %v24_v7 = vld [vmem:[%s138_s1 + $0x18] sm:$0xff] }
   0x3   :  { %v31_v5 = vpack.c.bf16 %v26_v4, %v25_v2  ;;  %v30_v8 = vpack.c.bf16 %v24_v7, %v23_v6  ;;  %v21_v9 = vld [vmem:[%s138_s1] sm:$0xff]  ;;  %v22_v10 = vld [vmem:[%s138_s1 + $0x8] sm:$0xff] }
   0x4   :  { %45 = vmatpush.bf16.msra.mxu0 %v32_v3  ;;  %v29_v11 = vpack.c.bf16 %v22_v10, %v21_v9  ;;  %v18_v12 = vld [vmem:[%s140_s0] sm:$0xff]  ;;  %v19_v13 = vld [vmem:[%s140_s0 + $0x8] sm:$0xff] }
   0x5   :  { %v20_v14 = vpack.c.bf16 %v19_v13, %v18_v12  ;;  %v67_v15 = vld [vmem:[%s139_s2] ss:$0 sm:$0xff]  ;;  %v56_v21 = vld [vmem:[%s141_s3 + $0x8] sm:$0xff] }
   0x6   :  { %v55_v17 = vld [vmem:[%s141_s3] sm:$0xff] }
   0x8   :  { %46 = vmatpush.bf16.msra.mxu0 %v31_v5 }
   0xc   :  { %47 = vmatpush.bf16.msra.mxu0 %v30_v8 }
  0x10   :  { %48 = vmatpush.bf16.msra.mxu0 %v29_v11 }
  0x13   :  { %66 = vmatmul.msk.bf16.vlgmr.msra.gmra.mxu0 %vm37_vm0, %v20_v14 }
  0x90   :  { %v50_v16 = vpop.f32.mrf.mxu0 }
  0x91   :  { %v51_v18 = vadd.f32 %v67_v15, %v50_v16 }
  0x93   :  { %v57_v19 = vadd.f32 %v55_v17, %v51_v18 }
  0x95   :  { %60 = vst.msk [vmem:[%s142_s4] sm:$0xff] %vm59_vm1, %v57_v19 }
  0x98   :  { %v52_v20 = vpop.f32.mrf.mxu0 }
  0x99   :  { %v53_v22 = vadd.f32 %v67_v15, %v52_v20 }
  0x9b   :  { %v58_v23 = vadd.f32 %v56_v21, %v53_v22 }
  0x9d   :  { %61 = vst.msk [vmem:[%s142_s4 + $0x8] sm:$0xff] %vm59_vm1, %v58_v23 }

// kernel: decoder_forward_pallas.37
= control target key start
LH: loop header
LB: loop body
LE: loop exit
PB: predicated region body
PF: predicated region fallthrough
CT: control target
= control target key end

     0   :  { %vm17_vm0 = vcmask 261120   ;;  %s184_s0 = inlined_call_operand.vmem [shape: f32[16,32], index: 0, kind: input, shape index: {}]   ;;  %s185_s1 = inlined_call_operand.vmem [shape: f32[1,32], index: 1, kind: input, shape index: {}]   ;;  %s186_s2 = inlined_call_operand.vmem [shape: f32[1,32], index: 2, kind: input, shape index: {}]   ;;  %s187_s3 = inlined_call_operand.hbm [shape: f32[16,32], index: 3, kind: output, shape index: {}]  }
   0x1   :  { %v15_v0 = vld [vmem:[%s184_s0] sm:$0xff] }
   0x2   :  { %v18_v1 = vsel %vm17_vm0, %v15_v0, 0.0 }
   0x3   :  { %8 = vsyncpa [#allocation3], 0  ;;  %19 = vadd.xlane.f32.xlu0 %v18_v1  ;;  %v16_v2 = vld [vmem:[%s184_s0 + $0x8] sm:$0xff]  ;;  %v139_v4 = vmov 32.0   ;;  %v105_v35 = vld [vmem:[%s185_s1] ss:$0 sm:$0xff] }
   0x4   :  { %v21_v3 = vsel %vm17_vm0, %v16_v2, 0.0  ;;  %107 = vrcp.f32 %v139_v4  ;;  %v106_v39 = vld [vmem:[%s186_s2] ss:$0 sm:$0xff]  ;;  %s140_s1 = smov [#allocation2]   ;;  %s89_s22 = sshll.u32 %s187_s3, 4  ;;  %s90_s22 = int_to_ptr.hbm [resolvable:$true] %s89_s22 }
   0x5   :  { %s87_s19 = sshll.u32 %s140_s1, 4  ;;  %s141_s2 = smov 128   ;;  %s88_s19 = int_to_ptr.vmem [resolvable:$true] %s87_s19 }
   0x6   :  { %s142_s23 = smov 8  }
   0xa   :  { %v108_v5 = vpop.eup %107 }
   0xb   :  { %22 = vadd.xlane.f32.xlu0 %v21_v3  ;;  %v25_v6 = vmul.f32 32.0, %v108_v5  ;;  %vm29_vm1 = vweird.f32 %v108_v5 }
   0xd   :  { %v26_v7 = vsub.f32 1.0, %v25_v6 }
   0xf   :  { %v27_v8 = vmul.f32 %v108_v5, %v26_v7 }
  0x11   :  { %v28_v9 = vadd.f32 %v108_v5, %v27_v8 }
  0x13   :  { %v30_v10 = vsel %vm29_vm1, %v108_v5, %v28_v9 }
  0x76   :  { %v20_v11 = vpop.xlane.xlu0 %19 }
  0x77   :  { %v31_v12 = vmul.f32 %v30_v10, %v20_v11 }
  0x79   :  { %v33_v13 = vsub.f32 %v15_v0, %v31_v12 }
  0x7b   :  { %v35_v14 = vmul.f32 %v33_v13, %v33_v13 }
  0x7d   :  { %v37_v15 = vsel %vm17_vm0, %v35_v14, 0.0 }
  0x7e   :  { %38 = vadd.xlane.f32.xlu1 %v37_v15  ;;  %v23_v16 = vpop.xlane.xlu0 %22 }
  0x7f   :  { %v32_v17 = vmul.f32 %v30_v10, %v23_v16 }
  0x81   :  { %v34_v18 = vsub.f32 %v16_v2, %v32_v17 }
  0x83   :  { %v36_v19 = vmul.f32 %v34_v18, %v34_v18 }
  0x85   :  { %v40_v20 = vsel %vm17_vm0, %v36_v19, 0.0 }
  0x86   :  { %41 = vadd.xlane.f32.xlu1 %v40_v20 }
  0xf1   :  { %v39_v21 = vpop.xlane.xlu1 %38 }
  0xf2   :  { %v43_v22 = vmul.f32 %v39_v21, %v30_v10 }
  0xf4   :  { %v45_v23 = vadd.f32 1e-06, %v43_v22 }
  0xf6   :  { %109 = vrsqrt.f32 %v45_v23  ;;  %vm53_vm3 = vweird.f32 %v45_v23 }
  0xf9   :  { %v42_v24 = vpop.xlane.xlu1 %41 }
  0xfa   :  { %v44_v25 = vmul.f32 %v42_v24, %v30_v10 }
  0xfc   :  { %v110_v26 = vpop.eup %109  ;;  %v46_v27 = vadd.f32 1e-06, %v44_v25 }
  0xfd   :  { %v48_v28 = vmul.f32 %v110_v26, %v45_v23  ;;  %vm54_vm2 = vweird.f32 %v110_v26 }
  0xfe   :  { %111 = vrsqrt.f32 %v46_v27  ;;  %vm55_vm4 = vmor %vm53_vm3, %vm54_vm2  ;;  %vm63_vm6 = vweird.f32 %v46_v27 }
  0xff   :  { %v49_v29 = vmul.f32 %v110_v26, %v48_v28 }
 0x101   :  { %v50_v30 = vmul.f32 0.5, %v49_v29 }
 0x103   :  { %v51_v31 = vsub.f32 1.5, %v50_v30 }
 0x104   :  { %v112_v32 = vpop.eup %111 }
 0x105   :  { %v52_v33 = vmul.f32 %v110_v26, %v51_v31  ;;  %v58_v34 = vmul.f32 %v112_v32, %v46_v27  ;;  %vm64_vm5 = vweird.f32 %v112_v32 }
 0x106   :  { %vm65_vm7 = vmor %vm63_vm6, %vm64_vm5 }
 0x107   :  { %v56_v36 = vsel %vm55_vm4, %v110_v26, %v52_v33  ;;  %v59_v37 = vmul.f32 %v112_v32, %v58_v34 }
 0x108   :  { %v67_v38 = vmul.f32 %v56_v36, %v33_v13 }
 0x109   :  { %v60_v40 = vmul.f32 0.5, %v59_v37 }
 0x10a   :  { %v73_v41 = vmul.f32 %v105_v35, %v67_v38 }
 0x10b   :  { %v61_v42 = vsub.f32 1.5, %v60_v40 }
 0x10c   :  { %v79_v43 = vadd.f32 %v106_v39, %v73_v41 }
 0x10d   :  { %v62_v44 = vmul.f32 %v112_v32, %v61_v42 }
 0x10e   :  { %81 = vst.msk [vmem:[#allocation2] sm:$0xff] %vm17_vm0, %v79_v43 }
 0x10f   :  { %v66_v45 = vsel %vm65_vm7, %v112_v32, %v62_v44 }
 0x110   :  { %v68_v46 = vmul.f32 %v66_v45, %v34_v18 }
 0x112   :  { %v74_v47 = vmul.f32 %v105_v35, %v68_v46 }
 0x114   :  { %v80_v48 = vadd.f32 %v106_v39, %v74_v47 }
 0x116   :  { %82 = vst.msk [vmem:[#allocation2 + $0x8] sm:$0xff] %vm17_vm0, %v80_v48 }
 0x117   :  { %95 = dma.vmem_to_hbm [thread:$0]  %s88_s19, 256, %s90_s22, [#allocation3], %s141_s2, %s141_s2, %s142_s23  }
 0x118   :  { %137 = dma.done.wait [#allocation3], 256  }
 0x119   :  { %138 = vsyncadd [#allocation3], 4294967040 }
 0x11a   :  { %100 = vsyncpa [#allocation3], 1 }

</bundles_post_ra>
